<compile_context>
chip_gen: v5e
topology: v5e:2x2
jax: 0.10.0
libtpu: 0.0.40
codegen_flags: <defaults>
</compile_context>

<pallas_src>
import jax
import jax.numpy as jnp
from jax import lax
from jax.experimental import pallas as pl
from jax.experimental.pallas import tpu as pltpu

# ----------------------------- config -------------------------------------
FILTER_SIZE1 = 3
FILTER_SIZE2 = 3
PADDING1 = 1
PADDING2 = 1
N_NOTE = 8
NUM_FEATURES1 = 4
NUM_FEATURES2 = 4
NUM_FEATURES3 = 32
NUM_FEATURES4 = 32
POOLING_SIZE = (1, 2, 2)   # MaxPool3d kernel/stride -> pure 2x2 spatial pool


# --------------------------- fused Pallas kernel ----------------------------
def _net_kernel(xp_ref, w1_ref, b1_ref, w2_ref, b2_ref,
                ce1_ref, co1_ref, re1_ref, ro1_ref,
                ce2_ref, co2_ref, re2_ref, ro2_ref,
                w3p_ref, b3_ref, w4p_ref, b4_ref, w5b_ref, b5_ref,
                out_ref):
    # One grid step == BB batch elements (conv/pool per-sample, LSTM batched).
    f32 = jnp.float32
    BB = xp_ref.shape[0]
    F1 = b1_ref.shape[0]
    F2 = b2_ref.shape[0]
    H1 = xp_ref.shape[1] - 2 * PADDING1      # 16
    W1 = xp_ref.shape[2] - 2 * PADDING1      # 96
    H2, W2 = H1 // 2, W1 // 2                # 8, 48
    H3, W3 = H2 // 2, W2 // 2                # 4, 24
    T = H3
    K1, K2 = FILTER_SIZE1, FILTER_SIZE2
    F3 = w3p_ref.shape[0] - F2 * W3          # packed rows = In + F3
    F4 = w4p_ref.shape[0] - F3               # packed rows = F3 + F4

    def elu(a):
        # exp only on the non-positive branch (no inf in the discarded lane).
        return jnp.where(a > 0, a, jnp.exp(jnp.minimum(a, 0.0)) - 1.0)

    # Selection matrices (DMA'd once, constant block index => resident).
    ce1 = ce1_ref[...]; co1 = co1_ref[...]
    re1 = re1_ref[...]; ro1 = ro1_ref[...]
    ce2 = ce2_ref[...]; co2 = co2_ref[...]
    re2 = re2_ref[...]; ro2 = ro2_ref[...]

    xin_list = []
    for b in range(BB):
        # -------------- conv1 (1 -> F1, 3x3, pad 1) + ELU -------------------
        xpad = xp_ref[b]                                  # (H1+2, W1+2)
        acc1 = [jnp.full((H1, W1), b1_ref[co], f32) for co in range(F1)]
        for dh in range(K1):
            for dw in range(K1):
                patch = xpad[dh:dh + H1, dw:dw + W1]      # hoisted over co
                for co in range(F1):
                    acc1[co] = acc1[co] + w1_ref[(co * K1 + dh) * K1 + dw] * patch
        stack1 = jnp.concatenate([elu(a) for a in acc1], axis=0)   # (F1*H1, W1)

        # -------------- pool1 (2x2): 4 channel-batched selection matmuls ----
        # conv2's zero halo is fused into the selectors -> padded planes.
        xw1 = jnp.maximum(jnp.dot(stack1, ce1, preferred_element_type=f32),
                          jnp.dot(stack1, co1, preferred_element_type=f32))
        pp1 = jnp.maximum(jnp.dot(re1, xw1, preferred_element_type=f32),
                          jnp.dot(ro1, xw1, preferred_element_type=f32))
        # pp1: (F1*(H2+2), W2+2), per-channel zero-padded pooled planes.

        # -------------- conv2 (F1 -> F2, 3x3, pad 1) + ELU -------------------
        acc2 = [jnp.full((H2, W2), b2_ref[co], f32) for co in range(F2)]
        for ci in range(F1):
            plane = pp1[ci * (H2 + 2):(ci + 1) * (H2 + 2), :]
            for dh in range(K2):
                for dw in range(K2):
                    patch = plane[dh:dh + H2, dw:dw + W2]  # hoisted over co
                    for co in range(F2):
                        widx = ((co * F1 + ci) * K2 + dh) * K2 + dw
                        acc2[co] = acc2[co] + w2_ref[widx] * patch
        stack2 = jnp.concatenate([elu(a) for a in acc2], axis=0)   # (F2*H2, W2)

        # -------------- pool2 (2x2): 4 channel-batched selection matmuls ----
        xw2 = jnp.maximum(jnp.dot(stack2, ce2, preferred_element_type=f32),
                          jnp.dot(stack2, co2, preferred_element_type=f32))
        p2 = jnp.maximum(jnp.dot(re2, xw2, preferred_element_type=f32),
                         jnp.dot(ro2, xw2, preferred_element_type=f32))
        # p2: (F2*H3, W3), row index = co*H3 + t.

        # LSTM input for this sample: (T, F2*W3), column index = co*W3 + j.
        xin_list.append(jnp.concatenate(
            [p2[co * H3:(co + 1) * H3, :] for co in range(F2)], axis=1))

    # -------------- LSTM3 + LSTM4, batched across BB samples ----------------
    w3p = w3p_ref[...]; b3 = b3_ref[...]
    w4p = w4p_ref[...]; b4 = b4_ref[...]

    def gates(g, hd):
        return (jax.nn.sigmoid(g[:, 0:hd]),               # i
                jax.nn.sigmoid(g[:, hd:2 * hd]),          # f
                jnp.tanh(g[:, 2 * hd:3 * hd]),            # g
                jax.nn.sigmoid(g[:, 3 * hd:4 * hd]))      # o

    h3 = jnp.zeros((BB, F3), f32); c3 = jnp.zeros((BB, F3), f32)
    h4 = jnp.zeros((BB, F4), f32); c4 = jnp.zeros((BB, F4), f32)
    h4_seq = []
    for t in range(T):
        x_t = jnp.concatenate([xin_list[b][t:t + 1, :] for b in range(BB)],
                              axis=0)                     # (BB, F2*W3)
        g3 = jnp.dot(jnp.concatenate([x_t, h3], axis=1), w3p,
                     preferred_element_type=f32) + b3     # one dot, K=In+F3
        i3, f3g, g3g, o3 = gates(g3, F3)
        c3 = f3g * c3 + i3 * g3g
        h3 = o3 * jnp.tanh(c3)

        g4 = jnp.dot(jnp.concatenate([h3, h4], axis=1), w4p,
                     preferred_element_type=f32) + b4     # one dot, K=F3+F4
        i4, f4g, g4g, o4 = gates(g4, F4)
        c4 = f4g * c4 + i4 * g4g
        h4 = o4 * jnp.tanh(c4)
        h4_seq.append(h4)

    # -------------- fused 1x1-conv head: ONE matmul, lane-flat store --------
    h4cat = jnp.concatenate(h4_seq, axis=1)               # (BB, T*F4)
    res = jnp.dot(h4cat, w5b_ref[...], preferred_element_type=f32) + b5_ref[...]
    out_ref[:, 0, :] = res                                # (BB, T*N_NOTE)


# --------------------------- host-side helpers -------------------------------
def _const_spec(shape):
    zeros = (0,) * len(shape)
    return pl.BlockSpec(shape, lambda i, z=zeros: z)


def _col_selector(w_in, w_out, off, pad):
    # (w_in, w_out + 2*pad) 0/1 matrix: column c picks input column
    # 2*(c-pad)+off for c in [pad, w_out+pad); pad columns are all-zero.
    r = jnp.arange(w_in)[:, None]
    c = jnp.arange(w_out + 2 * pad)[None, :]
    valid = (c >= pad) & (c < w_out + pad)
    return jnp.where(valid & (r == 2 * (c - pad) + off), 1.0, 0.0).astype(jnp.float32)


def _row_selector(n_blk, h_in, h_out, off, pad):
    # Block-diagonal over n_blk channel blocks: output row (blk, rr) picks
    # input row blk*h_in + 2*(rr-pad)+off for rr in [pad, h_out+pad).
    rows = n_blk * (h_out + 2 * pad)
    cols = n_blk * h_in
    r = jnp.arange(rows)[:, None]
    c = jnp.arange(cols)[None, :]
    blk = r // (h_out + 2 * pad)
    rr = r % (h_out + 2 * pad)
    valid = (rr >= pad) & (rr < h_out + pad)
    return jnp.where(valid & (c == blk * h_in + 2 * (rr - pad) + off),
                     1.0, 0.0).astype(jnp.float32)


# --------------------------- wrapper -----------------------------------------
def net_forward(x, p, block_batch=1):
    n, cin, h, w = x.shape
    f1, f2, f3, f4 = NUM_FEATURES1, NUM_FEATURES2, NUM_FEATURES3, NUM_FEATURES4
    assert cin == 1
    assert h % 4 == 0 and w % 4 == 0, "two 2x2 pools need H, W divisible by 4"
    assert n % block_batch == 0, "batch must be divisible by block_batch"
    t_len = h // 4
    w3 = w // 4
    assert p['w_ih3'].shape[1] == f2 * w3, "LSTM3 input size must match C2*W/4"

    hp, wp = h + 2 * PADDING1, w + 2 * PADDING1
    xp = jnp.pad(x[:, 0], ((0, 0), (PADDING1, PADDING1), (PADDING1, PADDING1)))

    # Pool selection matrices (built once; conv2 halo fused into pool1's).
    ce1 = _col_selector(w, w // 2, 0, PADDING2)
    co1 = _col_selector(w, w // 2, 1, PADDING2)
    re1 = _row_selector(f1, h, h // 2, 0, PADDING2)
    ro1 = _row_selector(f1, h, h // 2, 1, PADDING2)
    ce2 = _col_selector(w // 2, w3, 0, 0)
    co2 = _col_selector(w // 2, w3, 1, 0)
    re2 = _row_selector(f2, h // 2, t_len, 0, 0)
    ro2 = _row_selector(f2, h // 2, t_len, 1, 0)

    # Packed LSTM weights: gates (i,f,g,o) concatenated along lanes,
    # [input-proj ; hidden-proj] stacked along the contraction dim.
    w3p = jnp.concatenate([p['w_ih3'].T, p['w_hh3'].T], axis=0)   # (In+F3, 4F3)
    b3 = (p['b_ih3'] + p['b_hh3']).reshape(1, 4 * f3)
    w4p = jnp.concatenate([p['w_ih4'].T, p['w_hh4'].T], axis=0)   # (F3+F4, 4F4)
    b4 = (p['b_ih4'] + p['b_hh4']).reshape(1, 4 * f4)

    # Block-diagonal head weight -> whole 1x1-conv head is one matmul.
    w5t = p['w5'].reshape(N_NOTE, f4).T                            # (F4, n_note)
    w5b = jnp.kron(jnp.eye(t_len, dtype=jnp.float32), w5t)        # (T*F4, T*n_note)
    b5 = jnp.tile(p['b5_raw'], (t_len,)).reshape(1, t_len * N_NOTE)

    smem = pl.BlockSpec(memory_space=pltpu.MemorySpace.SMEM)
    bb = block_batch
    out = pl.pallas_call(
        _net_kernel,
        out_shape=jax.ShapeDtypeStruct((n, 1, t_len * N_NOTE), jnp.float32),
        grid=(n // bb,),
        in_specs=[
            pl.BlockSpec((bb, hp, wp), lambda i: (i, 0, 0)),      # padded input
            smem, smem,                                            # w1 (flat), b1
            smem, smem,                                            # w2 (flat), b2
            _const_spec(ce1.shape), _const_spec(co1.shape),
            _const_spec(re1.shape), _const_spec(ro1.shape),
            _const_spec(ce2.shape), _const_spec(co2.shape),
            _const_spec(re2.shape), _const_spec(ro2.shape),
            _const_spec(w3p.shape), _const_spec(b3.shape),
            _const_spec(w4p.shape), _const_spec(b4.shape),
            _const_spec(w5b.shape), _const_spec(b5.shape),
        ],
        out_specs=pl.BlockSpec((bb, 1, t_len * N_NOTE), lambda i: (i, 0, 0)),
        compiler_params=pltpu.CompilerParams(
            dimension_semantics=("parallel",)),
    )(xp, p['w1'].reshape(-1), p['b1'], p['w2'].reshape(-1), p['b2'],
      ce1, co1, re1, ro1, ce2, co2, re2, ro2, w3p, b3, w4p, b4, w5b, b5)

    # (B, 1, T*n_note) -> (B, n_note, T, 1)   (layout plumbing in the wrapper)
    out = out.reshape(n, t_len, N_NOTE)
    return jnp.transpose(out, (0, 2, 1))[..., None]


# ---------------------- pure-JAX reference (for checking) -------------------
def net_forward_ref(x, p):
    prec = lax.Precision.HIGHEST

    def conv(x, w, b, pad):
        y = lax.conv_general_dilated(
            x, w, (1, 1), ((pad, pad), (pad, pad)),
            dimension_numbers=('NCHW', 'OIHW', 'NCHW'), precision=prec)
        y = y + b[None, :, None, None]
        return jnp.where(y > 0, y, jnp.exp(jnp.minimum(y, 0.0)) - 1.0)

    def pool(x):
        return lax.reduce_window(x, -jnp.inf, lax.max,
                                 (1, 1, 2, 2), (1, 1, 2, 2), 'VALID')

    def lstm(xs, w_ih, w_hh, b_ih, b_hh):
        _, bsz, _ = xs.shape
        hid = w_hh.shape[1]

        def step(carry, x_t):
            h, c = carry
            gates = x_t @ w_ih.T + h @ w_hh.T + b_ih + b_hh
            i, f, g, o = jnp.split(gates, 4, axis=-1)
            c = jax.nn.sigmoid(f) * c + jax.nn.sigmoid(i) * jnp.tanh(g)
            h = jax.nn.sigmoid(o) * jnp.tanh(c)
            return (h, c), h

        init = (jnp.zeros((bsz, hid), jnp.float32),
                jnp.zeros((bsz, hid), jnp.float32))
        _, ys = lax.scan(step, init, xs)
        return ys

    x = conv(x, p['w1'], p['b1'], PADDING1)
    x = pool(x)
    x = conv(x, p['w2'], p['b2'], PADDING2)
    x = pool(x)
    n, c2, h2, w2 = x.shape
    x = jnp.transpose(x, (2, 0, 1, 3)).reshape(h2, n, c2 * w2)
    x = lstm(x, p['w_ih3'], p['w_hh3'], p['b_ih3'], p['b_hh3'])
    x = lstm(x, p['w_ih4'], p['w_hh4'], p['b_ih4'], p['b_hh4'])
    t_len, _, f4 = x.shape
    y = jnp.einsum('tbf,nf->tbn', x, p['w5'].reshape(N_NOTE, f4),
                   precision=prec) + p['b5_raw']
    return jnp.transpose(y, (1, 2, 0))[..., None]


# ------------------------------ params --------------------------------------
def init_params(key):
    ks = jax.random.split(key, 14)

    def u(k, shape, scale):
        return jax.random.uniform(k, shape, jnp.float32, -scale, scale)

    f1, f2, f3, f4 = NUM_FEATURES1, NUM_FEATURES2, NUM_FEATURES3, NUM_FEATURES4
    in3 = f2 * 24
    p = {}
    s1 = 1.0 / (1 * FILTER_SIZE1 * FILTER_SIZE1) ** 0.5
    p['w1'] = u(ks[0], (f1, 1, FILTER_SIZE1, FILTER_SIZE1), s1)
    p['b1'] = u(ks[1], (f1,), s1)
    s2 = 1.0 / (f1 * FILTER_SIZE2 * FILTER_SIZE2) ** 0.5
    p['w2'] = u(ks[2], (f2, f1, FILTER_SIZE2, FILTER_SIZE2), s2)
    p['b2'] = u(ks[3], (f2,), s2)
    s3 = 1.0 / f3 ** 0.5
    p['w_ih3'] = u(ks[4], (4 * f3, in3), s3)
    p['w_hh3'] = u(ks[5], (4 * f3, f3), s3)
    p['b_ih3'] = u(ks[6], (4 * f3,), s3)
    p['b_hh3'] = u(ks[7], (4 * f3,), s3)
    s4 = 1.0 / f4 ** 0.5
    p['w_ih4'] = u(ks[8], (4 * f4, f3), s4)
    p['w_hh4'] = u(ks[9], (4 * f4, f4), s4)
    p['b_ih4'] = u(ks[10], (4 * f4,), s4)
    p['b_hh4'] = u(ks[11], (4 * f4,), s4)
    s5 = 1.0 / f4 ** 0.5
    p['w5'] = u(ks[12], (N_NOTE, f4, 1, 1), s5)
    p['b5_raw'] = u(ks[13], (N_NOTE,), s5)
    return p


# ------------------------------- main ---------------------------------------
if __name__ == "__main__":
    key = jax.random.PRNGKey(0)
    kx, kp, kx2 = jax.random.split(key, 3)
    params = init_params(kp)

    fwd = jax.jit(net_forward, static_argnames="block_batch")
    ref_fn = jax.jit(net_forward_ref)

    # Case 1: batch=2, BB=1 -> grid=(2,): one sample per v7x TensorCore.
    x = jax.random.normal(kx, (2, 1, 16, 96), jnp.float32)
    out = jax.block_until_ready(fwd(x, params, block_batch=1))
    assert out.shape == (2, N_NOTE, 4, 1), out.shape
    assert bool(jnp.all(jnp.isfinite(out)))
    with jax.default_matmul_precision("highest"):
        ref = jax.block_until_ready(ref_fn(x, params))
    err1 = float(jnp.max(jnp.abs(out - ref)))
    assert jnp.allclose(out, ref, atol=3e-2, rtol=3e-2), err1

    # Case 2: batch=8, BB=4 -> grid=(2,): batched LSTM/head matmuls (M=4).
    x2 = jax.random.normal(kx2, (8, 1, 16, 96), jnp.float32)
    out2 = jax.block_until_ready(fwd(x2, params, block_batch=4))
    assert out2.shape == (8, N_NOTE, 4, 1), out2.shape
    with jax.default_matmul_precision("highest"):
        ref2 = jax.block_until_ready(ref_fn(x2, params))
    err2 = float(jnp.max(jnp.abs(out2 - ref2)))
    assert jnp.allclose(out2, ref2, atol=3e-2, rtol=3e-2), err2

    print("KERNEL_OK")
</pallas_src>

<mosaic_0001>
module attributes {stable_mosaic.version = 11 : i64} {
  func.func @_net_kernel(%arg0: i32, %arg1: memref<1x18x98xf32, #tpu.memory_space<vmem>>, %arg2: memref<36xf32, #tpu.memory_space<smem>>, %arg3: memref<4xf32, #tpu.memory_space<smem>>, %arg4: memref<144xf32, #tpu.memory_space<smem>>, %arg5: memref<4xf32, #tpu.memory_space<smem>>, %arg6: memref<96x50xf32, #tpu.memory_space<vmem>>, %arg7: memref<96x50xf32, #tpu.memory_space<vmem>>, %arg8: memref<40x64xf32, #tpu.memory_space<vmem>>, %arg9: memref<40x64xf32, #tpu.memory_space<vmem>>, %arg10: memref<48x24xf32, #tpu.memory_space<vmem>>, %arg11: memref<48x24xf32, #tpu.memory_space<vmem>>, %arg12: memref<16x32xf32, #tpu.memory_space<vmem>>, %arg13: memref<16x32xf32, #tpu.memory_space<vmem>>, %arg14: memref<128x128xf32, #tpu.memory_space<vmem>>, %arg15: memref<1x128xf32, #tpu.memory_space<vmem>>, %arg16: memref<64x128xf32, #tpu.memory_space<vmem>>, %arg17: memref<1x128xf32, #tpu.memory_space<vmem>>, %arg18: memref<128x32xf32, #tpu.memory_space<vmem>>, %arg19: memref<1x32xf32, #tpu.memory_space<vmem>>, %arg20: memref<1x1x32xf32, #tpu.memory_space<vmem>>) attributes {dimension_semantics = [#tpu.dimension_semantics<parallel>], iteration_bounds = array<i64: 2>, scalar_prefetch = 0 : i64, scratch_operands = 0 : i64, tpu.core_type = #tpu.core_type<tc>, window_params = [{transform_indices = @transform_0, window_bounds = array<i64: 1, 18, 98>}, {transform_indices = @transform_1, window_bounds = array<i64: 36>}, {transform_indices = @transform_2, window_bounds = array<i64: 4>}, {transform_indices = @transform_3, window_bounds = array<i64: 144>}, {transform_indices = @transform_4, window_bounds = array<i64: 4>}, {pipeline_mode = #tpu.pipeline_mode<synchronous>, transform_indices = @transform_5, window_bounds = array<i64: 96, 50>}, {pipeline_mode = #tpu.pipeline_mode<synchronous>, transform_indices = @transform_6, window_bounds = array<i64: 96, 50>}, {pipeline_mode = #tpu.pipeline_mode<synchronous>, transform_indices = @transform_7, window_bounds = array<i64: 40, 64>}, {pipeline_mode = #tpu.pipeline_mode<synchronous>, transform_indices = @transform_8, window_bounds = array<i64: 40, 64>}, {pipeline_mode = #tpu.pipeline_mode<synchronous>, transform_indices = @transform_9, window_bounds = array<i64: 48, 24>}, {pipeline_mode = #tpu.pipeline_mode<synchronous>, transform_indices = @transform_10, window_bounds = array<i64: 48, 24>}, {pipeline_mode = #tpu.pipeline_mode<synchronous>, transform_indices = @transform_11, window_bounds = array<i64: 16, 32>}, {pipeline_mode = #tpu.pipeline_mode<synchronous>, transform_indices = @transform_12, window_bounds = array<i64: 16, 32>}, {pipeline_mode = #tpu.pipeline_mode<synchronous>, transform_indices = @transform_13, window_bounds = array<i64: 128, 128>}, {pipeline_mode = #tpu.pipeline_mode<synchronous>, transform_indices = @transform_14, window_bounds = array<i64: 1, 128>}, {pipeline_mode = #tpu.pipeline_mode<synchronous>, transform_indices = @transform_15, window_bounds = array<i64: 64, 128>}, {pipeline_mode = #tpu.pipeline_mode<synchronous>, transform_indices = @transform_16, window_bounds = array<i64: 1, 128>}, {pipeline_mode = #tpu.pipeline_mode<synchronous>, transform_indices = @transform_17, window_bounds = array<i64: 128, 32>}, {pipeline_mode = #tpu.pipeline_mode<synchronous>, transform_indices = @transform_18, window_bounds = array<i64: 1, 32>}, {transform_indices = @transform_19, window_bounds = array<i64: 1, 1, 32>}]} {
    %c0 = arith.constant 0 : index
    %c0_0 = arith.constant 0 : index
    %0 = vector.load %arg6[%c0, %c0_0] : memref<96x50xf32, #tpu.memory_space<vmem>>, vector<96x50xf32>
    %c0_1 = arith.constant 0 : index
    %c0_2 = arith.constant 0 : index
    %1 = vector.load %arg7[%c0_1, %c0_2] : memref<96x50xf32, #tpu.memory_space<vmem>>, vector<96x50xf32>
    %c0_3 = arith.constant 0 : index
    %c0_4 = arith.constant 0 : index
    %2 = vector.load %arg8[%c0_3, %c0_4] : memref<40x64xf32, #tpu.memory_space<vmem>>, vector<40x64xf32>
    %c0_5 = arith.constant 0 : index
    %c0_6 = arith.constant 0 : index
    %3 = vector.load %arg9[%c0_5, %c0_6] : memref<40x64xf32, #tpu.memory_space<vmem>>, vector<40x64xf32>
    %c0_7 = arith.constant 0 : index
    %c0_8 = arith.constant 0 : index
    %4 = vector.load %arg10[%c0_7, %c0_8] : memref<48x24xf32, #tpu.memory_space<vmem>>, vector<48x24xf32>
    %c0_9 = arith.constant 0 : index
    %c0_10 = arith.constant 0 : index
    %5 = vector.load %arg11[%c0_9, %c0_10] : memref<48x24xf32, #tpu.memory_space<vmem>>, vector<48x24xf32>
    %c0_11 = arith.constant 0 : index
    %c0_12 = arith.constant 0 : index
    %6 = vector.load %arg12[%c0_11, %c0_12] : memref<16x32xf32, #tpu.memory_space<vmem>>, vector<16x32xf32>
    %c0_13 = arith.constant 0 : index
    %c0_14 = arith.constant 0 : index
    %7 = vector.load %arg13[%c0_13, %c0_14] : memref<16x32xf32, #tpu.memory_space<vmem>>, vector<16x32xf32>
    %c0_15 = arith.constant 0 : index
    %c0_16 = arith.constant 0 : index
    %c0_17 = arith.constant 0 : index
    %8 = vector.load %arg1[%c0_15, %c0_16, %c0_17] : memref<1x18x98xf32, #tpu.memory_space<vmem>>, vector<1x18x98xf32>
    %9 = vector.shape_cast %8 : vector<1x18x98xf32> to vector<18x98xf32>
    %c0_18 = arith.constant 0 : index
    %10 = memref.load %arg3[%c0_18] : memref<4xf32, #tpu.memory_space<smem>>
    %11 = vector.broadcast %10 : f32 to vector<16x96xf32>
    %c1 = arith.constant 1 : index
    %12 = memref.load %arg3[%c1] : memref<4xf32, #tpu.memory_space<smem>>
    %13 = vector.broadcast %12 : f32 to vector<16x96xf32>
    %c2 = arith.constant 2 : index
    %14 = memref.load %arg3[%c2] : memref<4xf32, #tpu.memory_space<smem>>
    %15 = vector.broadcast %14 : f32 to vector<16x96xf32>
    %c3 = arith.constant 3 : index
    %16 = memref.load %arg3[%c3] : memref<4xf32, #tpu.memory_space<smem>>
    %17 = vector.broadcast %16 : f32 to vector<16x96xf32>
    %18 = vector.extract_strided_slice %9 {offsets = [0, 0], sizes = [16, 96], strides = [1, 1]} : vector<18x98xf32> to vector<16x96xf32>
    %c0_19 = arith.constant 0 : index
    %19 = memref.load %arg2[%c0_19] : memref<36xf32, #tpu.memory_space<smem>>
    %20 = vector.broadcast %19 : f32 to vector<16x96xf32>
    %21 = arith.mulf %20, %18 : vector<16x96xf32>
    %22 = arith.addf %11, %21 : vector<16x96xf32>
    %c9 = arith.constant 9 : index
    %23 = memref.load %arg2[%c9] : memref<36xf32, #tpu.memory_space<smem>>
    %24 = vector.broadcast %23 : f32 to vector<16x96xf32>
    %25 = arith.mulf %24, %18 : vector<16x96xf32>
    %26 = arith.addf %13, %25 : vector<16x96xf32>
    %c18 = arith.constant 18 : index
    %27 = memref.load %arg2[%c18] : memref<36xf32, #tpu.memory_space<smem>>
    %28 = vector.broadcast %27 : f32 to vector<16x96xf32>
    %29 = arith.mulf %28, %18 : vector<16x96xf32>
    %30 = arith.addf %15, %29 : vector<16x96xf32>
    %c27 = arith.constant 27 : index
    %31 = memref.load %arg2[%c27] : memref<36xf32, #tpu.memory_space<smem>>
    %32 = vector.broadcast %31 : f32 to vector<16x96xf32>
    %33 = arith.mulf %32, %18 : vector<16x96xf32>
    %34 = arith.addf %17, %33 : vector<16x96xf32>
    %35 = vector.extract_strided_slice %9 {offsets = [0, 1], sizes = [16, 96], strides = [1, 1]} : vector<18x98xf32> to vector<16x96xf32>
    %c1_20 = arith.constant 1 : index
    %36 = memref.load %arg2[%c1_20] : memref<36xf32, #tpu.memory_space<smem>>
    %37 = vector.broadcast %36 : f32 to vector<16x96xf32>
    %38 = arith.mulf %37, %35 : vector<16x96xf32>
    %39 = arith.addf %22, %38 : vector<16x96xf32>
    %c10 = arith.constant 10 : index
    %40 = memref.load %arg2[%c10] : memref<36xf32, #tpu.memory_space<smem>>
    %41 = vector.broadcast %40 : f32 to vector<16x96xf32>
    %42 = arith.mulf %41, %35 : vector<16x96xf32>
    %43 = arith.addf %26, %42 : vector<16x96xf32>
    %c19 = arith.constant 19 : index
    %44 = memref.load %arg2[%c19] : memref<36xf32, #tpu.memory_space<smem>>
    %45 = vector.broadcast %44 : f32 to vector<16x96xf32>
    %46 = arith.mulf %45, %35 : vector<16x96xf32>
    %47 = arith.addf %30, %46 : vector<16x96xf32>
    %c28 = arith.constant 28 : index
    %48 = memref.load %arg2[%c28] : memref<36xf32, #tpu.memory_space<smem>>
    %49 = vector.broadcast %48 : f32 to vector<16x96xf32>
    %50 = arith.mulf %49, %35 : vector<16x96xf32>
    %51 = arith.addf %34, %50 : vector<16x96xf32>
    %52 = vector.extract_strided_slice %9 {offsets = [0, 2], sizes = [16, 96], strides = [1, 1]} : vector<18x98xf32> to vector<16x96xf32>
    %c2_21 = arith.constant 2 : index
    %53 = memref.load %arg2[%c2_21] : memref<36xf32, #tpu.memory_space<smem>>
    %54 = vector.broadcast %53 : f32 to vector<16x96xf32>
    %55 = arith.mulf %54, %52 : vector<16x96xf32>
    %56 = arith.addf %39, %55 : vector<16x96xf32>
    %c11 = arith.constant 11 : index
    %57 = memref.load %arg2[%c11] : memref<36xf32, #tpu.memory_space<smem>>
    %58 = vector.broadcast %57 : f32 to vector<16x96xf32>
    %59 = arith.mulf %58, %52 : vector<16x96xf32>
    %60 = arith.addf %43, %59 : vector<16x96xf32>
    %c20 = arith.constant 20 : index
    %61 = memref.load %arg2[%c20] : memref<36xf32, #tpu.memory_space<smem>>
    %62 = vector.broadcast %61 : f32 to vector<16x96xf32>
    %63 = arith.mulf %62, %52 : vector<16x96xf32>
    %64 = arith.addf %47, %63 : vector<16x96xf32>
    %c29 = arith.constant 29 : index
    %65 = memref.load %arg2[%c29] : memref<36xf32, #tpu.memory_space<smem>>
    %66 = vector.broadcast %65 : f32 to vector<16x96xf32>
    %67 = arith.mulf %66, %52 : vector<16x96xf32>
    %68 = arith.addf %51, %67 : vector<16x96xf32>
    %69 = vector.extract_strided_slice %9 {offsets = [1, 0], sizes = [16, 96], strides = [1, 1]} : vector<18x98xf32> to vector<16x96xf32>
    %c3_22 = arith.constant 3 : index
    %70 = memref.load %arg2[%c3_22] : memref<36xf32, #tpu.memory_space<smem>>
    %71 = vector.broadcast %70 : f32 to vector<16x96xf32>
    %72 = arith.mulf %71, %69 : vector<16x96xf32>
    %73 = arith.addf %56, %72 : vector<16x96xf32>
    %c12 = arith.constant 12 : index
    %74 = memref.load %arg2[%c12] : memref<36xf32, #tpu.memory_space<smem>>
    %75 = vector.broadcast %74 : f32 to vector<16x96xf32>
    %76 = arith.mulf %75, %69 : vector<16x96xf32>
    %77 = arith.addf %60, %76 : vector<16x96xf32>
    %c21 = arith.constant 21 : index
    %78 = memref.load %arg2[%c21] : memref<36xf32, #tpu.memory_space<smem>>
    %79 = vector.broadcast %78 : f32 to vector<16x96xf32>
    %80 = arith.mulf %79, %69 : vector<16x96xf32>
    %81 = arith.addf %64, %80 : vector<16x96xf32>
    %c30 = arith.constant 30 : index
    %82 = memref.load %arg2[%c30] : memref<36xf32, #tpu.memory_space<smem>>
    %83 = vector.broadcast %82 : f32 to vector<16x96xf32>
    %84 = arith.mulf %83, %69 : vector<16x96xf32>
    %85 = arith.addf %68, %84 : vector<16x96xf32>
    %86 = vector.extract_strided_slice %9 {offsets = [1, 1], sizes = [16, 96], strides = [1, 1]} : vector<18x98xf32> to vector<16x96xf32>
    %c4 = arith.constant 4 : index
    %87 = memref.load %arg2[%c4] : memref<36xf32, #tpu.memory_space<smem>>
    %88 = vector.broadcast %87 : f32 to vector<16x96xf32>
    %89 = arith.mulf %88, %86 : vector<16x96xf32>
    %90 = arith.addf %73, %89 : vector<16x96xf32>
    %c13 = arith.constant 13 : index
    %91 = memref.load %arg2[%c13] : memref<36xf32, #tpu.memory_space<smem>>
    %92 = vector.broadcast %91 : f32 to vector<16x96xf32>
    %93 = arith.mulf %92, %86 : vector<16x96xf32>
    %94 = arith.addf %77, %93 : vector<16x96xf32>
    %c22 = arith.constant 22 : index
    %95 = memref.load %arg2[%c22] : memref<36xf32, #tpu.memory_space<smem>>
    %96 = vector.broadcast %95 : f32 to vector<16x96xf32>
    %97 = arith.mulf %96, %86 : vector<16x96xf32>
    %98 = arith.addf %81, %97 : vector<16x96xf32>
    %c31 = arith.constant 31 : index
    %99 = memref.load %arg2[%c31] : memref<36xf32, #tpu.memory_space<smem>>
    %100 = vector.broadcast %99 : f32 to vector<16x96xf32>
    %101 = arith.mulf %100, %86 : vector<16x96xf32>
    %102 = arith.addf %85, %101 : vector<16x96xf32>
    %103 = vector.extract_strided_slice %9 {offsets = [1, 2], sizes = [16, 96], strides = [1, 1]} : vector<18x98xf32> to vector<16x96xf32>
    %c5 = arith.constant 5 : index
    %104 = memref.load %arg2[%c5] : memref<36xf32, #tpu.memory_space<smem>>
    %105 = vector.broadcast %104 : f32 to vector<16x96xf32>
    %106 = arith.mulf %105, %103 : vector<16x96xf32>
    %107 = arith.addf %90, %106 : vector<16x96xf32>
    %c14 = arith.constant 14 : index
    %108 = memref.load %arg2[%c14] : memref<36xf32, #tpu.memory_space<smem>>
    %109 = vector.broadcast %108 : f32 to vector<16x96xf32>
    %110 = arith.mulf %109, %103 : vector<16x96xf32>
    %111 = arith.addf %94, %110 : vector<16x96xf32>
    %c23 = arith.constant 23 : index
    %112 = memref.load %arg2[%c23] : memref<36xf32, #tpu.memory_space<smem>>
    %113 = vector.broadcast %112 : f32 to vector<16x96xf32>
    %114 = arith.mulf %113, %103 : vector<16x96xf32>
    %115 = arith.addf %98, %114 : vector<16x96xf32>
    %c32 = arith.constant 32 : index
    %116 = memref.load %arg2[%c32] : memref<36xf32, #tpu.memory_space<smem>>
    %117 = vector.broadcast %116 : f32 to vector<16x96xf32>
    %118 = arith.mulf %117, %103 : vector<16x96xf32>
    %119 = arith.addf %102, %118 : vector<16x96xf32>
    %120 = vector.extract_strided_slice %9 {offsets = [2, 0], sizes = [16, 96], strides = [1, 1]} : vector<18x98xf32> to vector<16x96xf32>
    %c6 = arith.constant 6 : index
    %121 = memref.load %arg2[%c6] : memref<36xf32, #tpu.memory_space<smem>>
    %122 = vector.broadcast %121 : f32 to vector<16x96xf32>
    %123 = arith.mulf %122, %120 : vector<16x96xf32>
    %124 = arith.addf %107, %123 : vector<16x96xf32>
    %c15 = arith.constant 15 : index
    %125 = memref.load %arg2[%c15] : memref<36xf32, #tpu.memory_space<smem>>
    %126 = vector.broadcast %125 : f32 to vector<16x96xf32>
    %127 = arith.mulf %126, %120 : vector<16x96xf32>
    %128 = arith.addf %111, %127 : vector<16x96xf32>
    %c24 = arith.constant 24 : index
    %129 = memref.load %arg2[%c24] : memref<36xf32, #tpu.memory_space<smem>>
    %130 = vector.broadcast %129 : f32 to vector<16x96xf32>
    %131 = arith.mulf %130, %120 : vector<16x96xf32>
    %132 = arith.addf %115, %131 : vector<16x96xf32>
    %c33 = arith.constant 33 : index
    %133 = memref.load %arg2[%c33] : memref<36xf32, #tpu.memory_space<smem>>
    %134 = vector.broadcast %133 : f32 to vector<16x96xf32>
    %135 = arith.mulf %134, %120 : vector<16x96xf32>
    %136 = arith.addf %119, %135 : vector<16x96xf32>
    %137 = vector.extract_strided_slice %9 {offsets = [2, 1], sizes = [16, 96], strides = [1, 1]} : vector<18x98xf32> to vector<16x96xf32>
    %c7 = arith.constant 7 : index
    %138 = memref.load %arg2[%c7] : memref<36xf32, #tpu.memory_space<smem>>
    %139 = vector.broadcast %138 : f32 to vector<16x96xf32>
    %140 = arith.mulf %139, %137 : vector<16x96xf32>
    %141 = arith.addf %124, %140 : vector<16x96xf32>
    %c16 = arith.constant 16 : index
    %142 = memref.load %arg2[%c16] : memref<36xf32, #tpu.memory_space<smem>>
    %143 = vector.broadcast %142 : f32 to vector<16x96xf32>
    %144 = arith.mulf %143, %137 : vector<16x96xf32>
    %145 = arith.addf %128, %144 : vector<16x96xf32>
    %c25 = arith.constant 25 : index
    %146 = memref.load %arg2[%c25] : memref<36xf32, #tpu.memory_space<smem>>
    %147 = vector.broadcast %146 : f32 to vector<16x96xf32>
    %148 = arith.mulf %147, %137 : vector<16x96xf32>
    %149 = arith.addf %132, %148 : vector<16x96xf32>
    %c34 = arith.constant 34 : index
    %150 = memref.load %arg2[%c34] : memref<36xf32, #tpu.memory_space<smem>>
    %151 = vector.broadcast %150 : f32 to vector<16x96xf32>
    %152 = arith.mulf %151, %137 : vector<16x96xf32>
    %153 = arith.addf %136, %152 : vector<16x96xf32>
    %154 = vector.extract_strided_slice %9 {offsets = [2, 2], sizes = [16, 96], strides = [1, 1]} : vector<18x98xf32> to vector<16x96xf32>
    %c8 = arith.constant 8 : index
    %155 = memref.load %arg2[%c8] : memref<36xf32, #tpu.memory_space<smem>>
    %156 = vector.broadcast %155 : f32 to vector<16x96xf32>
    %157 = arith.mulf %156, %154 : vector<16x96xf32>
    %158 = arith.addf %141, %157 : vector<16x96xf32>
    %c17 = arith.constant 17 : index
    %159 = memref.load %arg2[%c17] : memref<36xf32, #tpu.memory_space<smem>>
    %160 = vector.broadcast %159 : f32 to vector<16x96xf32>
    %161 = arith.mulf %160, %154 : vector<16x96xf32>
    %162 = arith.addf %145, %161 : vector<16x96xf32>
    %c26 = arith.constant 26 : index
    %163 = memref.load %arg2[%c26] : memref<36xf32, #tpu.memory_space<smem>>
    %164 = vector.broadcast %163 : f32 to vector<16x96xf32>
    %165 = arith.mulf %164, %154 : vector<16x96xf32>
    %166 = arith.addf %149, %165 : vector<16x96xf32>
    %c35 = arith.constant 35 : index
    %167 = memref.load %arg2[%c35] : memref<36xf32, #tpu.memory_space<smem>>
    %168 = vector.broadcast %167 : f32 to vector<16x96xf32>
    %169 = arith.mulf %168, %154 : vector<16x96xf32>
    %170 = arith.addf %153, %169 : vector<16x96xf32>
    %cst = arith.constant 0.000000e+00 : f32
    %171 = vector.broadcast %cst : f32 to vector<16x96xf32>
    %172 = arith.cmpf ogt, %158, %171 : vector<16x96xf32>
    %cst_23 = arith.constant 0.000000e+00 : f32
    %173 = vector.broadcast %cst_23 : f32 to vector<16x96xf32>
    %174 = arith.minimumf %158, %173 : vector<16x96xf32>
    %175 = math.exp %174 : vector<16x96xf32>
    %cst_24 = arith.constant 1.000000e+00 : f32
    %176 = vector.broadcast %cst_24 : f32 to vector<16x96xf32>
    %177 = arith.subf %175, %176 : vector<16x96xf32>
    %178 = arith.select %172, %158, %177 : vector<16x96xi1>, vector<16x96xf32>
    %cst_25 = arith.constant 0.000000e+00 : f32
    %179 = vector.broadcast %cst_25 : f32 to vector<16x96xf32>
    %180 = arith.cmpf ogt, %162, %179 : vector<16x96xf32>
    %cst_26 = arith.constant 0.000000e+00 : f32
    %181 = vector.broadcast %cst_26 : f32 to vector<16x96xf32>
    %182 = arith.minimumf %162, %181 : vector<16x96xf32>
    %183 = math.exp %182 : vector<16x96xf32>
    %cst_27 = arith.constant 1.000000e+00 : f32
    %184 = vector.broadcast %cst_27 : f32 to vector<16x96xf32>
    %185 = arith.subf %183, %184 : vector<16x96xf32>
    %186 = arith.select %180, %162, %185 : vector<16x96xi1>, vector<16x96xf32>
    %cst_28 = arith.constant 0.000000e+00 : f32
    %187 = vector.broadcast %cst_28 : f32 to vector<16x96xf32>
    %188 = arith.cmpf ogt, %166, %187 : vector<16x96xf32>
    %cst_29 = arith.constant 0.000000e+00 : f32
    %189 = vector.broadcast %cst_29 : f32 to vector<16x96xf32>
    %190 = arith.minimumf %166, %189 : vector<16x96xf32>
    %191 = math.exp %190 : vector<16x96xf32>
    %cst_30 = arith.constant 1.000000e+00 : f32
    %192 = vector.broadcast %cst_30 : f32 to vector<16x96xf32>
    %193 = arith.subf %191, %192 : vector<16x96xf32>
    %194 = arith.select %188, %166, %193 : vector<16x96xi1>, vector<16x96xf32>
    %cst_31 = arith.constant 0.000000e+00 : f32
    %195 = vector.broadcast %cst_31 : f32 to vector<16x96xf32>
    %196 = arith.cmpf ogt, %170, %195 : vector<16x96xf32>
    %cst_32 = arith.constant 0.000000e+00 : f32
    %197 = vector.broadcast %cst_32 : f32 to vector<16x96xf32>
    %198 = arith.minimumf %170, %197 : vector<16x96xf32>
    %199 = math.exp %198 : vector<16x96xf32>
    %cst_33 = arith.constant 1.000000e+00 : f32
    %200 = vector.broadcast %cst_33 : f32 to vector<16x96xf32>
    %201 = arith.subf %199, %200 : vector<16x96xf32>
    %202 = arith.select %196, %170, %201 : vector<16x96xi1>, vector<16x96xf32>
    %203 = tpu.concatenate %178, %186, %194, %202 in 0 : vector<16x96xf32>, vector<16x96xf32>, vector<16x96xf32>, vector<16x96xf32> -> vector<64x96xf32>
    %cst_34 = arith.constant dense<0.000000e+00> : vector<64x50xf32>
    %204 = tpu.matmul %203, %0, %cst_34 {dimension_numbers = #tpu.dot_dimension_numbers<[1], [0], [0], [1], [0, 0, 1, 1], [], []>} : vector<64x96xf32>, vector<96x50xf32>, vector<64x50xf32> -> vector<64x50xf32>
    %cst_35 = arith.constant dense<0.000000e+00> : vector<64x50xf32>
    %205 = tpu.matmul %203, %1, %cst_35 {dimension_numbers = #tpu.dot_dimension_numbers<[1], [0], [0], [1], [0, 0, 1, 1], [], []>} : vector<64x96xf32>, vector<96x50xf32>, vector<64x50xf32> -> vector<64x50xf32>
    %206 = arith.maximumf %204, %205 : vector<64x50xf32>
    %cst_36 = arith.constant dense<0.000000e+00> : vector<40x50xf32>
    %207 = tpu.matmul %2, %206, %cst_36 {dimension_numbers = #tpu.dot_dimension_numbers<[1], [0], [0], [1], [0, 0, 1, 1], [], []>} : vector<40x64xf32>, vector<64x50xf32>, vector<40x50xf32> -> vector<40x50xf32>
    %cst_37 = arith.constant dense<0.000000e+00> : vector<40x50xf32>
    %208 = tpu.matmul %3, %206, %cst_37 {dimension_numbers = #tpu.dot_dimension_numbers<[1], [0], [0], [1], [0, 0, 1, 1], [], []>} : vector<40x64xf32>, vector<64x50xf32>, vector<40x50xf32> -> vector<40x50xf32>
    %209 = arith.maximumf %207, %208 : vector<40x50xf32>
    %c0_38 = arith.constant 0 : index
    %210 = memref.load %arg5[%c0_38] : memref<4xf32, #tpu.memory_space<smem>>
    %211 = vector.broadcast %210 : f32 to vector<8x48xf32>
    %c1_39 = arith.constant 1 : index
    %212 = memref.load %arg5[%c1_39] : memref<4xf32, #tpu.memory_space<smem>>
    %213 = vector.broadcast %212 : f32 to vector<8x48xf32>
    %c2_40 = arith.constant 2 : index
    %214 = memref.load %arg5[%c2_40] : memref<4xf32, #tpu.memory_space<smem>>
    %215 = vector.broadcast %214 : f32 to vector<8x48xf32>
    %c3_41 = arith.constant 3 : index
    %216 = memref.load %arg5[%c3_41] : memref<4xf32, #tpu.memory_space<smem>>
    %217 = vector.broadcast %216 : f32 to vector<8x48xf32>
    %218 = vector.extract_strided_slice %209 {offsets = [0, 0], sizes = [10, 50], strides = [1, 1]} : vector<40x50xf32> to vector<10x50xf32>
    %219 = vector.extract_strided_slice %218 {offsets = [0, 0], sizes = [8, 48], strides = [1, 1]} : vector<10x50xf32> to vector<8x48xf32>
    %c0_42 = arith.constant 0 : index
    %220 = memref.load %arg4[%c0_42] : memref<144xf32, #tpu.memory_space<smem>>
    %221 = vector.broadcast %220 : f32 to vector<8x48xf32>
    %222 = arith.mulf %221, %219 : vector<8x48xf32>
    %223 = arith.addf %211, %222 : vector<8x48xf32>
    %c36 = arith.constant 36 : index
    %224 = memref.load %arg4[%c36] : memref<144xf32, #tpu.memory_space<smem>>
    %225 = vector.broadcast %224 : f32 to vector<8x48xf32>
    %226 = arith.mulf %225, %219 : vector<8x48xf32>
    %227 = arith.addf %213, %226 : vector<8x48xf32>
    %c72 = arith.constant 72 : index
    %228 = memref.load %arg4[%c72] : memref<144xf32, #tpu.memory_space<smem>>
    %229 = vector.broadcast %228 : f32 to vector<8x48xf32>
    %230 = arith.mulf %229, %219 : vector<8x48xf32>
    %231 = arith.addf %215, %230 : vector<8x48xf32>
    %c108 = arith.constant 108 : index
    %232 = memref.load %arg4[%c108] : memref<144xf32, #tpu.memory_space<smem>>
    %233 = vector.broadcast %232 : f32 to vector<8x48xf32>
    %234 = arith.mulf %233, %219 : vector<8x48xf32>
    %235 = arith.addf %217, %234 : vector<8x48xf32>
    %236 = vector.extract_strided_slice %218 {offsets = [0, 1], sizes = [8, 48], strides = [1, 1]} : vector<10x50xf32> to vector<8x48xf32>
    %c1_43 = arith.constant 1 : index
    %237 = memref.load %arg4[%c1_43] : memref<144xf32, #tpu.memory_space<smem>>
    %238 = vector.broadcast %237 : f32 to vector<8x48xf32>
    %239 = arith.mulf %238, %236 : vector<8x48xf32>
    %240 = arith.addf %223, %239 : vector<8x48xf32>
    %c37 = arith.constant 37 : index
    %241 = memref.load %arg4[%c37] : memref<144xf32, #tpu.memory_space<smem>>
    %242 = vector.broadcast %241 : f32 to vector<8x48xf32>
    %243 = arith.mulf %242, %236 : vector<8x48xf32>
    %244 = arith.addf %227, %243 : vector<8x48xf32>
    %c73 = arith.constant 73 : index
    %245 = memref.load %arg4[%c73] : memref<144xf32, #tpu.memory_space<smem>>
    %246 = vector.broadcast %245 : f32 to vector<8x48xf32>
    %247 = arith.mulf %246, %236 : vector<8x48xf32>
    %248 = arith.addf %231, %247 : vector<8x48xf32>
    %c109 = arith.constant 109 : index
    %249 = memref.load %arg4[%c109] : memref<144xf32, #tpu.memory_space<smem>>
    %250 = vector.broadcast %249 : f32 to vector<8x48xf32>
    %251 = arith.mulf %250, %236 : vector<8x48xf32>
    %252 = arith.addf %235, %251 : vector<8x48xf32>
    %253 = vector.extract_strided_slice %218 {offsets = [0, 2], sizes = [8, 48], strides = [1, 1]} : vector<10x50xf32> to vector<8x48xf32>
    %c2_44 = arith.constant 2 : index
    %254 = memref.load %arg4[%c2_44] : memref<144xf32, #tpu.memory_space<smem>>
    %255 = vector.broadcast %254 : f32 to vector<8x48xf32>
    %256 = arith.mulf %255, %253 : vector<8x48xf32>
    %257 = arith.addf %240, %256 : vector<8x48xf32>
    %c38 = arith.constant 38 : index
    %258 = memref.load %arg4[%c38] : memref<144xf32, #tpu.memory_space<smem>>
    %259 = vector.broadcast %258 : f32 to vector<8x48xf32>
    %260 = arith.mulf %259, %253 : vector<8x48xf32>
    %261 = arith.addf %244, %260 : vector<8x48xf32>
    %c74 = arith.constant 74 : index
    %262 = memref.load %arg4[%c74] : memref<144xf32, #tpu.memory_space<smem>>
    %263 = vector.broadcast %262 : f32 to vector<8x48xf32>
    %264 = arith.mulf %263, %253 : vector<8x48xf32>
    %265 = arith.addf %248, %264 : vector<8x48xf32>
    %c110 = arith.constant 110 : index
    %266 = memref.load %arg4[%c110] : memref<144xf32, #tpu.memory_space<smem>>
    %267 = vector.broadcast %266 : f32 to vector<8x48xf32>
    %268 = arith.mulf %267, %253 : vector<8x48xf32>
    %269 = arith.addf %252, %268 : vector<8x48xf32>
    %270 = vector.extract_strided_slice %218 {offsets = [1, 0], sizes = [8, 48], strides = [1, 1]} : vector<10x50xf32> to vector<8x48xf32>
    %c3_45 = arith.constant 3 : index
    %271 = memref.load %arg4[%c3_45] : memref<144xf32, #tpu.memory_space<smem>>
    %272 = vector.broadcast %271 : f32 to vector<8x48xf32>
    %273 = arith.mulf %272, %270 : vector<8x48xf32>
    %274 = arith.addf %257, %273 : vector<8x48xf32>
    %c39 = arith.constant 39 : index
    %275 = memref.load %arg4[%c39] : memref<144xf32, #tpu.memory_space<smem>>
    %276 = vector.broadcast %275 : f32 to vector<8x48xf32>
    %277 = arith.mulf %276, %270 : vector<8x48xf32>
    %278 = arith.addf %261, %277 : vector<8x48xf32>
    %c75 = arith.constant 75 : index
    %279 = memref.load %arg4[%c75] : memref<144xf32, #tpu.memory_space<smem>>
    %280 = vector.broadcast %279 : f32 to vector<8x48xf32>
    %281 = arith.mulf %280, %270 : vector<8x48xf32>
    %282 = arith.addf %265, %281 : vector<8x48xf32>
    %c111 = arith.constant 111 : index
    %283 = memref.load %arg4[%c111] : memref<144xf32, #tpu.memory_space<smem>>
    %284 = vector.broadcast %283 : f32 to vector<8x48xf32>
    %285 = arith.mulf %284, %270 : vector<8x48xf32>
    %286 = arith.addf %269, %285 : vector<8x48xf32>
    %287 = vector.extract_strided_slice %218 {offsets = [1, 1], sizes = [8, 48], strides = [1, 1]} : vector<10x50xf32> to vector<8x48xf32>
    %c4_46 = arith.constant 4 : index
    %288 = memref.load %arg4[%c4_46] : memref<144xf32, #tpu.memory_space<smem>>
    %289 = vector.broadcast %288 : f32 to vector<8x48xf32>
    %290 = arith.mulf %289, %287 : vector<8x48xf32>
    %291 = arith.addf %274, %290 : vector<8x48xf32>
    %c40 = arith.constant 40 : index
    %292 = memref.load %arg4[%c40] : memref<144xf32, #tpu.memory_space<smem>>
    %293 = vector.broadcast %292 : f32 to vector<8x48xf32>
    %294 = arith.mulf %293, %287 : vector<8x48xf32>
    %295 = arith.addf %278, %294 : vector<8x48xf32>
    %c76 = arith.constant 76 : index
    %296 = memref.load %arg4[%c76] : memref<144xf32, #tpu.memory_space<smem>>
    %297 = vector.broadcast %296 : f32 to vector<8x48xf32>
    %298 = arith.mulf %297, %287 : vector<8x48xf32>
    %299 = arith.addf %282, %298 : vector<8x48xf32>
    %c112 = arith.constant 112 : index
    %300 = memref.load %arg4[%c112] : memref<144xf32, #tpu.memory_space<smem>>
    %301 = vector.broadcast %300 : f32 to vector<8x48xf32>
    %302 = arith.mulf %301, %287 : vector<8x48xf32>
    %303 = arith.addf %286, %302 : vector<8x48xf32>
    %304 = vector.extract_strided_slice %218 {offsets = [1, 2], sizes = [8, 48], strides = [1, 1]} : vector<10x50xf32> to vector<8x48xf32>
    %c5_47 = arith.constant 5 : index
    %305 = memref.load %arg4[%c5_47] : memref<144xf32, #tpu.memory_space<smem>>
    %306 = vector.broadcast %305 : f32 to vector<8x48xf32>
    %307 = arith.mulf %306, %304 : vector<8x48xf32>
    %308 = arith.addf %291, %307 : vector<8x48xf32>
    %c41 = arith.constant 41 : index
    %309 = memref.load %arg4[%c41] : memref<144xf32, #tpu.memory_space<smem>>
    %310 = vector.broadcast %309 : f32 to vector<8x48xf32>
    %311 = arith.mulf %310, %304 : vector<8x48xf32>
    %312 = arith.addf %295, %311 : vector<8x48xf32>
    %c77 = arith.constant 77 : index
    %313 = memref.load %arg4[%c77] : memref<144xf32, #tpu.memory_space<smem>>
    %314 = vector.broadcast %313 : f32 to vector<8x48xf32>
    %315 = arith.mulf %314, %304 : vector<8x48xf32>
    %316 = arith.addf %299, %315 : vector<8x48xf32>
    %c113 = arith.constant 113 : index
    %317 = memref.load %arg4[%c113] : memref<144xf32, #tpu.memory_space<smem>>
    %318 = vector.broadcast %317 : f32 to vector<8x48xf32>
    %319 = arith.mulf %318, %304 : vector<8x48xf32>
    %320 = arith.addf %303, %319 : vector<8x48xf32>
    %321 = vector.extract_strided_slice %218 {offsets = [2, 0], sizes = [8, 48], strides = [1, 1]} : vector<10x50xf32> to vector<8x48xf32>
    %c6_48 = arith.constant 6 : index
    %322 = memref.load %arg4[%c6_48] : memref<144xf32, #tpu.memory_space<smem>>
    %323 = vector.broadcast %322 : f32 to vector<8x48xf32>
    %324 = arith.mulf %323, %321 : vector<8x48xf32>
    %325 = arith.addf %308, %324 : vector<8x48xf32>
    %c42 = arith.constant 42 : index
    %326 = memref.load %arg4[%c42] : memref<144xf32, #tpu.memory_space<smem>>
    %327 = vector.broadcast %326 : f32 to vector<8x48xf32>
    %328 = arith.mulf %327, %321 : vector<8x48xf32>
    %329 = arith.addf %312, %328 : vector<8x48xf32>
    %c78 = arith.constant 78 : index
    %330 = memref.load %arg4[%c78] : memref<144xf32, #tpu.memory_space<smem>>
    %331 = vector.broadcast %330 : f32 to vector<8x48xf32>
    %332 = arith.mulf %331, %321 : vector<8x48xf32>
    %333 = arith.addf %316, %332 : vector<8x48xf32>
    %c114 = arith.constant 114 : index
    %334 = memref.load %arg4[%c114] : memref<144xf32, #tpu.memory_space<smem>>
    %335 = vector.broadcast %334 : f32 to vector<8x48xf32>
    %336 = arith.mulf %335, %321 : vector<8x48xf32>
    %337 = arith.addf %320, %336 : vector<8x48xf32>
    %338 = vector.extract_strided_slice %218 {offsets = [2, 1], sizes = [8, 48], strides = [1, 1]} : vector<10x50xf32> to vector<8x48xf32>
    %c7_49 = arith.constant 7 : index
    %339 = memref.load %arg4[%c7_49] : memref<144xf32, #tpu.memory_space<smem>>
    %340 = vector.broadcast %339 : f32 to vector<8x48xf32>
    %341 = arith.mulf %340, %338 : vector<8x48xf32>
    %342 = arith.addf %325, %341 : vector<8x48xf32>
    %c43 = arith.constant 43 : index
    %343 = memref.load %arg4[%c43] : memref<144xf32, #tpu.memory_space<smem>>
    %344 = vector.broadcast %343 : f32 to vector<8x48xf32>
    %345 = arith.mulf %344, %338 : vector<8x48xf32>
    %346 = arith.addf %329, %345 : vector<8x48xf32>
    %c79 = arith.constant 79 : index
    %347 = memref.load %arg4[%c79] : memref<144xf32, #tpu.memory_space<smem>>
    %348 = vector.broadcast %347 : f32 to vector<8x48xf32>
    %349 = arith.mulf %348, %338 : vector<8x48xf32>
    %350 = arith.addf %333, %349 : vector<8x48xf32>
    %c115 = arith.constant 115 : index
    %351 = memref.load %arg4[%c115] : memref<144xf32, #tpu.memory_space<smem>>
    %352 = vector.broadcast %351 : f32 to vector<8x48xf32>
    %353 = arith.mulf %352, %338 : vector<8x48xf32>
    %354 = arith.addf %337, %353 : vector<8x48xf32>
    %355 = vector.extract_strided_slice %218 {offsets = [2, 2], sizes = [8, 48], strides = [1, 1]} : vector<10x50xf32> to vector<8x48xf32>
    %c8_50 = arith.constant 8 : index
    %356 = memref.load %arg4[%c8_50] : memref<144xf32, #tpu.memory_space<smem>>
    %357 = vector.broadcast %356 : f32 to vector<8x48xf32>
    %358 = arith.mulf %357, %355 : vector<8x48xf32>
    %359 = arith.addf %342, %358 : vector<8x48xf32>
    %c44 = arith.constant 44 : index
    %360 = memref.load %arg4[%c44] : memref<144xf32, #tpu.memory_space<smem>>
    %361 = vector.broadcast %360 : f32 to vector<8x48xf32>
    %362 = arith.mulf %361, %355 : vector<8x48xf32>
    %363 = arith.addf %346, %362 : vector<8x48xf32>
    %c80 = arith.constant 80 : index
    %364 = memref.load %arg4[%c80] : memref<144xf32, #tpu.memory_space<smem>>
    %365 = vector.broadcast %364 : f32 to vector<8x48xf32>
    %366 = arith.mulf %365, %355 : vector<8x48xf32>
    %367 = arith.addf %350, %366 : vector<8x48xf32>
    %c116 = arith.constant 116 : index
    %368 = memref.load %arg4[%c116] : memref<144xf32, #tpu.memory_space<smem>>
    %369 = vector.broadcast %368 : f32 to vector<8x48xf32>
    %370 = arith.mulf %369, %355 : vector<8x48xf32>
    %371 = arith.addf %354, %370 : vector<8x48xf32>
    %372 = vector.extract_strided_slice %209 {offsets = [10, 0], sizes = [10, 50], strides = [1, 1]} : vector<40x50xf32> to vector<10x50xf32>
    %373 = vector.extract_strided_slice %372 {offsets = [0, 0], sizes = [8, 48], strides = [1, 1]} : vector<10x50xf32> to vector<8x48xf32>
    %c9_51 = arith.constant 9 : index
    %374 = memref.load %arg4[%c9_51] : memref<144xf32, #tpu.memory_space<smem>>
    %375 = vector.broadcast %374 : f32 to vector<8x48xf32>
    %376 = arith.mulf %375, %373 : vector<8x48xf32>
    %377 = arith.addf %359, %376 : vector<8x48xf32>
    %c45 = arith.constant 45 : index
    %378 = memref.load %arg4[%c45] : memref<144xf32, #tpu.memory_space<smem>>
    %379 = vector.broadcast %378 : f32 to vector<8x48xf32>
    %380 = arith.mulf %379, %373 : vector<8x48xf32>
    %381 = arith.addf %363, %380 : vector<8x48xf32>
    %c81 = arith.constant 81 : index
    %382 = memref.load %arg4[%c81] : memref<144xf32, #tpu.memory_space<smem>>
    %383 = vector.broadcast %382 : f32 to vector<8x48xf32>
    %384 = arith.mulf %383, %373 : vector<8x48xf32>
    %385 = arith.addf %367, %384 : vector<8x48xf32>
    %c117 = arith.constant 117 : index
    %386 = memref.load %arg4[%c117] : memref<144xf32, #tpu.memory_space<smem>>
    %387 = vector.broadcast %386 : f32 to vector<8x48xf32>
    %388 = arith.mulf %387, %373 : vector<8x48xf32>
    %389 = arith.addf %371, %388 : vector<8x48xf32>
    %390 = vector.extract_strided_slice %372 {offsets = [0, 1], sizes = [8, 48], strides = [1, 1]} : vector<10x50xf32> to vector<8x48xf32>
    %c10_52 = arith.constant 10 : index
    %391 = memref.load %arg4[%c10_52] : memref<144xf32, #tpu.memory_space<smem>>
    %392 = vector.broadcast %391 : f32 to vector<8x48xf32>
    %393 = arith.mulf %392, %390 : vector<8x48xf32>
    %394 = arith.addf %377, %393 : vector<8x48xf32>
    %c46 = arith.constant 46 : index
    %395 = memref.load %arg4[%c46] : memref<144xf32, #tpu.memory_space<smem>>
    %396 = vector.broadcast %395 : f32 to vector<8x48xf32>
    %397 = arith.mulf %396, %390 : vector<8x48xf32>
    %398 = arith.addf %381, %397 : vector<8x48xf32>
    %c82 = arith.constant 82 : index
    %399 = memref.load %arg4[%c82] : memref<144xf32, #tpu.memory_space<smem>>
    %400 = vector.broadcast %399 : f32 to vector<8x48xf32>
    %401 = arith.mulf %400, %390 : vector<8x48xf32>
    %402 = arith.addf %385, %401 : vector<8x48xf32>
    %c118 = arith.constant 118 : index
    %403 = memref.load %arg4[%c118] : memref<144xf32, #tpu.memory_space<smem>>
    %404 = vector.broadcast %403 : f32 to vector<8x48xf32>
    %405 = arith.mulf %404, %390 : vector<8x48xf32>
    %406 = arith.addf %389, %405 : vector<8x48xf32>
    %407 = vector.extract_strided_slice %372 {offsets = [0, 2], sizes = [8, 48], strides = [1, 1]} : vector<10x50xf32> to vector<8x48xf32>
    %c11_53 = arith.constant 11 : index
    %408 = memref.load %arg4[%c11_53] : memref<144xf32, #tpu.memory_space<smem>>
    %409 = vector.broadcast %408 : f32 to vector<8x48xf32>
    %410 = arith.mulf %409, %407 : vector<8x48xf32>
    %411 = arith.addf %394, %410 : vector<8x48xf32>
    %c47 = arith.constant 47 : index
    %412 = memref.load %arg4[%c47] : memref<144xf32, #tpu.memory_space<smem>>
    %413 = vector.broadcast %412 : f32 to vector<8x48xf32>
    %414 = arith.mulf %413, %407 : vector<8x48xf32>
    %415 = arith.addf %398, %414 : vector<8x48xf32>
    %c83 = arith.constant 83 : index
    %416 = memref.load %arg4[%c83] : memref<144xf32, #tpu.memory_space<smem>>
    %417 = vector.broadcast %416 : f32 to vector<8x48xf32>
    %418 = arith.mulf %417, %407 : vector<8x48xf32>
    %419 = arith.addf %402, %418 : vector<8x48xf32>
    %c119 = arith.constant 119 : index
    %420 = memref.load %arg4[%c119] : memref<144xf32, #tpu.memory_space<smem>>
    %421 = vector.broadcast %420 : f32 to vector<8x48xf32>
    %422 = arith.mulf %421, %407 : vector<8x48xf32>
    %423 = arith.addf %406, %422 : vector<8x48xf32>
    %424 = vector.extract_strided_slice %372 {offsets = [1, 0], sizes = [8, 48], strides = [1, 1]} : vector<10x50xf32> to vector<8x48xf32>
    %c12_54 = arith.constant 12 : index
    %425 = memref.load %arg4[%c12_54] : memref<144xf32, #tpu.memory_space<smem>>
    %426 = vector.broadcast %425 : f32 to vector<8x48xf32>
    %427 = arith.mulf %426, %424 : vector<8x48xf32>
    %428 = arith.addf %411, %427 : vector<8x48xf32>
    %c48 = arith.constant 48 : index
    %429 = memref.load %arg4[%c48] : memref<144xf32, #tpu.memory_space<smem>>
    %430 = vector.broadcast %429 : f32 to vector<8x48xf32>
    %431 = arith.mulf %430, %424 : vector<8x48xf32>
    %432 = arith.addf %415, %431 : vector<8x48xf32>
    %c84 = arith.constant 84 : index
    %433 = memref.load %arg4[%c84] : memref<144xf32, #tpu.memory_space<smem>>
    %434 = vector.broadcast %433 : f32 to vector<8x48xf32>
    %435 = arith.mulf %434, %424 : vector<8x48xf32>
    %436 = arith.addf %419, %435 : vector<8x48xf32>
    %c120 = arith.constant 120 : index
    %437 = memref.load %arg4[%c120] : memref<144xf32, #tpu.memory_space<smem>>
    %438 = vector.broadcast %437 : f32 to vector<8x48xf32>
    %439 = arith.mulf %438, %424 : vector<8x48xf32>
    %440 = arith.addf %423, %439 : vector<8x48xf32>
    %441 = vector.extract_strided_slice %372 {offsets = [1, 1], sizes = [8, 48], strides = [1, 1]} : vector<10x50xf32> to vector<8x48xf32>
    %c13_55 = arith.constant 13 : index
    %442 = memref.load %arg4[%c13_55] : memref<144xf32, #tpu.memory_space<smem>>
    %443 = vector.broadcast %442 : f32 to vector<8x48xf32>
    %444 = arith.mulf %443, %441 : vector<8x48xf32>
    %445 = arith.addf %428, %444 : vector<8x48xf32>
    %c49 = arith.constant 49 : index
    %446 = memref.load %arg4[%c49] : memref<144xf32, #tpu.memory_space<smem>>
    %447 = vector.broadcast %446 : f32 to vector<8x48xf32>
    %448 = arith.mulf %447, %441 : vector<8x48xf32>
    %449 = arith.addf %432, %448 : vector<8x48xf32>
    %c85 = arith.constant 85 : index
    %450 = memref.load %arg4[%c85] : memref<144xf32, #tpu.memory_space<smem>>
    %451 = vector.broadcast %450 : f32 to vector<8x48xf32>
    %452 = arith.mulf %451, %441 : vector<8x48xf32>
    %453 = arith.addf %436, %452 : vector<8x48xf32>
    %c121 = arith.constant 121 : index
    %454 = memref.load %arg4[%c121] : memref<144xf32, #tpu.memory_space<smem>>
    %455 = vector.broadcast %454 : f32 to vector<8x48xf32>
    %456 = arith.mulf %455, %441 : vector<8x48xf32>
    %457 = arith.addf %440, %456 : vector<8x48xf32>
    %458 = vector.extract_strided_slice %372 {offsets = [1, 2], sizes = [8, 48], strides = [1, 1]} : vector<10x50xf32> to vector<8x48xf32>
    %c14_56 = arith.constant 14 : index
    %459 = memref.load %arg4[%c14_56] : memref<144xf32, #tpu.memory_space<smem>>
    %460 = vector.broadcast %459 : f32 to vector<8x48xf32>
    %461 = arith.mulf %460, %458 : vector<8x48xf32>
    %462 = arith.addf %445, %461 : vector<8x48xf32>
    %c50 = arith.constant 50 : index
    %463 = memref.load %arg4[%c50] : memref<144xf32, #tpu.memory_space<smem>>
    %464 = vector.broadcast %463 : f32 to vector<8x48xf32>
    %465 = arith.mulf %464, %458 : vector<8x48xf32>
    %466 = arith.addf %449, %465 : vector<8x48xf32>
    %c86 = arith.constant 86 : index
    %467 = memref.load %arg4[%c86] : memref<144xf32, #tpu.memory_space<smem>>
    %468 = vector.broadcast %467 : f32 to vector<8x48xf32>
    %469 = arith.mulf %468, %458 : vector<8x48xf32>
    %470 = arith.addf %453, %469 : vector<8x48xf32>
    %c122 = arith.constant 122 : index
    %471 = memref.load %arg4[%c122] : memref<144xf32, #tpu.memory_space<smem>>
    %472 = vector.broadcast %471 : f32 to vector<8x48xf32>
    %473 = arith.mulf %472, %458 : vector<8x48xf32>
    %474 = arith.addf %457, %473 : vector<8x48xf32>
    %475 = vector.extract_strided_slice %372 {offsets = [2, 0], sizes = [8, 48], strides = [1, 1]} : vector<10x50xf32> to vector<8x48xf32>
    %c15_57 = arith.constant 15 : index
    %476 = memref.load %arg4[%c15_57] : memref<144xf32, #tpu.memory_space<smem>>
    %477 = vector.broadcast %476 : f32 to vector<8x48xf32>
    %478 = arith.mulf %477, %475 : vector<8x48xf32>
    %479 = arith.addf %462, %478 : vector<8x48xf32>
    %c51 = arith.constant 51 : index
    %480 = memref.load %arg4[%c51] : memref<144xf32, #tpu.memory_space<smem>>
    %481 = vector.broadcast %480 : f32 to vector<8x48xf32>
    %482 = arith.mulf %481, %475 : vector<8x48xf32>
    %483 = arith.addf %466, %482 : vector<8x48xf32>
    %c87 = arith.constant 87 : index
    %484 = memref.load %arg4[%c87] : memref<144xf32, #tpu.memory_space<smem>>
    %485 = vector.broadcast %484 : f32 to vector<8x48xf32>
    %486 = arith.mulf %485, %475 : vector<8x48xf32>
    %487 = arith.addf %470, %486 : vector<8x48xf32>
    %c123 = arith.constant 123 : index
    %488 = memref.load %arg4[%c123] : memref<144xf32, #tpu.memory_space<smem>>
    %489 = vector.broadcast %488 : f32 to vector<8x48xf32>
    %490 = arith.mulf %489, %475 : vector<8x48xf32>
    %491 = arith.addf %474, %490 : vector<8x48xf32>
    %492 = vector.extract_strided_slice %372 {offsets = [2, 1], sizes = [8, 48], strides = [1, 1]} : vector<10x50xf32> to vector<8x48xf32>
    %c16_58 = arith.constant 16 : index
    %493 = memref.load %arg4[%c16_58] : memref<144xf32, #tpu.memory_space<smem>>
    %494 = vector.broadcast %493 : f32 to vector<8x48xf32>
    %495 = arith.mulf %494, %492 : vector<8x48xf32>
    %496 = arith.addf %479, %495 : vector<8x48xf32>
    %c52 = arith.constant 52 : index
    %497 = memref.load %arg4[%c52] : memref<144xf32, #tpu.memory_space<smem>>
    %498 = vector.broadcast %497 : f32 to vector<8x48xf32>
    %499 = arith.mulf %498, %492 : vector<8x48xf32>
    %500 = arith.addf %483, %499 : vector<8x48xf32>
    %c88 = arith.constant 88 : index
    %501 = memref.load %arg4[%c88] : memref<144xf32, #tpu.memory_space<smem>>
    %502 = vector.broadcast %501 : f32 to vector<8x48xf32>
    %503 = arith.mulf %502, %492 : vector<8x48xf32>
    %504 = arith.addf %487, %503 : vector<8x48xf32>
    %c124 = arith.constant 124 : index
    %505 = memref.load %arg4[%c124] : memref<144xf32, #tpu.memory_space<smem>>
    %506 = vector.broadcast %505 : f32 to vector<8x48xf32>
    %507 = arith.mulf %506, %492 : vector<8x48xf32>
    %508 = arith.addf %491, %507 : vector<8x48xf32>
    %509 = vector.extract_strided_slice %372 {offsets = [2, 2], sizes = [8, 48], strides = [1, 1]} : vector<10x50xf32> to vector<8x48xf32>
    %c17_59 = arith.constant 17 : index
    %510 = memref.load %arg4[%c17_59] : memref<144xf32, #tpu.memory_space<smem>>
    %511 = vector.broadcast %510 : f32 to vector<8x48xf32>
    %512 = arith.mulf %511, %509 : vector<8x48xf32>
    %513 = arith.addf %496, %512 : vector<8x48xf32>
    %c53 = arith.constant 53 : index
    %514 = memref.load %arg4[%c53] : memref<144xf32, #tpu.memory_space<smem>>
    %515 = vector.broadcast %514 : f32 to vector<8x48xf32>
    %516 = arith.mulf %515, %509 : vector<8x48xf32>
    %517 = arith.addf %500, %516 : vector<8x48xf32>
    %c89 = arith.constant 89 : index
    %518 = memref.load %arg4[%c89] : memref<144xf32, #tpu.memory_space<smem>>
    %519 = vector.broadcast %518 : f32 to vector<8x48xf32>
    %520 = arith.mulf %519, %509 : vector<8x48xf32>
    %521 = arith.addf %504, %520 : vector<8x48xf32>
    %c125 = arith.constant 125 : index
    %522 = memref.load %arg4[%c125] : memref<144xf32, #tpu.memory_space<smem>>
    %523 = vector.broadcast %522 : f32 to vector<8x48xf32>
    %524 = arith.mulf %523, %509 : vector<8x48xf32>
    %525 = arith.addf %508, %524 : vector<8x48xf32>
    %526 = vector.extract_strided_slice %209 {offsets = [20, 0], sizes = [10, 50], strides = [1, 1]} : vector<40x50xf32> to vector<10x50xf32>
    %527 = vector.extract_strided_slice %526 {offsets = [0, 0], sizes = [8, 48], strides = [1, 1]} : vector<10x50xf32> to vector<8x48xf32>
    %c18_60 = arith.constant 18 : index
    %528 = memref.load %arg4[%c18_60] : memref<144xf32, #tpu.memory_space<smem>>
    %529 = vector.broadcast %528 : f32 to vector<8x48xf32>
    %530 = arith.mulf %529, %527 : vector<8x48xf32>
    %531 = arith.addf %513, %530 : vector<8x48xf32>
    %c54 = arith.constant 54 : index
    %532 = memref.load %arg4[%c54] : memref<144xf32, #tpu.memory_space<smem>>
    %533 = vector.broadcast %532 : f32 to vector<8x48xf32>
    %534 = arith.mulf %533, %527 : vector<8x48xf32>
    %535 = arith.addf %517, %534 : vector<8x48xf32>
    %c90 = arith.constant 90 : index
    %536 = memref.load %arg4[%c90] : memref<144xf32, #tpu.memory_space<smem>>
    %537 = vector.broadcast %536 : f32 to vector<8x48xf32>
    %538 = arith.mulf %537, %527 : vector<8x48xf32>
    %539 = arith.addf %521, %538 : vector<8x48xf32>
    %c126 = arith.constant 126 : index
    %540 = memref.load %arg4[%c126] : memref<144xf32, #tpu.memory_space<smem>>
    %541 = vector.broadcast %540 : f32 to vector<8x48xf32>
    %542 = arith.mulf %541, %527 : vector<8x48xf32>
    %543 = arith.addf %525, %542 : vector<8x48xf32>
    %544 = vector.extract_strided_slice %526 {offsets = [0, 1], sizes = [8, 48], strides = [1, 1]} : vector<10x50xf32> to vector<8x48xf32>
    %c19_61 = arith.constant 19 : index
    %545 = memref.load %arg4[%c19_61] : memref<144xf32, #tpu.memory_space<smem>>
    %546 = vector.broadcast %545 : f32 to vector<8x48xf32>
    %547 = arith.mulf %546, %544 : vector<8x48xf32>
    %548 = arith.addf %531, %547 : vector<8x48xf32>
    %c55 = arith.constant 55 : index
    %549 = memref.load %arg4[%c55] : memref<144xf32, #tpu.memory_space<smem>>
    %550 = vector.broadcast %549 : f32 to vector<8x48xf32>
    %551 = arith.mulf %550, %544 : vector<8x48xf32>
    %552 = arith.addf %535, %551 : vector<8x48xf32>
    %c91 = arith.constant 91 : index
    %553 = memref.load %arg4[%c91] : memref<144xf32, #tpu.memory_space<smem>>
    %554 = vector.broadcast %553 : f32 to vector<8x48xf32>
    %555 = arith.mulf %554, %544 : vector<8x48xf32>
    %556 = arith.addf %539, %555 : vector<8x48xf32>
    %c127 = arith.constant 127 : index
    %557 = memref.load %arg4[%c127] : memref<144xf32, #tpu.memory_space<smem>>
    %558 = vector.broadcast %557 : f32 to vector<8x48xf32>
    %559 = arith.mulf %558, %544 : vector<8x48xf32>
    %560 = arith.addf %543, %559 : vector<8x48xf32>
    %561 = vector.extract_strided_slice %526 {offsets = [0, 2], sizes = [8, 48], strides = [1, 1]} : vector<10x50xf32> to vector<8x48xf32>
    %c20_62 = arith.constant 20 : index
    %562 = memref.load %arg4[%c20_62] : memref<144xf32, #tpu.memory_space<smem>>
    %563 = vector.broadcast %562 : f32 to vector<8x48xf32>
    %564 = arith.mulf %563, %561 : vector<8x48xf32>
    %565 = arith.addf %548, %564 : vector<8x48xf32>
    %c56 = arith.constant 56 : index
    %566 = memref.load %arg4[%c56] : memref<144xf32, #tpu.memory_space<smem>>
    %567 = vector.broadcast %566 : f32 to vector<8x48xf32>
    %568 = arith.mulf %567, %561 : vector<8x48xf32>
    %569 = arith.addf %552, %568 : vector<8x48xf32>
    %c92 = arith.constant 92 : index
    %570 = memref.load %arg4[%c92] : memref<144xf32, #tpu.memory_space<smem>>
    %571 = vector.broadcast %570 : f32 to vector<8x48xf32>
    %572 = arith.mulf %571, %561 : vector<8x48xf32>
    %573 = arith.addf %556, %572 : vector<8x48xf32>
    %c128 = arith.constant 128 : index
    %574 = memref.load %arg4[%c128] : memref<144xf32, #tpu.memory_space<smem>>
    %575 = vector.broadcast %574 : f32 to vector<8x48xf32>
    %576 = arith.mulf %575, %561 : vector<8x48xf32>
    %577 = arith.addf %560, %576 : vector<8x48xf32>
    %578 = vector.extract_strided_slice %526 {offsets = [1, 0], sizes = [8, 48], strides = [1, 1]} : vector<10x50xf32> to vector<8x48xf32>
    %c21_63 = arith.constant 21 : index
    %579 = memref.load %arg4[%c21_63] : memref<144xf32, #tpu.memory_space<smem>>
    %580 = vector.broadcast %579 : f32 to vector<8x48xf32>
    %581 = arith.mulf %580, %578 : vector<8x48xf32>
    %582 = arith.addf %565, %581 : vector<8x48xf32>
    %c57 = arith.constant 57 : index
    %583 = memref.load %arg4[%c57] : memref<144xf32, #tpu.memory_space<smem>>
    %584 = vector.broadcast %583 : f32 to vector<8x48xf32>
    %585 = arith.mulf %584, %578 : vector<8x48xf32>
    %586 = arith.addf %569, %585 : vector<8x48xf32>
    %c93 = arith.constant 93 : index
    %587 = memref.load %arg4[%c93] : memref<144xf32, #tpu.memory_space<smem>>
    %588 = vector.broadcast %587 : f32 to vector<8x48xf32>
    %589 = arith.mulf %588, %578 : vector<8x48xf32>
    %590 = arith.addf %573, %589 : vector<8x48xf32>
    %c129 = arith.constant 129 : index
    %591 = memref.load %arg4[%c129] : memref<144xf32, #tpu.memory_space<smem>>
    %592 = vector.broadcast %591 : f32 to vector<8x48xf32>
    %593 = arith.mulf %592, %578 : vector<8x48xf32>
    %594 = arith.addf %577, %593 : vector<8x48xf32>
    %595 = vector.extract_strided_slice %526 {offsets = [1, 1], sizes = [8, 48], strides = [1, 1]} : vector<10x50xf32> to vector<8x48xf32>
    %c22_64 = arith.constant 22 : index
    %596 = memref.load %arg4[%c22_64] : memref<144xf32, #tpu.memory_space<smem>>
    %597 = vector.broadcast %596 : f32 to vector<8x48xf32>
    %598 = arith.mulf %597, %595 : vector<8x48xf32>
    %599 = arith.addf %582, %598 : vector<8x48xf32>
    %c58 = arith.constant 58 : index
    %600 = memref.load %arg4[%c58] : memref<144xf32, #tpu.memory_space<smem>>
    %601 = vector.broadcast %600 : f32 to vector<8x48xf32>
    %602 = arith.mulf %601, %595 : vector<8x48xf32>
    %603 = arith.addf %586, %602 : vector<8x48xf32>
    %c94 = arith.constant 94 : index
    %604 = memref.load %arg4[%c94] : memref<144xf32, #tpu.memory_space<smem>>
    %605 = vector.broadcast %604 : f32 to vector<8x48xf32>
    %606 = arith.mulf %605, %595 : vector<8x48xf32>
    %607 = arith.addf %590, %606 : vector<8x48xf32>
    %c130 = arith.constant 130 : index
    %608 = memref.load %arg4[%c130] : memref<144xf32, #tpu.memory_space<smem>>
    %609 = vector.broadcast %608 : f32 to vector<8x48xf32>
    %610 = arith.mulf %609, %595 : vector<8x48xf32>
    %611 = arith.addf %594, %610 : vector<8x48xf32>
    %612 = vector.extract_strided_slice %526 {offsets = [1, 2], sizes = [8, 48], strides = [1, 1]} : vector<10x50xf32> to vector<8x48xf32>
    %c23_65 = arith.constant 23 : index
    %613 = memref.load %arg4[%c23_65] : memref<144xf32, #tpu.memory_space<smem>>
    %614 = vector.broadcast %613 : f32 to vector<8x48xf32>
    %615 = arith.mulf %614, %612 : vector<8x48xf32>
    %616 = arith.addf %599, %615 : vector<8x48xf32>
    %c59 = arith.constant 59 : index
    %617 = memref.load %arg4[%c59] : memref<144xf32, #tpu.memory_space<smem>>
    %618 = vector.broadcast %617 : f32 to vector<8x48xf32>
    %619 = arith.mulf %618, %612 : vector<8x48xf32>
    %620 = arith.addf %603, %619 : vector<8x48xf32>
    %c95 = arith.constant 95 : index
    %621 = memref.load %arg4[%c95] : memref<144xf32, #tpu.memory_space<smem>>
    %622 = vector.broadcast %621 : f32 to vector<8x48xf32>
    %623 = arith.mulf %622, %612 : vector<8x48xf32>
    %624 = arith.addf %607, %623 : vector<8x48xf32>
    %c131 = arith.constant 131 : index
    %625 = memref.load %arg4[%c131] : memref<144xf32, #tpu.memory_space<smem>>
    %626 = vector.broadcast %625 : f32 to vector<8x48xf32>
    %627 = arith.mulf %626, %612 : vector<8x48xf32>
    %628 = arith.addf %611, %627 : vector<8x48xf32>
    %629 = vector.extract_strided_slice %526 {offsets = [2, 0], sizes = [8, 48], strides = [1, 1]} : vector<10x50xf32> to vector<8x48xf32>
    %c24_66 = arith.constant 24 : index
    %630 = memref.load %arg4[%c24_66] : memref<144xf32, #tpu.memory_space<smem>>
    %631 = vector.broadcast %630 : f32 to vector<8x48xf32>
    %632 = arith.mulf %631, %629 : vector<8x48xf32>
    %633 = arith.addf %616, %632 : vector<8x48xf32>
    %c60 = arith.constant 60 : index
    %634 = memref.load %arg4[%c60] : memref<144xf32, #tpu.memory_space<smem>>
    %635 = vector.broadcast %634 : f32 to vector<8x48xf32>
    %636 = arith.mulf %635, %629 : vector<8x48xf32>
    %637 = arith.addf %620, %636 : vector<8x48xf32>
    %c96 = arith.constant 96 : index
    %638 = memref.load %arg4[%c96] : memref<144xf32, #tpu.memory_space<smem>>
    %639 = vector.broadcast %638 : f32 to vector<8x48xf32>
    %640 = arith.mulf %639, %629 : vector<8x48xf32>
    %641 = arith.addf %624, %640 : vector<8x48xf32>
    %c132 = arith.constant 132 : index
    %642 = memref.load %arg4[%c132] : memref<144xf32, #tpu.memory_space<smem>>
    %643 = vector.broadcast %642 : f32 to vector<8x48xf32>
    %644 = arith.mulf %643, %629 : vector<8x48xf32>
    %645 = arith.addf %628, %644 : vector<8x48xf32>
    %646 = vector.extract_strided_slice %526 {offsets = [2, 1], sizes = [8, 48], strides = [1, 1]} : vector<10x50xf32> to vector<8x48xf32>
    %c25_67 = arith.constant 25 : index
    %647 = memref.load %arg4[%c25_67] : memref<144xf32, #tpu.memory_space<smem>>
    %648 = vector.broadcast %647 : f32 to vector<8x48xf32>
    %649 = arith.mulf %648, %646 : vector<8x48xf32>
    %650 = arith.addf %633, %649 : vector<8x48xf32>
    %c61 = arith.constant 61 : index
    %651 = memref.load %arg4[%c61] : memref<144xf32, #tpu.memory_space<smem>>
    %652 = vector.broadcast %651 : f32 to vector<8x48xf32>
    %653 = arith.mulf %652, %646 : vector<8x48xf32>
    %654 = arith.addf %637, %653 : vector<8x48xf32>
    %c97 = arith.constant 97 : index
    %655 = memref.load %arg4[%c97] : memref<144xf32, #tpu.memory_space<smem>>
    %656 = vector.broadcast %655 : f32 to vector<8x48xf32>
    %657 = arith.mulf %656, %646 : vector<8x48xf32>
    %658 = arith.addf %641, %657 : vector<8x48xf32>
    %c133 = arith.constant 133 : index
    %659 = memref.load %arg4[%c133] : memref<144xf32, #tpu.memory_space<smem>>
    %660 = vector.broadcast %659 : f32 to vector<8x48xf32>
    %661 = arith.mulf %660, %646 : vector<8x48xf32>
    %662 = arith.addf %645, %661 : vector<8x48xf32>
    %663 = vector.extract_strided_slice %526 {offsets = [2, 2], sizes = [8, 48], strides = [1, 1]} : vector<10x50xf32> to vector<8x48xf32>
    %c26_68 = arith.constant 26 : index
    %664 = memref.load %arg4[%c26_68] : memref<144xf32, #tpu.memory_space<smem>>
    %665 = vector.broadcast %664 : f32 to vector<8x48xf32>
    %666 = arith.mulf %665, %663 : vector<8x48xf32>
    %667 = arith.addf %650, %666 : vector<8x48xf32>
    %c62 = arith.constant 62 : index
    %668 = memref.load %arg4[%c62] : memref<144xf32, #tpu.memory_space<smem>>
    %669 = vector.broadcast %668 : f32 to vector<8x48xf32>
    %670 = arith.mulf %669, %663 : vector<8x48xf32>
    %671 = arith.addf %654, %670 : vector<8x48xf32>
    %c98 = arith.constant 98 : index
    %672 = memref.load %arg4[%c98] : memref<144xf32, #tpu.memory_space<smem>>
    %673 = vector.broadcast %672 : f32 to vector<8x48xf32>
    %674 = arith.mulf %673, %663 : vector<8x48xf32>
    %675 = arith.addf %658, %674 : vector<8x48xf32>
    %c134 = arith.constant 134 : index
    %676 = memref.load %arg4[%c134] : memref<144xf32, #tpu.memory_space<smem>>
    %677 = vector.broadcast %676 : f32 to vector<8x48xf32>
    %678 = arith.mulf %677, %663 : vector<8x48xf32>
    %679 = arith.addf %662, %678 : vector<8x48xf32>
    %680 = vector.extract_strided_slice %209 {offsets = [30, 0], sizes = [10, 50], strides = [1, 1]} : vector<40x50xf32> to vector<10x50xf32>
    %681 = vector.extract_strided_slice %680 {offsets = [0, 0], sizes = [8, 48], strides = [1, 1]} : vector<10x50xf32> to vector<8x48xf32>
    %c27_69 = arith.constant 27 : index
    %682 = memref.load %arg4[%c27_69] : memref<144xf32, #tpu.memory_space<smem>>
    %683 = vector.broadcast %682 : f32 to vector<8x48xf32>
    %684 = arith.mulf %683, %681 : vector<8x48xf32>
    %685 = arith.addf %667, %684 : vector<8x48xf32>
    %c63 = arith.constant 63 : index
    %686 = memref.load %arg4[%c63] : memref<144xf32, #tpu.memory_space<smem>>
    %687 = vector.broadcast %686 : f32 to vector<8x48xf32>
    %688 = arith.mulf %687, %681 : vector<8x48xf32>
    %689 = arith.addf %671, %688 : vector<8x48xf32>
    %c99 = arith.constant 99 : index
    %690 = memref.load %arg4[%c99] : memref<144xf32, #tpu.memory_space<smem>>
    %691 = vector.broadcast %690 : f32 to vector<8x48xf32>
    %692 = arith.mulf %691, %681 : vector<8x48xf32>
    %693 = arith.addf %675, %692 : vector<8x48xf32>
    %c135 = arith.constant 135 : index
    %694 = memref.load %arg4[%c135] : memref<144xf32, #tpu.memory_space<smem>>
    %695 = vector.broadcast %694 : f32 to vector<8x48xf32>
    %696 = arith.mulf %695, %681 : vector<8x48xf32>
    %697 = arith.addf %679, %696 : vector<8x48xf32>
    %698 = vector.extract_strided_slice %680 {offsets = [0, 1], sizes = [8, 48], strides = [1, 1]} : vector<10x50xf32> to vector<8x48xf32>
    %c28_70 = arith.constant 28 : index
    %699 = memref.load %arg4[%c28_70] : memref<144xf32, #tpu.memory_space<smem>>
    %700 = vector.broadcast %699 : f32 to vector<8x48xf32>
    %701 = arith.mulf %700, %698 : vector<8x48xf32>
    %702 = arith.addf %685, %701 : vector<8x48xf32>
    %c64 = arith.constant 64 : index
    %703 = memref.load %arg4[%c64] : memref<144xf32, #tpu.memory_space<smem>>
    %704 = vector.broadcast %703 : f32 to vector<8x48xf32>
    %705 = arith.mulf %704, %698 : vector<8x48xf32>
    %706 = arith.addf %689, %705 : vector<8x48xf32>
    %c100 = arith.constant 100 : index
    %707 = memref.load %arg4[%c100] : memref<144xf32, #tpu.memory_space<smem>>
    %708 = vector.broadcast %707 : f32 to vector<8x48xf32>
    %709 = arith.mulf %708, %698 : vector<8x48xf32>
    %710 = arith.addf %693, %709 : vector<8x48xf32>
    %c136 = arith.constant 136 : index
    %711 = memref.load %arg4[%c136] : memref<144xf32, #tpu.memory_space<smem>>
    %712 = vector.broadcast %711 : f32 to vector<8x48xf32>
    %713 = arith.mulf %712, %698 : vector<8x48xf32>
    %714 = arith.addf %697, %713 : vector<8x48xf32>
    %715 = vector.extract_strided_slice %680 {offsets = [0, 2], sizes = [8, 48], strides = [1, 1]} : vector<10x50xf32> to vector<8x48xf32>
    %c29_71 = arith.constant 29 : index
    %716 = memref.load %arg4[%c29_71] : memref<144xf32, #tpu.memory_space<smem>>
    %717 = vector.broadcast %716 : f32 to vector<8x48xf32>
    %718 = arith.mulf %717, %715 : vector<8x48xf32>
    %719 = arith.addf %702, %718 : vector<8x48xf32>
    %c65 = arith.constant 65 : index
    %720 = memref.load %arg4[%c65] : memref<144xf32, #tpu.memory_space<smem>>
    %721 = vector.broadcast %720 : f32 to vector<8x48xf32>
    %722 = arith.mulf %721, %715 : vector<8x48xf32>
    %723 = arith.addf %706, %722 : vector<8x48xf32>
    %c101 = arith.constant 101 : index
    %724 = memref.load %arg4[%c101] : memref<144xf32, #tpu.memory_space<smem>>
    %725 = vector.broadcast %724 : f32 to vector<8x48xf32>
    %726 = arith.mulf %725, %715 : vector<8x48xf32>
    %727 = arith.addf %710, %726 : vector<8x48xf32>
    %c137 = arith.constant 137 : index
    %728 = memref.load %arg4[%c137] : memref<144xf32, #tpu.memory_space<smem>>
    %729 = vector.broadcast %728 : f32 to vector<8x48xf32>
    %730 = arith.mulf %729, %715 : vector<8x48xf32>
    %731 = arith.addf %714, %730 : vector<8x48xf32>
    %732 = vector.extract_strided_slice %680 {offsets = [1, 0], sizes = [8, 48], strides = [1, 1]} : vector<10x50xf32> to vector<8x48xf32>
    %c30_72 = arith.constant 30 : index
    %733 = memref.load %arg4[%c30_72] : memref<144xf32, #tpu.memory_space<smem>>
    %734 = vector.broadcast %733 : f32 to vector<8x48xf32>
    %735 = arith.mulf %734, %732 : vector<8x48xf32>
    %736 = arith.addf %719, %735 : vector<8x48xf32>
    %c66 = arith.constant 66 : index
    %737 = memref.load %arg4[%c66] : memref<144xf32, #tpu.memory_space<smem>>
    %738 = vector.broadcast %737 : f32 to vector<8x48xf32>
    %739 = arith.mulf %738, %732 : vector<8x48xf32>
    %740 = arith.addf %723, %739 : vector<8x48xf32>
    %c102 = arith.constant 102 : index
    %741 = memref.load %arg4[%c102] : memref<144xf32, #tpu.memory_space<smem>>
    %742 = vector.broadcast %741 : f32 to vector<8x48xf32>
    %743 = arith.mulf %742, %732 : vector<8x48xf32>
    %744 = arith.addf %727, %743 : vector<8x48xf32>
    %c138 = arith.constant 138 : index
    %745 = memref.load %arg4[%c138] : memref<144xf32, #tpu.memory_space<smem>>
    %746 = vector.broadcast %745 : f32 to vector<8x48xf32>
    %747 = arith.mulf %746, %732 : vector<8x48xf32>
    %748 = arith.addf %731, %747 : vector<8x48xf32>
    %749 = vector.extract_strided_slice %680 {offsets = [1, 1], sizes = [8, 48], strides = [1, 1]} : vector<10x50xf32> to vector<8x48xf32>
    %c31_73 = arith.constant 31 : index
    %750 = memref.load %arg4[%c31_73] : memref<144xf32, #tpu.memory_space<smem>>
    %751 = vector.broadcast %750 : f32 to vector<8x48xf32>
    %752 = arith.mulf %751, %749 : vector<8x48xf32>
    %753 = arith.addf %736, %752 : vector<8x48xf32>
    %c67 = arith.constant 67 : index
    %754 = memref.load %arg4[%c67] : memref<144xf32, #tpu.memory_space<smem>>
    %755 = vector.broadcast %754 : f32 to vector<8x48xf32>
    %756 = arith.mulf %755, %749 : vector<8x48xf32>
    %757 = arith.addf %740, %756 : vector<8x48xf32>
    %c103 = arith.constant 103 : index
    %758 = memref.load %arg4[%c103] : memref<144xf32, #tpu.memory_space<smem>>
    %759 = vector.broadcast %758 : f32 to vector<8x48xf32>
    %760 = arith.mulf %759, %749 : vector<8x48xf32>
    %761 = arith.addf %744, %760 : vector<8x48xf32>
    %c139 = arith.constant 139 : index
    %762 = memref.load %arg4[%c139] : memref<144xf32, #tpu.memory_space<smem>>
    %763 = vector.broadcast %762 : f32 to vector<8x48xf32>
    %764 = arith.mulf %763, %749 : vector<8x48xf32>
    %765 = arith.addf %748, %764 : vector<8x48xf32>
    %766 = vector.extract_strided_slice %680 {offsets = [1, 2], sizes = [8, 48], strides = [1, 1]} : vector<10x50xf32> to vector<8x48xf32>
    %c32_74 = arith.constant 32 : index
    %767 = memref.load %arg4[%c32_74] : memref<144xf32, #tpu.memory_space<smem>>
    %768 = vector.broadcast %767 : f32 to vector<8x48xf32>
    %769 = arith.mulf %768, %766 : vector<8x48xf32>
    %770 = arith.addf %753, %769 : vector<8x48xf32>
    %c68 = arith.constant 68 : index
    %771 = memref.load %arg4[%c68] : memref<144xf32, #tpu.memory_space<smem>>
    %772 = vector.broadcast %771 : f32 to vector<8x48xf32>
    %773 = arith.mulf %772, %766 : vector<8x48xf32>
    %774 = arith.addf %757, %773 : vector<8x48xf32>
    %c104 = arith.constant 104 : index
    %775 = memref.load %arg4[%c104] : memref<144xf32, #tpu.memory_space<smem>>
    %776 = vector.broadcast %775 : f32 to vector<8x48xf32>
    %777 = arith.mulf %776, %766 : vector<8x48xf32>
    %778 = arith.addf %761, %777 : vector<8x48xf32>
    %c140 = arith.constant 140 : index
    %779 = memref.load %arg4[%c140] : memref<144xf32, #tpu.memory_space<smem>>
    %780 = vector.broadcast %779 : f32 to vector<8x48xf32>
    %781 = arith.mulf %780, %766 : vector<8x48xf32>
    %782 = arith.addf %765, %781 : vector<8x48xf32>
    %783 = vector.extract_strided_slice %680 {offsets = [2, 0], sizes = [8, 48], strides = [1, 1]} : vector<10x50xf32> to vector<8x48xf32>
    %c33_75 = arith.constant 33 : index
    %784 = memref.load %arg4[%c33_75] : memref<144xf32, #tpu.memory_space<smem>>
    %785 = vector.broadcast %784 : f32 to vector<8x48xf32>
    %786 = arith.mulf %785, %783 : vector<8x48xf32>
    %787 = arith.addf %770, %786 : vector<8x48xf32>
    %c69 = arith.constant 69 : index
    %788 = memref.load %arg4[%c69] : memref<144xf32, #tpu.memory_space<smem>>
    %789 = vector.broadcast %788 : f32 to vector<8x48xf32>
    %790 = arith.mulf %789, %783 : vector<8x48xf32>
    %791 = arith.addf %774, %790 : vector<8x48xf32>
    %c105 = arith.constant 105 : index
    %792 = memref.load %arg4[%c105] : memref<144xf32, #tpu.memory_space<smem>>
    %793 = vector.broadcast %792 : f32 to vector<8x48xf32>
    %794 = arith.mulf %793, %783 : vector<8x48xf32>
    %795 = arith.addf %778, %794 : vector<8x48xf32>
    %c141 = arith.constant 141 : index
    %796 = memref.load %arg4[%c141] : memref<144xf32, #tpu.memory_space<smem>>
    %797 = vector.broadcast %796 : f32 to vector<8x48xf32>
    %798 = arith.mulf %797, %783 : vector<8x48xf32>
    %799 = arith.addf %782, %798 : vector<8x48xf32>
    %800 = vector.extract_strided_slice %680 {offsets = [2, 1], sizes = [8, 48], strides = [1, 1]} : vector<10x50xf32> to vector<8x48xf32>
    %c34_76 = arith.constant 34 : index
    %801 = memref.load %arg4[%c34_76] : memref<144xf32, #tpu.memory_space<smem>>
    %802 = vector.broadcast %801 : f32 to vector<8x48xf32>
    %803 = arith.mulf %802, %800 : vector<8x48xf32>
    %804 = arith.addf %787, %803 : vector<8x48xf32>
    %c70 = arith.constant 70 : index
    %805 = memref.load %arg4[%c70] : memref<144xf32, #tpu.memory_space<smem>>
    %806 = vector.broadcast %805 : f32 to vector<8x48xf32>
    %807 = arith.mulf %806, %800 : vector<8x48xf32>
    %808 = arith.addf %791, %807 : vector<8x48xf32>
    %c106 = arith.constant 106 : index
    %809 = memref.load %arg4[%c106] : memref<144xf32, #tpu.memory_space<smem>>
    %810 = vector.broadcast %809 : f32 to vector<8x48xf32>
    %811 = arith.mulf %810, %800 : vector<8x48xf32>
    %812 = arith.addf %795, %811 : vector<8x48xf32>
    %c142 = arith.constant 142 : index
    %813 = memref.load %arg4[%c142] : memref<144xf32, #tpu.memory_space<smem>>
    %814 = vector.broadcast %813 : f32 to vector<8x48xf32>
    %815 = arith.mulf %814, %800 : vector<8x48xf32>
    %816 = arith.addf %799, %815 : vector<8x48xf32>
    %817 = vector.extract_strided_slice %680 {offsets = [2, 2], sizes = [8, 48], strides = [1, 1]} : vector<10x50xf32> to vector<8x48xf32>
    %c35_77 = arith.constant 35 : index
    %818 = memref.load %arg4[%c35_77] : memref<144xf32, #tpu.memory_space<smem>>
    %819 = vector.broadcast %818 : f32 to vector<8x48xf32>
    %820 = arith.mulf %819, %817 : vector<8x48xf32>
    %821 = arith.addf %804, %820 : vector<8x48xf32>
    %c71 = arith.constant 71 : index
    %822 = memref.load %arg4[%c71] : memref<144xf32, #tpu.memory_space<smem>>
    %823 = vector.broadcast %822 : f32 to vector<8x48xf32>
    %824 = arith.mulf %823, %817 : vector<8x48xf32>
    %825 = arith.addf %808, %824 : vector<8x48xf32>
    %c107 = arith.constant 107 : index
    %826 = memref.load %arg4[%c107] : memref<144xf32, #tpu.memory_space<smem>>
    %827 = vector.broadcast %826 : f32 to vector<8x48xf32>
    %828 = arith.mulf %827, %817 : vector<8x48xf32>
    %829 = arith.addf %812, %828 : vector<8x48xf32>
    %c143 = arith.constant 143 : index
    %830 = memref.load %arg4[%c143] : memref<144xf32, #tpu.memory_space<smem>>
    %831 = vector.broadcast %830 : f32 to vector<8x48xf32>
    %832 = arith.mulf %831, %817 : vector<8x48xf32>
    %833 = arith.addf %816, %832 : vector<8x48xf32>
    %cst_78 = arith.constant 0.000000e+00 : f32
    %834 = vector.broadcast %cst_78 : f32 to vector<8x48xf32>
    %835 = arith.cmpf ogt, %821, %834 : vector<8x48xf32>
    %cst_79 = arith.constant 0.000000e+00 : f32
    %836 = vector.broadcast %cst_79 : f32 to vector<8x48xf32>
    %837 = arith.minimumf %821, %836 : vector<8x48xf32>
    %838 = math.exp %837 : vector<8x48xf32>
    %cst_80 = arith.constant 1.000000e+00 : f32
    %839 = vector.broadcast %cst_80 : f32 to vector<8x48xf32>
    %840 = arith.subf %838, %839 : vector<8x48xf32>
    %841 = arith.select %835, %821, %840 : vector<8x48xi1>, vector<8x48xf32>
    %cst_81 = arith.constant 0.000000e+00 : f32
    %842 = vector.broadcast %cst_81 : f32 to vector<8x48xf32>
    %843 = arith.cmpf ogt, %825, %842 : vector<8x48xf32>
    %cst_82 = arith.constant 0.000000e+00 : f32
    %844 = vector.broadcast %cst_82 : f32 to vector<8x48xf32>
    %845 = arith.minimumf %825, %844 : vector<8x48xf32>
    %846 = math.exp %845 : vector<8x48xf32>
    %cst_83 = arith.constant 1.000000e+00 : f32
    %847 = vector.broadcast %cst_83 : f32 to vector<8x48xf32>
    %848 = arith.subf %846, %847 : vector<8x48xf32>
    %849 = arith.select %843, %825, %848 : vector<8x48xi1>, vector<8x48xf32>
    %cst_84 = arith.constant 0.000000e+00 : f32
    %850 = vector.broadcast %cst_84 : f32 to vector<8x48xf32>
    %851 = arith.cmpf ogt, %829, %850 : vector<8x48xf32>
    %cst_85 = arith.constant 0.000000e+00 : f32
    %852 = vector.broadcast %cst_85 : f32 to vector<8x48xf32>
    %853 = arith.minimumf %829, %852 : vector<8x48xf32>
    %854 = math.exp %853 : vector<8x48xf32>
    %cst_86 = arith.constant 1.000000e+00 : f32
    %855 = vector.broadcast %cst_86 : f32 to vector<8x48xf32>
    %856 = arith.subf %854, %855 : vector<8x48xf32>
    %857 = arith.select %851, %829, %856 : vector<8x48xi1>, vector<8x48xf32>
    %cst_87 = arith.constant 0.000000e+00 : f32
    %858 = vector.broadcast %cst_87 : f32 to vector<8x48xf32>
    %859 = arith.cmpf ogt, %833, %858 : vector<8x48xf32>
    %cst_88 = arith.constant 0.000000e+00 : f32
    %860 = vector.broadcast %cst_88 : f32 to vector<8x48xf32>
    %861 = arith.minimumf %833, %860 : vector<8x48xf32>
    %862 = math.exp %861 : vector<8x48xf32>
    %cst_89 = arith.constant 1.000000e+00 : f32
    %863 = vector.broadcast %cst_89 : f32 to vector<8x48xf32>
    %864 = arith.subf %862, %863 : vector<8x48xf32>
    %865 = arith.select %859, %833, %864 : vector<8x48xi1>, vector<8x48xf32>
    %866 = tpu.concatenate %841, %849, %857, %865 in 0 : vector<8x48xf32>, vector<8x48xf32>, vector<8x48xf32>, vector<8x48xf32> -> vector<32x48xf32>
    %cst_90 = arith.constant dense<0.000000e+00> : vector<32x24xf32>
    %867 = tpu.matmul %866, %4, %cst_90 {dimension_numbers = #tpu.dot_dimension_numbers<[1], [0], [0], [1], [0, 0, 1, 1], [], []>} : vector<32x48xf32>, vector<48x24xf32>, vector<32x24xf32> -> vector<32x24xf32>
    %cst_91 = arith.constant dense<0.000000e+00> : vector<32x24xf32>
    %868 = tpu.matmul %866, %5, %cst_91 {dimension_numbers = #tpu.dot_dimension_numbers<[1], [0], [0], [1], [0, 0, 1, 1], [], []>} : vector<32x48xf32>, vector<48x24xf32>, vector<32x24xf32> -> vector<32x24xf32>
    %869 = arith.maximumf %867, %868 : vector<32x24xf32>
    %cst_92 = arith.constant dense<0.000000e+00> : vector<16x24xf32>
    %870 = tpu.matmul %6, %869, %cst_92 {dimension_numbers = #tpu.dot_dimension_numbers<[1], [0], [0], [1], [0, 0, 1, 1], [], []>} : vector<16x32xf32>, vector<32x24xf32>, vector<16x24xf32> -> vector<16x24xf32>
    %cst_93 = arith.constant dense<0.000000e+00> : vector<16x24xf32>
    %871 = tpu.matmul %7, %869, %cst_93 {dimension_numbers = #tpu.dot_dimension_numbers<[1], [0], [0], [1], [0, 0, 1, 1], [], []>} : vector<16x32xf32>, vector<32x24xf32>, vector<16x24xf32> -> vector<16x24xf32>
    %872 = arith.maximumf %870, %871 : vector<16x24xf32>
    %873 = vector.extract_strided_slice %872 {offsets = [0, 0], sizes = [4, 24], strides = [1, 1]} : vector<16x24xf32> to vector<4x24xf32>
    %874 = vector.extract_strided_slice %872 {offsets = [4, 0], sizes = [4, 24], strides = [1, 1]} : vector<16x24xf32> to vector<4x24xf32>
    %875 = vector.extract_strided_slice %872 {offsets = [8, 0], sizes = [4, 24], strides = [1, 1]} : vector<16x24xf32> to vector<4x24xf32>
    %876 = vector.extract_strided_slice %872 {offsets = [12, 0], sizes = [4, 24], strides = [1, 1]} : vector<16x24xf32> to vector<4x24xf32>
    %877 = tpu.concatenate %873, %874, %875, %876 in 1 : vector<4x24xf32>, vector<4x24xf32>, vector<4x24xf32>, vector<4x24xf32> -> vector<4x96xf32>
    %c0_94 = arith.constant 0 : index
    %c0_95 = arith.constant 0 : index
    %878 = vector.load %arg14[%c0_94, %c0_95] : memref<128x128xf32, #tpu.memory_space<vmem>>, vector<128x128xf32>
    %c0_96 = arith.constant 0 : index
    %c0_97 = arith.constant 0 : index
    %879 = vector.load %arg15[%c0_96, %c0_97] : memref<1x128xf32, #tpu.memory_space<vmem>>, vector<1x128xf32>
    %c0_98 = arith.constant 0 : index
    %c0_99 = arith.constant 0 : index
    %880 = vector.load %arg16[%c0_98, %c0_99] : memref<64x128xf32, #tpu.memory_space<vmem>>, vector<64x128xf32>
    %c0_100 = arith.constant 0 : index
    %c0_101 = arith.constant 0 : index
    %881 = vector.load %arg17[%c0_100, %c0_101] : memref<1x128xf32, #tpu.memory_space<vmem>>, vector<1x128xf32>
    %cst_102 = arith.constant 0.000000e+00 : f32
    %882 = vector.broadcast %cst_102 : f32 to vector<1x32xf32>
    %cst_103 = arith.constant 0.000000e+00 : f32
    %883 = vector.broadcast %cst_103 : f32 to vector<1x32xf32>
    %cst_104 = arith.constant 0.000000e+00 : f32
    %884 = vector.broadcast %cst_104 : f32 to vector<1x32xf32>
    %cst_105 = arith.constant 0.000000e+00 : f32
    %885 = vector.broadcast %cst_105 : f32 to vector<1x32xf32>
    %886 = vector.extract_strided_slice %877 {offsets = [0, 0], sizes = [1, 96], strides = [1, 1]} : vector<4x96xf32> to vector<1x96xf32>
    %887 = tpu.concatenate %886, %882 in 1 : vector<1x96xf32>, vector<1x32xf32> -> vector<1x128xf32>
    %cst_106 = arith.constant dense<0.000000e+00> : vector<1x128xf32>
    %888 = tpu.matmul %887, %878, %cst_106 {dimension_numbers = #tpu.dot_dimension_numbers<[1], [0], [0], [1], [0, 0, 1, 1], [], []>} : vector<1x128xf32>, vector<128x128xf32>, vector<1x128xf32> -> vector<1x128xf32>
    %889 = arith.addf %888, %879 : vector<1x128xf32>
    %890 = vector.extract_strided_slice %889 {offsets = [0, 0], sizes = [1, 32], strides = [1, 1]} : vector<1x128xf32> to vector<1x32xf32>
    %891 = arith.negf %890 : vector<1x32xf32>
    %892 = math.exp %891 : vector<1x32xf32>
    %cst_107 = arith.constant 1.000000e+00 : f32
    %893 = vector.broadcast %cst_107 : f32 to vector<1x32xf32>
    %894 = arith.addf %893, %892 : vector<1x32xf32>
    %895 = arith.divf %893, %894 : vector<1x32xf32>
    %896 = vector.extract_strided_slice %889 {offsets = [0, 32], sizes = [1, 32], strides = [1, 1]} : vector<1x128xf32> to vector<1x32xf32>
    %897 = arith.negf %896 : vector<1x32xf32>
    %898 = math.exp %897 : vector<1x32xf32>
    %cst_108 = arith.constant 1.000000e+00 : f32
    %899 = vector.broadcast %cst_108 : f32 to vector<1x32xf32>
    %900 = arith.addf %899, %898 : vector<1x32xf32>
    %901 = arith.divf %899, %900 : vector<1x32xf32>
    %902 = vector.extract_strided_slice %889 {offsets = [0, 64], sizes = [1, 32], strides = [1, 1]} : vector<1x128xf32> to vector<1x32xf32>
    %903 = math.tanh %902 : vector<1x32xf32>
    %904 = vector.extract_strided_slice %889 {offsets = [0, 96], sizes = [1, 32], strides = [1, 1]} : vector<1x128xf32> to vector<1x32xf32>
    %905 = arith.negf %904 : vector<1x32xf32>
    %906 = math.exp %905 : vector<1x32xf32>
    %cst_109 = arith.constant 1.000000e+00 : f32
    %907 = vector.broadcast %cst_109 : f32 to vector<1x32xf32>
    %908 = arith.addf %907, %906 : vector<1x32xf32>
    %909 = arith.divf %907, %908 : vector<1x32xf32>
    %910 = arith.mulf %901, %883 : vector<1x32xf32>
    %911 = arith.mulf %895, %903 : vector<1x32xf32>
    %912 = arith.addf %910, %911 : vector<1x32xf32>
    %913 = math.tanh %912 : vector<1x32xf32>
    %914 = arith.mulf %909, %913 : vector<1x32xf32>
    %915 = tpu.concatenate %914, %884 in 1 : vector<1x32xf32>, vector<1x32xf32> -> vector<1x64xf32>
    %cst_110 = arith.constant dense<0.000000e+00> : vector<1x128xf32>
    %916 = tpu.matmul %915, %880, %cst_110 {dimension_numbers = #tpu.dot_dimension_numbers<[1], [0], [0], [1], [0, 0, 1, 1], [], []>} : vector<1x64xf32>, vector<64x128xf32>, vector<1x128xf32> -> vector<1x128xf32>
    %917 = arith.addf %916, %881 : vector<1x128xf32>
    %918 = vector.extract_strided_slice %917 {offsets = [0, 0], sizes = [1, 32], strides = [1, 1]} : vector<1x128xf32> to vector<1x32xf32>
    %919 = arith.negf %918 : vector<1x32xf32>
    %920 = math.exp %919 : vector<1x32xf32>
    %cst_111 = arith.constant 1.000000e+00 : f32
    %921 = vector.broadcast %cst_111 : f32 to vector<1x32xf32>
    %922 = arith.addf %921, %920 : vector<1x32xf32>
    %923 = arith.divf %921, %922 : vector<1x32xf32>
    %924 = vector.extract_strided_slice %917 {offsets = [0, 32], sizes = [1, 32], strides = [1, 1]} : vector<1x128xf32> to vector<1x32xf32>
    %925 = arith.negf %924 : vector<1x32xf32>
    %926 = math.exp %925 : vector<1x32xf32>
    %cst_112 = arith.constant 1.000000e+00 : f32
    %927 = vector.broadcast %cst_112 : f32 to vector<1x32xf32>
    %928 = arith.addf %927, %926 : vector<1x32xf32>
    %929 = arith.divf %927, %928 : vector<1x32xf32>
    %930 = vector.extract_strided_slice %917 {offsets = [0, 64], sizes = [1, 32], strides = [1, 1]} : vector<1x128xf32> to vector<1x32xf32>
    %931 = math.tanh %930 : vector<1x32xf32>
    %932 = vector.extract_strided_slice %917 {offsets = [0, 96], sizes = [1, 32], strides = [1, 1]} : vector<1x128xf32> to vector<1x32xf32>
    %933 = arith.negf %932 : vector<1x32xf32>
    %934 = math.exp %933 : vector<1x32xf32>
    %cst_113 = arith.constant 1.000000e+00 : f32
    %935 = vector.broadcast %cst_113 : f32 to vector<1x32xf32>
    %936 = arith.addf %935, %934 : vector<1x32xf32>
    %937 = arith.divf %935, %936 : vector<1x32xf32>
    %938 = arith.mulf %929, %885 : vector<1x32xf32>
    %939 = arith.mulf %923, %931 : vector<1x32xf32>
    %940 = arith.addf %938, %939 : vector<1x32xf32>
    %941 = math.tanh %940 : vector<1x32xf32>
    %942 = arith.mulf %937, %941 : vector<1x32xf32>
    %943 = vector.extract_strided_slice %877 {offsets = [1, 0], sizes = [1, 96], strides = [1, 1]} : vector<4x96xf32> to vector<1x96xf32>
    %944 = tpu.concatenate %943, %914 in 1 : vector<1x96xf32>, vector<1x32xf32> -> vector<1x128xf32>
    %cst_114 = arith.constant dense<0.000000e+00> : vector<1x128xf32>
    %945 = tpu.matmul %944, %878, %cst_114 {dimension_numbers = #tpu.dot_dimension_numbers<[1], [0], [0], [1], [0, 0, 1, 1], [], []>} : vector<1x128xf32>, vector<128x128xf32>, vector<1x128xf32> -> vector<1x128xf32>
    %946 = arith.addf %945, %879 : vector<1x128xf32>
    %947 = vector.extract_strided_slice %946 {offsets = [0, 0], sizes = [1, 32], strides = [1, 1]} : vector<1x128xf32> to vector<1x32xf32>
    %948 = arith.negf %947 : vector<1x32xf32>
    %949 = math.exp %948 : vector<1x32xf32>
    %cst_115 = arith.constant 1.000000e+00 : f32
    %950 = vector.broadcast %cst_115 : f32 to vector<1x32xf32>
    %951 = arith.addf %950, %949 : vector<1x32xf32>
    %952 = arith.divf %950, %951 : vector<1x32xf32>
    %953 = vector.extract_strided_slice %946 {offsets = [0, 32], sizes = [1, 32], strides = [1, 1]} : vector<1x128xf32> to vector<1x32xf32>
    %954 = arith.negf %953 : vector<1x32xf32>
    %955 = math.exp %954 : vector<1x32xf32>
    %cst_116 = arith.constant 1.000000e+00 : f32
    %956 = vector.broadcast %cst_116 : f32 to vector<1x32xf32>
    %957 = arith.addf %956, %955 : vector<1x32xf32>
    %958 = arith.divf %956, %957 : vector<1x32xf32>
    %959 = vector.extract_strided_slice %946 {offsets = [0, 64], sizes = [1, 32], strides = [1, 1]} : vector<1x128xf32> to vector<1x32xf32>
    %960 = math.tanh %959 : vector<1x32xf32>
    %961 = vector.extract_strided_slice %946 {offsets = [0, 96], sizes = [1, 32], strides = [1, 1]} : vector<1x128xf32> to vector<1x32xf32>
    %962 = arith.negf %961 : vector<1x32xf32>
    %963 = math.exp %962 : vector<1x32xf32>
    %cst_117 = arith.constant 1.000000e+00 : f32
    %964 = vector.broadcast %cst_117 : f32 to vector<1x32xf32>
    %965 = arith.addf %964, %963 : vector<1x32xf32>
    %966 = arith.divf %964, %965 : vector<1x32xf32>
    %967 = arith.mulf %958, %912 : vector<1x32xf32>
    %968 = arith.mulf %952, %960 : vector<1x32xf32>
    %969 = arith.addf %967, %968 : vector<1x32xf32>
    %970 = math.tanh %969 : vector<1x32xf32>
    %971 = arith.mulf %966, %970 : vector<1x32xf32>
    %972 = tpu.concatenate %971, %942 in 1 : vector<1x32xf32>, vector<1x32xf32> -> vector<1x64xf32>
    %cst_118 = arith.constant dense<0.000000e+00> : vector<1x128xf32>
    %973 = tpu.matmul %972, %880, %cst_118 {dimension_numbers = #tpu.dot_dimension_numbers<[1], [0], [0], [1], [0, 0, 1, 1], [], []>} : vector<1x64xf32>, vector<64x128xf32>, vector<1x128xf32> -> vector<1x128xf32>
    %974 = arith.addf %973, %881 : vector<1x128xf32>
    %975 = vector.extract_strided_slice %974 {offsets = [0, 0], sizes = [1, 32], strides = [1, 1]} : vector<1x128xf32> to vector<1x32xf32>
    %976 = arith.negf %975 : vector<1x32xf32>
    %977 = math.exp %976 : vector<1x32xf32>
    %cst_119 = arith.constant 1.000000e+00 : f32
    %978 = vector.broadcast %cst_119 : f32 to vector<1x32xf32>
    %979 = arith.addf %978, %977 : vector<1x32xf32>
    %980 = arith.divf %978, %979 : vector<1x32xf32>
    %981 = vector.extract_strided_slice %974 {offsets = [0, 32], sizes = [1, 32], strides = [1, 1]} : vector<1x128xf32> to vector<1x32xf32>
    %982 = arith.negf %981 : vector<1x32xf32>
    %983 = math.exp %982 : vector<1x32xf32>
    %cst_120 = arith.constant 1.000000e+00 : f32
    %984 = vector.broadcast %cst_120 : f32 to vector<1x32xf32>
    %985 = arith.addf %984, %983 : vector<1x32xf32>
    %986 = arith.divf %984, %985 : vector<1x32xf32>
    %987 = vector.extract_strided_slice %974 {offsets = [0, 64], sizes = [1, 32], strides = [1, 1]} : vector<1x128xf32> to vector<1x32xf32>
    %988 = math.tanh %987 : vector<1x32xf32>
    %989 = vector.extract_strided_slice %974 {offsets = [0, 96], sizes = [1, 32], strides = [1, 1]} : vector<1x128xf32> to vector<1x32xf32>
    %990 = arith.negf %989 : vector<1x32xf32>
    %991 = math.exp %990 : vector<1x32xf32>
    %cst_121 = arith.constant 1.000000e+00 : f32
    %992 = vector.broadcast %cst_121 : f32 to vector<1x32xf32>
    %993 = arith.addf %992, %991 : vector<1x32xf32>
    %994 = arith.divf %992, %993 : vector<1x32xf32>
    %995 = arith.mulf %986, %940 : vector<1x32xf32>
    %996 = arith.mulf %980, %988 : vector<1x32xf32>
    %997 = arith.addf %995, %996 : vector<1x32xf32>
    %998 = math.tanh %997 : vector<1x32xf32>
    %999 = arith.mulf %994, %998 : vector<1x32xf32>
    %1000 = vector.extract_strided_slice %877 {offsets = [2, 0], sizes = [1, 96], strides = [1, 1]} : vector<4x96xf32> to vector<1x96xf32>
    %1001 = tpu.concatenate %1000, %971 in 1 : vector<1x96xf32>, vector<1x32xf32> -> vector<1x128xf32>
    %cst_122 = arith.constant dense<0.000000e+00> : vector<1x128xf32>
    %1002 = tpu.matmul %1001, %878, %cst_122 {dimension_numbers = #tpu.dot_dimension_numbers<[1], [0], [0], [1], [0, 0, 1, 1], [], []>} : vector<1x128xf32>, vector<128x128xf32>, vector<1x128xf32> -> vector<1x128xf32>
    %1003 = arith.addf %1002, %879 : vector<1x128xf32>
    %1004 = vector.extract_strided_slice %1003 {offsets = [0, 0], sizes = [1, 32], strides = [1, 1]} : vector<1x128xf32> to vector<1x32xf32>
    %1005 = arith.negf %1004 : vector<1x32xf32>
    %1006 = math.exp %1005 : vector<1x32xf32>
    %cst_123 = arith.constant 1.000000e+00 : f32
    %1007 = vector.broadcast %cst_123 : f32 to vector<1x32xf32>
    %1008 = arith.addf %1007, %1006 : vector<1x32xf32>
    %1009 = arith.divf %1007, %1008 : vector<1x32xf32>
    %1010 = vector.extract_strided_slice %1003 {offsets = [0, 32], sizes = [1, 32], strides = [1, 1]} : vector<1x128xf32> to vector<1x32xf32>
    %1011 = arith.negf %1010 : vector<1x32xf32>
    %1012 = math.exp %1011 : vector<1x32xf32>
    %cst_124 = arith.constant 1.000000e+00 : f32
    %1013 = vector.broadcast %cst_124 : f32 to vector<1x32xf32>
    %1014 = arith.addf %1013, %1012 : vector<1x32xf32>
    %1015 = arith.divf %1013, %1014 : vector<1x32xf32>
    %1016 = vector.extract_strided_slice %1003 {offsets = [0, 64], sizes = [1, 32], strides = [1, 1]} : vector<1x128xf32> to vector<1x32xf32>
    %1017 = math.tanh %1016 : vector<1x32xf32>
    %1018 = vector.extract_strided_slice %1003 {offsets = [0, 96], sizes = [1, 32], strides = [1, 1]} : vector<1x128xf32> to vector<1x32xf32>
    %1019 = arith.negf %1018 : vector<1x32xf32>
    %1020 = math.exp %1019 : vector<1x32xf32>
    %cst_125 = arith.constant 1.000000e+00 : f32
    %1021 = vector.broadcast %cst_125 : f32 to vector<1x32xf32>
    %1022 = arith.addf %1021, %1020 : vector<1x32xf32>
    %1023 = arith.divf %1021, %1022 : vector<1x32xf32>
    %1024 = arith.mulf %1015, %969 : vector<1x32xf32>
    %1025 = arith.mulf %1009, %1017 : vector<1x32xf32>
    %1026 = arith.addf %1024, %1025 : vector<1x32xf32>
    %1027 = math.tanh %1026 : vector<1x32xf32>
    %1028 = arith.mulf %1023, %1027 : vector<1x32xf32>
    %1029 = tpu.concatenate %1028, %999 in 1 : vector<1x32xf32>, vector<1x32xf32> -> vector<1x64xf32>
    %cst_126 = arith.constant dense<0.000000e+00> : vector<1x128xf32>
    %1030 = tpu.matmul %1029, %880, %cst_126 {dimension_numbers = #tpu.dot_dimension_numbers<[1], [0], [0], [1], [0, 0, 1, 1], [], []>} : vector<1x64xf32>, vector<64x128xf32>, vector<1x128xf32> -> vector<1x128xf32>
    %1031 = arith.addf %1030, %881 : vector<1x128xf32>
    %1032 = vector.extract_strided_slice %1031 {offsets = [0, 0], sizes = [1, 32], strides = [1, 1]} : vector<1x128xf32> to vector<1x32xf32>
    %1033 = arith.negf %1032 : vector<1x32xf32>
    %1034 = math.exp %1033 : vector<1x32xf32>
    %cst_127 = arith.constant 1.000000e+00 : f32
    %1035 = vector.broadcast %cst_127 : f32 to vector<1x32xf32>
    %1036 = arith.addf %1035, %1034 : vector<1x32xf32>
    %1037 = arith.divf %1035, %1036 : vector<1x32xf32>
    %1038 = vector.extract_strided_slice %1031 {offsets = [0, 32], sizes = [1, 32], strides = [1, 1]} : vector<1x128xf32> to vector<1x32xf32>
    %1039 = arith.negf %1038 : vector<1x32xf32>
    %1040 = math.exp %1039 : vector<1x32xf32>
    %cst_128 = arith.constant 1.000000e+00 : f32
    %1041 = vector.broadcast %cst_128 : f32 to vector<1x32xf32>
    %1042 = arith.addf %1041, %1040 : vector<1x32xf32>
    %1043 = arith.divf %1041, %1042 : vector<1x32xf32>
    %1044 = vector.extract_strided_slice %1031 {offsets = [0, 64], sizes = [1, 32], strides = [1, 1]} : vector<1x128xf32> to vector<1x32xf32>
    %1045 = math.tanh %1044 : vector<1x32xf32>
    %1046 = vector.extract_strided_slice %1031 {offsets = [0, 96], sizes = [1, 32], strides = [1, 1]} : vector<1x128xf32> to vector<1x32xf32>
    %1047 = arith.negf %1046 : vector<1x32xf32>
    %1048 = math.exp %1047 : vector<1x32xf32>
    %cst_129 = arith.constant 1.000000e+00 : f32
    %1049 = vector.broadcast %cst_129 : f32 to vector<1x32xf32>
    %1050 = arith.addf %1049, %1048 : vector<1x32xf32>
    %1051 = arith.divf %1049, %1050 : vector<1x32xf32>
    %1052 = arith.mulf %1043, %997 : vector<1x32xf32>
    %1053 = arith.mulf %1037, %1045 : vector<1x32xf32>
    %1054 = arith.addf %1052, %1053 : vector<1x32xf32>
    %1055 = math.tanh %1054 : vector<1x32xf32>
    %1056 = arith.mulf %1051, %1055 : vector<1x32xf32>
    %1057 = vector.extract_strided_slice %877 {offsets = [3, 0], sizes = [1, 96], strides = [1, 1]} : vector<4x96xf32> to vector<1x96xf32>
    %1058 = tpu.concatenate %1057, %1028 in 1 : vector<1x96xf32>, vector<1x32xf32> -> vector<1x128xf32>
    %cst_130 = arith.constant dense<0.000000e+00> : vector<1x128xf32>
    %1059 = tpu.matmul %1058, %878, %cst_130 {dimension_numbers = #tpu.dot_dimension_numbers<[1], [0], [0], [1], [0, 0, 1, 1], [], []>} : vector<1x128xf32>, vector<128x128xf32>, vector<1x128xf32> -> vector<1x128xf32>
    %1060 = arith.addf %1059, %879 : vector<1x128xf32>
    %1061 = vector.extract_strided_slice %1060 {offsets = [0, 0], sizes = [1, 32], strides = [1, 1]} : vector<1x128xf32> to vector<1x32xf32>
    %1062 = arith.negf %1061 : vector<1x32xf32>
    %1063 = math.exp %1062 : vector<1x32xf32>
    %cst_131 = arith.constant 1.000000e+00 : f32
    %1064 = vector.broadcast %cst_131 : f32 to vector<1x32xf32>
    %1065 = arith.addf %1064, %1063 : vector<1x32xf32>
    %1066 = arith.divf %1064, %1065 : vector<1x32xf32>
    %1067 = vector.extract_strided_slice %1060 {offsets = [0, 32], sizes = [1, 32], strides = [1, 1]} : vector<1x128xf32> to vector<1x32xf32>
    %1068 = arith.negf %1067 : vector<1x32xf32>
    %1069 = math.exp %1068 : vector<1x32xf32>
    %cst_132 = arith.constant 1.000000e+00 : f32
    %1070 = vector.broadcast %cst_132 : f32 to vector<1x32xf32>
    %1071 = arith.addf %1070, %1069 : vector<1x32xf32>
    %1072 = arith.divf %1070, %1071 : vector<1x32xf32>
    %1073 = vector.extract_strided_slice %1060 {offsets = [0, 64], sizes = [1, 32], strides = [1, 1]} : vector<1x128xf32> to vector<1x32xf32>
    %1074 = math.tanh %1073 : vector<1x32xf32>
    %1075 = vector.extract_strided_slice %1060 {offsets = [0, 96], sizes = [1, 32], strides = [1, 1]} : vector<1x128xf32> to vector<1x32xf32>
    %1076 = arith.negf %1075 : vector<1x32xf32>
    %1077 = math.exp %1076 : vector<1x32xf32>
    %cst_133 = arith.constant 1.000000e+00 : f32
    %1078 = vector.broadcast %cst_133 : f32 to vector<1x32xf32>
    %1079 = arith.addf %1078, %1077 : vector<1x32xf32>
    %1080 = arith.divf %1078, %1079 : vector<1x32xf32>
    %1081 = arith.mulf %1072, %1026 : vector<1x32xf32>
    %1082 = arith.mulf %1066, %1074 : vector<1x32xf32>
    %1083 = arith.addf %1081, %1082 : vector<1x32xf32>
    %1084 = math.tanh %1083 : vector<1x32xf32>
    %1085 = arith.mulf %1080, %1084 : vector<1x32xf32>
    %1086 = tpu.concatenate %1085, %1056 in 1 : vector<1x32xf32>, vector<1x32xf32> -> vector<1x64xf32>
    %cst_134 = arith.constant dense<0.000000e+00> : vector<1x128xf32>
    %1087 = tpu.matmul %1086, %880, %cst_134 {dimension_numbers = #tpu.dot_dimension_numbers<[1], [0], [0], [1], [0, 0, 1, 1], [], []>} : vector<1x64xf32>, vector<64x128xf32>, vector<1x128xf32> -> vector<1x128xf32>
    %1088 = arith.addf %1087, %881 : vector<1x128xf32>
    %1089 = vector.extract_strided_slice %1088 {offsets = [0, 0], sizes = [1, 32], strides = [1, 1]} : vector<1x128xf32> to vector<1x32xf32>
    %1090 = arith.negf %1089 : vector<1x32xf32>
    %1091 = math.exp %1090 : vector<1x32xf32>
    %cst_135 = arith.constant 1.000000e+00 : f32
    %1092 = vector.broadcast %cst_135 : f32 to vector<1x32xf32>
    %1093 = arith.addf %1092, %1091 : vector<1x32xf32>
    %1094 = arith.divf %1092, %1093 : vector<1x32xf32>
    %1095 = vector.extract_strided_slice %1088 {offsets = [0, 32], sizes = [1, 32], strides = [1, 1]} : vector<1x128xf32> to vector<1x32xf32>
    %1096 = arith.negf %1095 : vector<1x32xf32>
    %1097 = math.exp %1096 : vector<1x32xf32>
    %cst_136 = arith.constant 1.000000e+00 : f32
    %1098 = vector.broadcast %cst_136 : f32 to vector<1x32xf32>
    %1099 = arith.addf %1098, %1097 : vector<1x32xf32>
    %1100 = arith.divf %1098, %1099 : vector<1x32xf32>
    %1101 = vector.extract_strided_slice %1088 {offsets = [0, 64], sizes = [1, 32], strides = [1, 1]} : vector<1x128xf32> to vector<1x32xf32>
    %1102 = math.tanh %1101 : vector<1x32xf32>
    %1103 = vector.extract_strided_slice %1088 {offsets = [0, 96], sizes = [1, 32], strides = [1, 1]} : vector<1x128xf32> to vector<1x32xf32>
    %1104 = arith.negf %1103 : vector<1x32xf32>
    %1105 = math.exp %1104 : vector<1x32xf32>
    %cst_137 = arith.constant 1.000000e+00 : f32
    %1106 = vector.broadcast %cst_137 : f32 to vector<1x32xf32>
    %1107 = arith.addf %1106, %1105 : vector<1x32xf32>
    %1108 = arith.divf %1106, %1107 : vector<1x32xf32>
    %1109 = arith.mulf %1100, %1054 : vector<1x32xf32>
    %1110 = arith.mulf %1094, %1102 : vector<1x32xf32>
    %1111 = arith.addf %1109, %1110 : vector<1x32xf32>
    %1112 = math.tanh %1111 : vector<1x32xf32>
    %1113 = arith.mulf %1108, %1112 : vector<1x32xf32>
    %1114 = tpu.concatenate %942, %999, %1056, %1113 in 1 : vector<1x32xf32>, vector<1x32xf32>, vector<1x32xf32>, vector<1x32xf32> -> vector<1x128xf32>
    %c0_138 = arith.constant 0 : index
    %c0_139 = arith.constant 0 : index
    %1115 = vector.load %arg18[%c0_138, %c0_139] : memref<128x32xf32, #tpu.memory_space<vmem>>, vector<128x32xf32>
    %cst_140 = arith.constant dense<0.000000e+00> : vector<1x32xf32>
    %1116 = tpu.matmul %1114, %1115, %cst_140 {dimension_numbers = #tpu.dot_dimension_numbers<[1], [0], [0], [1], [0, 0, 1, 1], [], []>} : vector<1x128xf32>, vector<128x32xf32>, vector<1x32xf32> -> vector<1x32xf32>
    %c0_141 = arith.constant 0 : index
    %c0_142 = arith.constant 0 : index
    %1117 = vector.load %arg19[%c0_141, %c0_142] : memref<1x32xf32, #tpu.memory_space<vmem>>, vector<1x32xf32>
    %1118 = arith.addf %1116, %1117 : vector<1x32xf32>
    %c0_143 = arith.constant 0 : index
    %c0_144 = arith.constant 0 : index
    %c0_145 = arith.constant 0 : index
    %1119 = vector.load %arg20[%c0_143, %c0_144, %c0_145] : memref<1x1x32xf32, #tpu.memory_space<vmem>>, vector<1x1x32xf32>
    %1120 = vector.shape_cast %1119 : vector<1x1x32xf32> to vector<1x32xf32>
    %1121 = vector.shape_cast %1118 : vector<1x32xf32> to vector<1x1x32xf32>
    tpu.vector_store %arg20[%c0_143, %c0_144, %c0_145], %1121 {strides = array<i32>} : memref<1x1x32xf32, #tpu.memory_space<vmem>>, vector<1x1x32xf32>,
    return
  }
  func.func @transform_0(%arg0: i32) -> (i32, i32, i32) {
    %c0_i32 = arith.constant 0 : i32
    %c0_i32_0 = arith.constant 0 : i32
    %c0_i32_1 = arith.constant 0 : i32
    return %arg0, %c0_i32, %c0_i32_0 : i32, i32, i32
  }
  func.func @transform_1(%arg0: i32) -> i32 {
    %c0_i32 = arith.constant 0 : i32
    %c0_i32_0 = arith.constant 0 : i32
    return %c0_i32 : i32
  }
  func.func @transform_2(%arg0: i32) -> i32 {
    %c0_i32 = arith.constant 0 : i32
    %c0_i32_0 = arith.constant 0 : i32
    return %c0_i32 : i32
  }
  func.func @transform_3(%arg0: i32) -> i32 {
    %c0_i32 = arith.constant 0 : i32
    %c0_i32_0 = arith.constant 0 : i32
    return %c0_i32 : i32
  }
  func.func @transform_4(%arg0: i32) -> i32 {
    %c0_i32 = arith.constant 0 : i32
    %c0_i32_0 = arith.constant 0 : i32
    return %c0_i32 : i32
  }
  func.func @transform_5(%arg0: i32) -> (i32, i32) {
    %c0_i32 = arith.constant 0 : i32
    %c0_i32_0 = arith.constant 0 : i32
    %c0_i32_1 = arith.constant 0 : i32
    return %c0_i32, %c0_i32_0 : i32, i32
  }
  func.func @transform_6(%arg0: i32) -> (i32, i32) {
    %c0_i32 = arith.constant 0 : i32
    %c0_i32_0 = arith.constant 0 : i32
    %c0_i32_1 = arith.constant 0 : i32
    return %c0_i32, %c0_i32_0 : i32, i32
  }
  func.func @transform_7(%arg0: i32) -> (i32, i32) {
    %c0_i32 = arith.constant 0 : i32
    %c0_i32_0 = arith.constant 0 : i32
    %c0_i32_1 = arith.constant 0 : i32
    return %c0_i32, %c0_i32_0 : i32, i32
  }
  func.func @transform_8(%arg0: i32) -> (i32, i32) {
    %c0_i32 = arith.constant 0 : i32
    %c0_i32_0 = arith.constant 0 : i32
    %c0_i32_1 = arith.constant 0 : i32
    return %c0_i32, %c0_i32_0 : i32, i32
  }
  func.func @transform_9(%arg0: i32) -> (i32, i32) {
    %c0_i32 = arith.constant 0 : i32
    %c0_i32_0 = arith.constant 0 : i32
    %c0_i32_1 = arith.constant 0 : i32
    return %c0_i32, %c0_i32_0 : i32, i32
  }
  func.func @transform_10(%arg0: i32) -> (i32, i32) {
    %c0_i32 = arith.constant 0 : i32
    %c0_i32_0 = arith.constant 0 : i32
    %c0_i32_1 = arith.constant 0 : i32
    return %c0_i32, %c0_i32_0 : i32, i32
  }
  func.func @transform_11(%arg0: i32) -> (i32, i32) {
    %c0_i32 = arith.constant 0 : i32
    %c0_i32_0 = arith.constant 0 : i32
    %c0_i32_1 = arith.constant 0 : i32
    return %c0_i32, %c0_i32_0 : i32, i32
  }
  func.func @transform_12(%arg0: i32) -> (i32, i32) {
    %c0_i32 = arith.constant 0 : i32
    %c0_i32_0 = arith.constant 0 : i32
    %c0_i32_1 = arith.constant 0 : i32
    return %c0_i32, %c0_i32_0 : i32, i32
  }
  func.func @transform_13(%arg0: i32) -> (i32, i32) {
    %c0_i32 = arith.constant 0 : i32
    %c0_i32_0 = arith.constant 0 : i32
    %c0_i32_1 = arith.constant 0 : i32
    return %c0_i32, %c0_i32_0 : i32, i32
  }
  func.func @transform_14(%arg0: i32) -> (i32, i32) {
    %c0_i32 = arith.constant 0 : i32
    %c0_i32_0 = arith.constant 0 : i32
    %c0_i32_1 = arith.constant 0 : i32
    return %c0_i32, %c0_i32_0 : i32, i32
  }
  func.func @transform_15(%arg0: i32) -> (i32, i32) {
    %c0_i32 = arith.constant 0 : i32
    %c0_i32_0 = arith.constant 0 : i32
    %c0_i32_1 = arith.constant 0 : i32
    return %c0_i32, %c0_i32_0 : i32, i32
  }
  func.func @transform_16(%arg0: i32) -> (i32, i32) {
    %c0_i32 = arith.constant 0 : i32
    %c0_i32_0 = arith.constant 0 : i32
    %c0_i32_1 = arith.constant 0 : i32
    return %c0_i32, %c0_i32_0 : i32, i32
  }
  func.func @transform_17(%arg0: i32) -> (i32, i32) {
    %c0_i32 = arith.constant 0 : i32
    %c0_i32_0 = arith.constant 0 : i32
    %c0_i32_1 = arith.constant 0 : i32
    return %c0_i32, %c0_i32_0 : i32, i32
  }
  func.func @transform_18(%arg0: i32) -> (i32, i32) {
    %c0_i32 = arith.constant 0 : i32
    %c0_i32_0 = arith.constant 0 : i32
    %c0_i32_1 = arith.constant 0 : i32
    return %c0_i32, %c0_i32_0 : i32, i32
  }
  func.func @transform_19(%arg0: i32) -> (i32, i32, i32) {
    %c0_i32 = arith.constant 0 : i32
    %c0_i32_0 = arith.constant 0 : i32
    %c0_i32_1 = arith.constant 0 : i32
    return %arg0, %c0_i32, %c0_i32_0 : i32, i32, i32
  }
}

</mosaic_0001>

<bundles_post_ra>
// kernel: tile.8
= control target key start
LH: loop header
LB: loop body
LE: loop exit
PB: predicated region body
PF: predicated region fallthrough
CT: control target
= control target key end

     0   :  { %s22_s0 = inlined_call_operand.vmem [shape: f32[8], index: 0, kind: input, shape index: {}]   ;;  %s23_s1 = inlined_call_operand.vmem [shape: f32[4,8], index: 1, kind: output, shape index: {}]  }
   0x1   :  { %v4_v0 = vld [vmem:[%s22_s0] ss:$0 sm:$0xff] }
   0x2   :  { %5 = vst [vmem:[%s23_s1] sm:$0xf] %v4_v0 }

// kernel: tile.9
= control target key start
LH: loop header
LB: loop body
LE: loop exit
PB: predicated region body
PF: predicated region fallthrough
CT: control target
= control target key end

     0   :  { %s37_s8 = smov 8   ;;  %s38_s9 = smov 16   ;;  %vm7_vm0 = vcmask 64512   ;;  %vm13_vm1 = vcmask 261312   ;;  %vm19_vm2 = vcmask 195712   ;;  %vm25_vm3 = vcmask 130112   ;;  %s55_s0 = inlined_call_operand.vmem [shape: f32[4,8], index: 0, kind: input, shape index: {}]   ;;  %s56_s1 = inlined_call_operand.vmem [shape: f32[1,32], index: 1, kind: output, shape index: {}]  }
   0x1   :  { %v4_v0 = vld [vmem:[%s55_s0] sm:$0xf]  ;;  %s36_s0 = smov 24  }
   0x2   :  { %5 = vst [vmem:[#allocation1] sm:$0xf] %v4_v0 }
   0x9   :  { %v10_v1 = vld [vmem:[#allocation1 + $0x3] sm:$0x1]   ;;  %v22_v2 = vld [vmem:[#allocation1 + $0x1] sm:$0x1]   ;;  %v16_v3 = vld [vmem:[#allocation1 + $0x2] sm:$0x1]  }
   0xa   :  { %11 = vrot.lane.b32.xlu0 %v10_v1, %s36_s0  ;;  %23 = vrot.lane.b32.xlu1 %v22_v2, %s37_s8  ;;  %v6_v4 = vld [vmem:[#allocation1] sm:$0x1]  }
   0xb   :  { %8 = vst.msk [vmem:[#allocation0] sm:$0x1] %vm7_vm0, %v6_v4  }
  0x12   :  { %17 = vrot.lane.b32.xlu0 %v16_v3, %s38_s9 }
  0x7c   :  { %v12_v5 = vpop.permute.xlu0 %11   ;;  %v24_v6 = vpop.permute.xlu1 %23  }
  0x7d   :  { %14 = vst.msk [vmem:[#allocation0] sm:$0x1] %vm13_vm1, %v12_v5  }
  0x84   :  { %v18_v7 = vpop.permute.xlu0 %17  }
  0x85   :  { %20 = vst.msk [vmem:[#allocation0] sm:$0x1] %vm19_vm2, %v18_v7  }
  0x86   :  { %26 = vst.msk [vmem:[#allocation0] sm:$0x1] %vm25_vm3, %v24_v6  }
  0x8d   :  { %v29_v8 = vld [vmem:[#allocation0] sm:$0x1] }
  0x8e   :  { %32 = vst [vmem:[%s56_s1] sm:$0x1] %v29_v8 }

// kernel: net_forward.1
= control target key start
LH: loop header
LB: loop body
LE: loop exit
PB: predicated region body
PF: predicated region fallthrough
CT: control target
= control target key end

     0   :  { %s6657_s0 = inlined_call_operand.vmem [shape: f32[2,18,98], index: 0, kind: input, shape index: {}]   ;;  %s6658_s1 = inlined_call_operand.vmem [shape: f32[36], index: 1, kind: input, shape index: {}]   ;;  %s6659_s2 = inlined_call_operand.vmem [shape: f32[4], index: 2, kind: input, shape index: {}]   ;;  %s6660_s3 = inlined_call_operand.vmem [shape: f32[144], index: 3, kind: input, shape index: {}]   ;;  %s6661_s4 = inlined_call_operand.vmem [shape: f32[4], index: 4, kind: input, shape index: {}]   ;;  %s6662_s5 = inlined_call_operand.vmem [shape: f32[96,50], index: 5, kind: input, shape index: {}]   ;;  %s6663_s6 = inlined_call_operand.vmem [shape: f32[96,50], index: 6, kind: input, shape index: {}]   ;;  %s6664_s7 = inlined_call_operand.vmem [shape: f32[40,64], index: 7, kind: input, shape index: {}]   ;;  %s6665_s8 = inlined_call_operand.vmem [shape: f32[40,64], index: 8, kind: input, shape index: {}]   ;;  %s6666_s9 = inlined_call_operand.vmem [shape: f32[48,24], index: 9, kind: input, shape index: {}]   ;;  %s6667_s10 = inlined_call_operand.vmem [shape: f32[48,24], index: 10, kind: input, shape index: {}]   ;;  %s6668_s11 = inlined_call_operand.vmem [shape: f32[16,32], index: 11, kind: input, shape index: {}]   ;;  %s6669_s12 = inlined_call_operand.vmem [shape: f32[16,32], index: 12, kind: input, shape index: {}]   ;;  %s6670_s13 = inlined_call_operand.vmem [shape: f32[128,128], index: 13, kind: input, shape index: {}]   ;;  %s6671_s14 = inlined_call_operand.vmem [shape: f32[1,128], index: 14, kind: input, shape index: {}]   ;;  %s6672_s15 = inlined_call_operand.vmem [shape: f32[64,128], index: 15, kind: input, shape index: {}]   ;;  %s6673_s16 = inlined_call_operand.vmem [shape: f32[1,128], index: 16, kind: input, shape index: {}]   ;;  %s6674_s17 = inlined_call_operand.vmem [shape: f32[128,32], index: 17, kind: input, shape index: {}]   ;;  %s6675_s18 = inlined_call_operand.vmem [shape: f32[1,32], index: 18, kind: input, shape index: {}]   ;;  %s6676_s19 = inlined_call_operand.vmem [shape: f32[2,1,32], index: 19, kind: output, shape index: {}]  }
   0x1   :  { %6678 = sst [smem:[#allocation13_spill]] %s6657_s0 }
   0x2   :  { %6679 = sst [smem:[#allocation14_spill]] %s6658_s1 }
   0x3   :  { %6680 = sst [smem:[#allocation15_spill]] %s6659_s2 }
   0x4   :  { %6681 = sst [smem:[#allocation16_spill]] %s6660_s3 }
   0x5   :  { %24 = vsyncpa [#allocation3], 0 }
   0x6   :  { %25 = vsyncpa [#allocation5], 0 }
   0x7   :  { %26 = vsyncpa [#allocation8], 0  ;;  %s4712_s0 = smov 0  }
   0x8 LB: > { %6682 = sst [smem:[#allocation12_spill]] %s4598_s0  ;;  %s4721_s22 = sadd.s32 4294967295, %s4598_s0   ;;  %s4598_s0 = sphi %s4712_s0, %s32_s0  }
   0x9   : > { %s6683_s21 = sld [smem:[#allocation15_spill]]  ;;  %p4099_p0 = scmp.ge.s32.totalorder %s4598_s0, 1 }
   0xa   : > { %p467_p1 = scmp.lt.s32.totalorder %s4598_s0, 3  ;;  %p4402_p2 = scmp.eq.s32.totalorder %s4721_s22, 0 }
   0xb   : > { %s6685_s25 = sld [smem:[#allocation14_spill]]  ;;  %s4600_s0 = smov [#allocation4]  }
   0xc   : > { %p4726_p3 = pnand %p4099_p0, %p467_p1  ;;  %s6686_s28 = sld [smem:[#allocation16_spill]] }
   0xd   : > { %s4601_s23 = smov [#allocation2]   ;;  %s4602_s24 = smov [#allocation6]  }
   0xe   : > { %p4389_p4 = pneg %p4726_p3 }
   0xf   : > { %s489_s1 = sshll.u32 %s6683_s21, 4  ;;  %s509_s21 = sshll.u32 %s6661_s4, 4  ;;  %s490_s1 = int_to_ptr.vmem [resolvable:$true] %s489_s1  ;;  %s510_s21 = int_to_ptr.vmem [resolvable:$true] %s509_s21 }
  0x10   : > { %p4390_p5 = pnand %p4402_p2, %p4389_p4 }
  0x11   : > { %s479_s3 = sshll.u32 %s6685_s25, 4  ;;  %s4603_s25 = smov [#allocation7]   ;;  %s480_s3 = int_to_ptr.vmem [resolvable:$true] %s479_s3 }
  0x12   : > { %s499_s29 = sshll.u32 %s6686_s28, 4  ;;  %572 = sbr.rel (%p4726_p3) target bundleno = 4306 (0x10d2), region = 96  ;;  %s500_s29 = int_to_ptr.vmem [resolvable:$true] %s499_s29 }
  0x13   : > { %4395 = dma.vmem_to_smem (!%p4390_p5), %s490_s1, 16, %s4600_s0, [#allocation5]  }
  0x14   : > { %4392 = dma.vmem_to_smem (!%p4390_p5), %s480_s3, 16, %s4601_s23, [#allocation3]  }
  0x15   : > { %4398 = dma.vmem_to_smem (!%p4390_p5), %s500_s29, 32, %s4602_s24, [#allocation5]  }
  0x16   : > { %4401 = dma.vmem_to_smem (!%p4390_p5), %s510_s21, 16, %s4603_s25, [#allocation8]  }
  0x17   : > { %4585 = dma.done.wait (%p4402_p2), [#allocation3], 16  }
  0x18   : > { %4587 = vsyncadd (%p4402_p2), [#allocation3], 4294967280 }
  0x19   : > { %4589 = dma.done.wait (%p4402_p2), [#allocation5], 48  }
  0x1a   : > { %4591 = vsyncadd (%p4402_p2), [#allocation5], 4294967248 }
  0x1b   : > { %4593 = dma.done.wait (%p4402_p2), [#allocation8], 16  }
  0x1c   : > { %4595 = vsyncadd (%p4402_p2), [#allocation8], 4294967280 }
  0x1d   : > { %594 = sfence }
  0x1e   : > { %p643_p6 = scmp.lt.s32.totalorder %s4721_s22, 1  ;;  %s4117_s0 = sld [smem:[#allocation2 + $0x1]]  ;;  %vm856_vm0 = vcmask 1046528   ;;  %vm1093_vm1 = vcmask 1045504   ;;  %vm1370_vm2 = vcmask 785408   ;;  %vm1485_vm11 = vcmask 523264  }
  0x1f   : > { %s4758_s1 = sld [smem:[#allocation2 + $0x2]]  ;;  %s4604_s23 = smov 127   ;;  %vm2123_vm12 = vcmask 1044480   ;;  %vm2272_vm13 = vcmask 1043456   ;;  %vm2569_vm14 = vcmask 1042432   ;;  %vm2718_vm15 = vcmask 1041408  }
  0x20   : > { %s6690_s22 = smov (!%p643_p6, %s4721_s22), 1  ;;  %s4129_s2 = sld [smem:[#allocation2 + $0x4]] }
  0x21   : > { %s4372_s3 = smul.u32 24, %s6690_s22  ;;  %s4133_s26 = sld [smem:[#allocation2 + $0x5]] }
  0x22   : > { %s4141_s27 = sld [smem:[#allocation2 + $0x7]]  ;;  %s4605_s24 = smov 126  }
  0x23   : > { %s6687_s30 = sld [smem:[#allocation13_spill]] }
  0x24   : > { %v737_v0 = vstv %s4117_s0  ;;  %s4145_s21 = sld [smem:[#allocation2 + $0x8]] }
  0x25   : > { %v793_v3 = vstv %s4758_s1  ;;  %s4799_s25 = sld [smem:[#allocation2 + $0xa]] }
  0x26   : > { %v918_v7 = vstv %s4129_s2  ;;  %s4802_s0 = sld [smem:[#allocation2 + $0xb]] }
  0x27   : > { %v1002_v10 = vstv %s4133_s26  ;;  %s4130_s1 = sld [smem:[#allocation2 + $0xd]] }
  0x28   : > { %v1155_v16 = vstv %s4141_s27  ;;  %s4134_s2 = sld [smem:[#allocation2 + $0xe]] }
  0x29   : > { %s4767_s20 = scalar_lea.vmem %s6687_s30, %s4372_s3  ;;  %s4142_s3 = sld [smem:[#allocation2 + $0x10]] }
  0x2a   : > { %v4770_v1 = vld [vmem:[%s4767_s20 + $0x8] sm:$0xff]  ;;  %v4773_v2 = vld [vmem:[%s4767_s20] sm:$0xff]  ;;  %v4787_v15 = vld [vmem:[%s4767_s20 + $0x10] sm:$0x3]  ;;  %v1239_v19 = vstv %s4145_s21  ;;  %s4146_s26 = sld [smem:[#allocation2 + $0x11]] }
  0x2b   : > { %v739_v4 = vmul.f32 %v737_v0, %v4770_v1  ;;  %v738_v5 = vmul.f32 %v737_v0, %v4773_v2  ;;  %v795_v6 = vmul.f32 %v793_v3, %v4770_v1  ;;  %v919_v8 = vmul.f32 %v918_v7, %v4773_v2  ;;  %s4841_s27 = sld [smem:[#allocation2 + $0x13]] }
  0x2c   : > { %v920_v9 = vmul.f32 %v918_v7, %v4770_v1  ;;  %v1003_v11 = vmul.f32 %v1002_v10, %v4773_v2  ;;  %v1004_v12 = vmul.f32 %v1002_v10, %v4770_v1  ;;  %v794_v20 = vmul.f32 %v793_v3, %v4773_v2  ;;  %s4844_s28 = sld [smem:[#allocation2 + $0x14]] }
  0x2d   : > { %744 = vrot.lane.b32.xlu1 %v739_v4, %s4604_s23  ;;  %742 = vrot.lane.b32.xlu0 %v738_v5, %s4604_s23  ;;  %v925_v13 = vrot.slane %v919_v8, 1  ;;  %v921_v22 = vmul.f32 %v918_v7, %v4787_v15  ;;  %v1156_v23 = vmul.f32 %v1155_v16, %v4773_v2  ;;  %v1157_v24 = vmul.f32 %v1155_v16, %v4770_v1  ;;  %s4131_s29 = sld [smem:[#allocation2 + $0x16]] }
  0x2e   : > { %800 = vrot.lane.b32.xlu2 %v795_v6, %s4605_s24  ;;  %v926_v14 = vrot.slane %v920_v9, 1  ;;  %v1009_v17 = vrot.slane %v1003_v11, 1  ;;  %v1010_v18 = vrot.slane %v1004_v12, 1  ;;  %v1240_v26 = vmul.f32 %v1239_v19, %v4773_v2  ;;  %s4135_s30 = sld [smem:[#allocation2 + $0x17]] }
  0x2f   : > { %v1241_v27 = vmul.f32 %v1239_v19, %v4770_v1  ;;  %v928_v28 = vrot.slane %v921_v22, 1  ;;  %v1162_v29 = vrot.slane %v1156_v23, 2  ;;  %v1163_v30 = vrot.slane %v1157_v24, 2  ;;  %s4868_s21 = sld [smem:[#allocation2 + $0x1c]] }
  0x30   : > { %v927_v21 = vsel %vm856_vm0, %v925_v13, %v926_v14  ;;  %v1011_v25 = vsel %vm856_vm0, %v1009_v17, %v1010_v18  ;;  %v1246_v31 = vrot.slane %v1240_v26, 2  ;;  %v1005_v33 = vmul.f32 %v1002_v10, %v4787_v15 }
  0x31   : > { %v1247_v32 = vrot.slane %v1241_v27, 2  ;;  %v929_v34 = vsel %vm856_vm0, %v926_v14, %v928_v28  ;;  %v1164_v35 = vsel %vm1093_vm1, %v1162_v29, %v1163_v30  ;;  %v751_v38 = vstv %s4799_s25  ;;  %s4143_s25 = sld [smem:[#allocation2 + $0x19]] }
  0x32   : > { %v1012_v37 = vrot.slane %v1005_v33, 1  ;;  %v807_v39 = vstv %s4802_s0  ;;  %v939_v40 = vstv %s4130_s1  ;;  %v752_v42 = vmul.f32 %v751_v38, %v4773_v2  ;;  %s4878_s0 = sld [smem:[#allocation2 + $0x1d]] }
  0x33   : > { %v1248_v36 = vsel %vm1093_vm1, %v1246_v31, %v1247_v32  ;;  %v808_v43 = vmul.f32 %v807_v39, %v4773_v2  ;;  %v940_v44 = vmul.f32 %v939_v40, %v4773_v2  ;;  %v941_v45 = vmul.f32 %v939_v40, %v4770_v1  ;;  %s4147_s1 = sld [smem:[#allocation2 + $0x1a]] }
  0x34   : > { %v1013_v41 = vsel %vm856_vm0, %v1010_v18, %v1012_v37  ;;  %v1158_v46 = vmul.f32 %v1155_v16, %v4787_v15  ;;  %v1242_v47 = vmul.f32 %v1239_v19, %v4787_v15  ;;  %v1023_v52 = vstv %s4134_s2  ;;  %s4132_s2 = sld [smem:[#allocation2 + $0x1f]] }
  0x35   : > { %930 = vrot.lane.b32.xlu1 %v927_v21, %s4604_s23  ;;  %798 = vrot.lane.b32.xlu0 %v794_v20, %s4605_s24  ;;  %v946_v48 = vrot.slane %v940_v44, 1  ;;  %v947_v49 = vrot.slane %v941_v45, 1  ;;  %v1024_v55 = vmul.f32 %v1023_v52, %v4773_v2  ;;  %v1025_v56 = vmul.f32 %v1023_v52, %v4770_v1 }
  0x36   : > { %1014 = vrot.lane.b32.xlu2 %v1011_v25, %s4605_s24  ;;  %v1165_v50 = vrot.slane %v1158_v46, 2  ;;  %v1249_v51 = vrot.slane %v1242_v47, 2  ;;  %v1176_v60 = vstv %s4142_s3  ;;  %v1260_v61 = vstv %s4146_s26  ;;  %s4136_s3 = sld [smem:[#allocation2 + $0x20]] }
  0x37   : > { %v948_v53 = vsel %vm856_vm0, %v946_v48, %v947_v49  ;;  %v1030_v58 = vrot.slane %v1024_v55, 1  ;;  %v1031_v59 = vrot.slane %v1025_v56, 1  ;;  %v753_v62 = vmul.f32 %v751_v38, %v4770_v1  ;;  %s4144_s26 = sld [smem:[#allocation2 + $0x22]] }
  0x38   : > { %v1166_v54 = vsel %vm1093_vm1, %v1163_v30, %v1165_v50  ;;  %v1250_v57 = vsel %vm1093_vm1, %v1247_v32, %v1249_v51  ;;  %v809_v63 = vmul.f32 %v807_v39, %v4770_v1  ;;  %v942_v3 = vmul.f32 %v939_v40, %v4787_v15 }
  0x39   : > { %v1032_v0 = vsel %vm856_vm0, %v1030_v58, %v1031_v59  ;;  %v1177_v4 = vmul.f32 %v1176_v60, %v4773_v2  ;;  %v1178_v5 = vmul.f32 %v1176_v60, %v4770_v1  ;;  %v1261_v6 = vmul.f32 %v1260_v61, %v4773_v2 }
  0x3a   : > { %v1262_v7 = vmul.f32 %v1260_v61, %v4770_v1  ;;  %v949_v8 = vrot.slane %v942_v3, 1  ;;  %v1026_v13 = vmul.f32 %v1023_v52, %v4787_v15  ;;  %v765_v19 = vstv %s4841_s27  ;;  %s4148_s27 = sld [smem:[#allocation2 + $0x23]] }
  0x3b   : > { %v1183_v9 = vrot.slane %v1177_v4, 2  ;;  %v1184_v10 = vrot.slane %v1178_v5, 2  ;;  %v1267_v11 = vrot.slane %v1261_v6, 2  ;;  %v821_v20 = vstv %s4844_s28  ;;  %s4139_s28 = sld [smem:[#allocation2 + $0x18]] }
  0x3c   : > { %v1268_v12 = vrot.slane %v1262_v7, 2  ;;  %v950_v14 = vsel %vm856_vm0, %v947_v49, %v949_v8  ;;  %v1033_v18 = vrot.slane %v1026_v13, 1  ;;  %v960_v21 = vstv %s4131_s29  ;;  %s5020_s29 = sld [smem:[#allocation2 + $0x3]] }
  0x3d   : > { %932 = vrot.lane.b32.xlu1 %v929_v34, %s4604_s23  ;;  %1167 = vrot.lane.b32.xlu0 %v1164_v35, %s4604_s23  ;;  %v1185_v16 = vsel %vm1093_vm1, %v1183_v9, %v1184_v10  ;;  %v766_v23 = vmul.f32 %v765_v19, %v4773_v2  ;;  %v822_v24 = vmul.f32 %v821_v20, %v4773_v2  ;;  %v1044_v33 = vstv %s4135_s30  ;;  %s5163_s30 = sld [smem:[#allocation4 + $0x3]] }
  0x3e   : > { %1251 = vrot.lane.b32.xlu2 %v1248_v36, %s4605_s24  ;;  %v1269_v17 = vsel %vm1093_vm1, %v1267_v11, %v1268_v12  ;;  %v1034_v22 = vsel %vm856_vm0, %v1031_v59, %v1033_v18  ;;  %v961_v25 = vmul.f32 %v960_v21, %v4773_v2  ;;  %v4860_v26 = vmul.f32 %v960_v21, %v4770_v1 }
  0x3f   : > { %v1179_v27 = vmul.f32 %v1176_v60, %v4787_v15  ;;  %v1263_v28 = vmul.f32 %v1260_v61, %v4787_v15  ;;  %v1045_v36 = vmul.f32 %v1044_v33, %v4773_v2  ;;  %v1046_v37 = vmul.f32 %v1044_v33, %v4770_v1 }
  0x40   : > { %v967_v29 = vrot.slane %v961_v25, 1  ;;  %v968_v30 = vrot.slane %v4860_v26, 1  ;;  %v835_v48 = vstv %s4878_s0  ;;  %v4893_v51 = vstv %s4147_s1  ;;  %v661_v25 = vld [vmem:[%s6662_s5 + $0x50] sm:$0xff]  ;;  %s4126_s0 = sld [smem:[#allocation2 + $0xc]] }
  0x41   : > { %v1186_v31 = vrot.slane %v1179_v27, 2  ;;  %v1270_v32 = vrot.slane %v1263_v28, 2  ;;  %v1051_v39 = vrot.slane %v1045_v36, 1  ;;  %v1052_v40 = vrot.slane %v1046_v37, 1  ;;  %v673_v27 = vld [vmem:[%s6663_s6 + $0x50] sm:$0xff]  ;;  %s5140_s1 = sld [smem:[#allocation2 + $0x12]] }
  0x42   : > { %v969_v34 = vsel %vm856_vm0, %v967_v29, %v968_v30  ;;  %v4895_v52 = vstv %s4132_s2  ;;  %v1282_v55 = vmul.f32 %v4893_v51, %v4773_v2  ;;  %v4905_v56 = vmul.f32 %v4893_v51, %v4770_v1  ;;  %s5147_s2 = sld [smem:[#allocation4 + $0x2]] }
  0x43   : > { %v1187_v35 = vsel %vm1093_vm1, %v1184_v10, %v1186_v31  ;;  %v1271_v38 = vsel %vm1093_vm1, %v1268_v12, %v1270_v32  ;;  %v1053_v44 = vsel %vm856_vm0, %v1051_v39, %v1052_v40  ;;  %v982_v59 = vmul.f32 %v4895_v52, %v4773_v2  ;;  %v660_v32 = vld [vmem:[%s6662_s5 + $0x48] sm:$0xff] }
  0x44   : > { %v4915_v60 = vmul.f32 %v4895_v52, %v4770_v1  ;;  %v1288_v61 = vrot.slane %v1282_v55, 2  ;;  %v4922_v4 = vstv %s4136_s3  ;;  %v1047_v7 = vmul.f32 %v1044_v33, %v4787_v15  ;;  %v672_v33 = vld [vmem:[%s6663_s6 + $0x48] sm:$0xff]  ;;  %s4127_s3 = sld [smem:[#allocation2 + $0x15]] }
  0x45   : > { %1016 = vrot.lane.b32.xlu1 %v1013_v41, %s4605_s24  ;;  %756 = vrot.lane.b32.xlu0 %v752_v42, %s4604_s23  ;;  %v779_v41 = vstv %s4868_s21  ;;  %v1197_v42 = vstv %s4143_s25  ;;  %v1066_v9 = vmul.f32 %v4922_v4, %v4773_v2  ;;  %v4936_v10 = vmul.f32 %v4922_v4, %v4770_v1  ;;  %s4987_s21 = sld [smem:[#allocation2]] }
  0x46   : > { %812 = vrot.lane.b32.xlu2 %v808_v43, %s4605_s24  ;;  %v767_v43 = vmul.f32 %v765_v19, %v4770_v1  ;;  %v780_v45 = vmul.f32 %v779_v41, %v4773_v2  ;;  %v1198_v46 = vmul.f32 %v1197_v42, %v4773_v2  ;;  %v4886_v47 = vmul.f32 %v1197_v42, %v4770_v1  ;;  %s5025_s25 = sld [smem:[#allocation4]] }
  0x47   : > { %v989_v3 = vrot.slane %v4915_v60, 1  ;;  %v1054_v11 = vrot.slane %v1047_v7, 1  ;;  %v1072_v12 = vrot.slane %v1066_v9, 1  ;;  %v1073_v13 = vrot.slane %v4936_v10, 1  ;;  %v667_v60 = vld [vmem:[%s6663_s6 + $0x20] sm:$0xff] }
  0x48   : > { %v1204_v49 = vrot.slane %v1198_v46, 2  ;;  %v1205_v50 = vrot.slane %v4886_v47, 2  ;;  %v1200_v19 = vmul.f32 %v1197_v42, %v4787_v15  ;;  %v4976_v31 = vstv %s4148_s27  ;;  %v671_v42 = vld [vmem:[%s6663_s6 + $0x40] sm:$0xff]  ;;  %v657_v47 = vld [vmem:[%s6662_s5 + $0x30] sm:$0xff]  ;;  %s5111_s27 = sld [smem:[#allocation2 + $0x9]] }
  0x49   : > { %v1055_v18 = vsel %vm856_vm0, %v1052_v40, %v1054_v11  ;;  %v984_v36 = vmul.f32 %v4895_v52, %v4787_v15  ;;  %v1284_v37 = vmul.f32 %v4893_v51, %v4787_v15  ;;  %v1303_v40 = vmul.f32 %v4976_v31, %v4773_v2  ;;  %v656_v52 = vld [vmem:[%s6662_s5 + $0x28] sm:$0xff] }
  0x4a   : > { %v1206_v58 = vsel %vm1093_vm1, %v1204_v49, %v1205_v50  ;;  %v1207_v26 = vrot.slane %v1200_v19, 2 }
  0x4b   : > { %v1291_v46 = vrot.slane %v1284_v37, 2 }
  0x4c   : > { %v705_v7 = vstv %s5025_s25  ;;  %s4138_s25 = sld [smem:[#allocation2 + $0xf]] }
  0x4d   : > { %951 = vrot.lane.b32.xlu1 %v948_v53, %s4604_s23  ;;  %1169 = vrot.lane.b32.xlu0 %v1166_v54, %s4604_s23  ;;  %v836_v53 = vmul.f32 %v835_v48, %v4773_v2  ;;  %v823_v54 = vmul.f32 %v821_v20, %v4770_v1  ;;  %v1074_v20 = vsel %vm856_vm0, %v1072_v12, %v1073_v13  ;;  %v653_v12 = vld [vmem:[%s6662_s5 + $0x10] sm:$0xff] }
  0x4e   : > { %1253 = vrot.lane.b32.xlu2 %v1250_v57, %s4605_s24  ;;  %v963_v57 = vmul.f32 %v960_v21, %v4787_v15 }
  0x55   : > { %1035 = vrot.lane.b32.xlu1 %v1032_v0, %s4605_s24  ;;  %758 = vrot.lane.b32.xlu0 %v753_v62, %s4604_s23  ;;  %v1289_v62 = vrot.slane %v4905_v56, 2  ;;  %v988_v0 = vrot.slane %v982_v59, 1  ;;  %v655_v56 = vld [vmem:[%s6662_s5 + $0x20] sm:$0xff] }
  0x56   : > { %814 = vrot.lane.b32.xlu2 %v809_v63, %s4605_s24  ;;  %v970_v63 = vrot.slane %v963_v57, 1 }
  0x57   : > { %v1290_v5 = vsel %vm1093_vm1, %v1288_v61, %v1289_v62  ;;  %v990_v8 = vsel %vm856_vm0, %v988_v0, %v989_v3  ;;  %v1292_v57 = vsel %vm1093_vm1, %v1289_v62, %v1291_v46 }
  0x58   : > { %v971_v6 = vsel %vm856_vm0, %v968_v30, %v970_v63  ;;  %v654_v63 = vld [vmem:[%s6662_s5 + $0x18] sm:$0xff] }
  0x5d   : > { %953 = vrot.lane.b32.xlu1 %v950_v14, %s4604_s23  ;;  %1188 = vrot.lane.b32.xlu0 %v1185_v16, %s4604_s23  ;;  %v4944_v16 = vstv %s4144_s26  ;;  %s5154_s26 = sld [smem:[#allocation2 + $0x1b]] }
  0x5e   : > { %1272 = vrot.lane.b32.xlu2 %v1269_v17, %s4605_s24  ;;  %v781_v17 = vmul.f32 %v779_v41, %v4770_v1  ;;  %v1219_v21 = vmul.f32 %v4944_v16, %v4773_v2  ;;  %v5006_v41 = vmul.f32 %v4976_v31, %v4770_v1  ;;  %v1221_v59 = vmul.f32 %v4944_v16, %v4787_v15 }
  0x60   : > { %v1225_v28 = vrot.slane %v1219_v21, 2  ;;  %v1310_v49 = vrot.slane %v5006_v41, 2 }
  0x65   : > { %1037 = vrot.lane.b32.xlu1 %v1034_v22, %s4605_s24  ;;  %770 = vrot.lane.b32.xlu0 %v766_v23, %s4604_s23  ;;  %v4956_v22 = vmul.f32 %v4944_v16, %v4770_v1  ;;  %v662_v23 = vld [vmem:[%s6662_s5 + $0x58] sm:$0xff] }
  0x66   : > { %826 = vrot.lane.b32.xlu2 %v822_v24, %s4605_s24  ;;  %v674_v24 = vld [vmem:[%s6663_s6 + $0x58] sm:$0xff]  ;;  %1399 = vmatpush.msra.mxu0 %v662_v23 }
  0x67   : > { %v1226_v29 = vrot.slane %v4956_v22, 2  ;;  %1440 = vmatpush.msra.mxu1 %v674_v24  ;;  %4360 = vmatpush.msra.mxu2 %v662_v23 }
  0x68   : > { %1400 = vmatpush.msra.mxu0 %v661_v25 }
  0x69   : > { %1441 = vmatpush.msra.mxu1 %v673_v27  ;;  %4361 = vmatpush.msra.mxu2 %v661_v25  ;;  %v1227_v39 = vsel %vm1093_vm1, %v1225_v28, %v1226_v29  ;;  %v664_v27 = vld [vmem:[%s6663_s6 + $0x8] sm:$0xff]  ;;  %v651_v28 = vld [vmem:[%s6662_s5] sm:$0xff] }
  0x6a   : > { %1401 = vmatpush.msra.mxu0 %v660_v32 }
  0x6b   : > { %1442 = vmatpush.msra.mxu1 %v672_v33  ;;  %4362 = vmatpush.msra.mxu2 %v660_v32 }
  0x6d   : > { %972 = vrot.lane.b32.xlu1 %v969_v34, %s4604_s23  ;;  %1190 = vrot.lane.b32.xlu0 %v1187_v35, %s4604_s23  ;;  %v837_v34 = vmul.f32 %v835_v48, %v4770_v1  ;;  %v1208_v35 = vsel %vm1093_vm1, %v1205_v50, %v1207_v26  ;;  %v1309_v48 = vrot.slane %v1303_v40, 2  ;;  %v669_v50 = vld [vmem:[%s6663_s6 + $0x30] sm:$0xff] }
  0x6e   : > { %1274 = vrot.lane.b32.xlu2 %v1271_v38, %s4605_s24  ;;  %v659_v38 = vld [vmem:[%s6662_s5 + $0x40] sm:$0xff]  ;;  %1443 = vmatpush.msra.mxu1 %v671_v42 }
  0x6f   : > { %1402 = vmatpush.msra.mxu0 %v659_v38  ;;  %4363 = vmatpush.msra.mxu2 %v659_v38  ;;  %v1311_v61 = vsel %vm1093_vm1, %v1309_v48, %v1310_v49 }
  0x75   : > { %1056 = vrot.lane.b32.xlu1 %v1053_v44, %s4605_s24  ;;  %772 = vrot.lane.b32.xlu0 %v767_v43, %s4604_s23  ;;  %v658_v43 = vld [vmem:[%s6662_s5 + $0x38] sm:$0xff] }
  0x76   : > { %784 = vrot.lane.b32.xlu2 %v780_v45, %s4604_s23  ;;  %v670_v44 = vld [vmem:[%s6663_s6 + $0x38] sm:$0xff]  ;;  %v991_v45 = vrot.slane %v984_v36, 1  ;;  %1403 = vmatpush.msra.mxu0 %v658_v43 }
  0x77   : > { %1444 = vmatpush.msra.mxu1 %v670_v44  ;;  %4364 = vmatpush.msra.mxu2 %v658_v43 }
  0x78   : > { %1404 = vmatpush.msra.mxu0 %v657_v47  ;;  %v992_v55 = vsel %vm856_vm0, %v989_v3, %v991_v45  ;;  %v849_v3 = vstv %s5020_s29  ;;  %s5115_s29 = sld [smem:[#allocation4 + $0x1]] }
  0x79   : > { %1445 = vmatpush.msra.mxu1 %v669_v50  ;;  %4365 = vmatpush.msra.mxu2 %v657_v47  ;;  %v850_v11 = vmul.f32 %v849_v3, %v4773_v2  ;;  %v851_v19 = vmul.f32 %v849_v3, %v4770_v1  ;;  %v852_v43 = vmul.f32 %v849_v3, %v4787_v15 }
  0x7a   : > { %1405 = vmatpush.msra.mxu0 %v656_v52 }
  0x7b   : > { %4366 = vmatpush.msra.mxu2 %v656_v52  ;;  %v857_v26 = vrot.slane %v850_v11, 1  ;;  %v860_v48 = vrot.slane %v852_v43, 1 }
  0x7c   : > { %1406 = vmatpush.msra.mxu0 %v655_v56 }
  0x7d   : > { %840 = vrot.lane.b32.xlu1 %v836_v53, %s4605_s24  ;;  %828 = vrot.lane.b32.xlu0 %v823_v54, %s4605_s24  ;;  %v713_v53 = vstv %s4987_s21  ;;  %v668_v54 = vld [vmem:[%s6663_s6 + $0x28] sm:$0xff]  ;;  %s5050_s21 = sld [smem:[#allocation2 + $0x6]] }
  0x7e   : > { %1209 = vrot.lane.b32.xlu2 %v1206_v58, %s4604_s23  ;;  %v1068_v58 = vmul.f32 %v4922_v4, %v4787_v15  ;;  %1446 = vmatpush.msra.mxu1 %v668_v54  ;;  %v714_v62 = vmul.f32 %v713_v53, %v4773_v2  ;;  %v1228_v4 = vrot.slane %v1221_v59, 2  ;;  %v715_v32 = vmul.f32 %v713_v53, %v4770_v1 }
  0x7f   : > { %1407 = vmatpush.msra.mxu0 %v654_v63  ;;  %4367 = vmatpush.msra.mxu2 %v655_v56 }
  0x80   : > { %v1075_v0 = vrot.slane %v1068_v58, 1  ;;  %1447 = vmatpush.msra.mxu1 %v667_v60  ;;  %v716_v21 = vadd.f32 %v714_v62, %v705_v7  ;;  %v1229_v24 = vsel %vm1093_vm1, %v1226_v29, %v1228_v4  ;;  %v717_v41 = vadd.f32 %v715_v32, %v705_v7 }
  0x81   : > { %1408 = vmatpush.msra.mxu0 %v653_v12  ;;  %4368 = vmatpush.msra.mxu2 %v654_v63  ;;  %v719_v58 = vstv %s5111_s27  ;;  %v707_v63 = vstv %s5115_s29  ;;  %s4140_s27 = sld [smem:[#allocation2 + $0x21]] }
  0x82   : > { %v1076_v23 = vsel %vm856_vm0, %v1073_v13, %v1075_v0  ;;  %v858_v13 = vrot.slane %v851_v19, 1  ;;  %v720_v60 = vmul.f32 %v719_v58, %v4773_v2  ;;  %s4190_s29 = sld [smem:[#allocation6 + $0x25]] }
  0x83   : > { %v1086_v25 = vstv %s5050_s21  ;;  %4369 = vmatpush.msra.mxu2 %v653_v12  ;;  %s4128_s21 = sld [smem:[#allocation2 + $0x1e]] }
  0x84   : > { %v1087_v22 = vmul.f32 %v1086_v25, %v4773_v2  ;;  %v1088_v29 = vmul.f32 %v1086_v25, %v4770_v1  ;;  %v1089_v59 = vmul.f32 %v1086_v25, %v4787_v15 }
  0x85   : > { %1293 = vrot.lane.b32.xlu1 %v1290_v5, %s4605_s24  ;;  %974 = vrot.lane.b32.xlu0 %v971_v6, %s4604_s23  ;;  %v666_v5 = vld [vmem:[%s6663_s6 + $0x18] sm:$0xff]  ;;  %v1305_v6 = vmul.f32 %v4976_v31, %v4787_v15  ;;  %v663_v31 = vld [vmem:[%s6663_s6] sm:$0xff] }
  0x86   : > { %993 = vrot.lane.b32.xlu2 %v990_v8, %s4604_s23  ;;  %1448 = vmatpush.msra.mxu1 %v666_v5  ;;  %v1095_v40 = vrot.slane %v1088_v29, 2  ;;  %v1097_v3 = vrot.slane %v1089_v59, 2 }
  0x88   : > { %v4942_v14 = vpop.permute.xlu2 %800  ;;  %v1098_v11 = vsel %vm1093_vm1, %v1095_v40, %v1097_v3 }
  0x8d   : > { %786 = vrot.lane.b32.xlu1 %v781_v17, %s4604_s23  ;;  %1058 = vrot.lane.b32.xlu0 %v1055_v18, %s4605_s24  ;;  %v665_v17 = vld [vmem:[%s6663_s6 + $0x10] sm:$0xff]  ;;  %v1312_v18 = vrot.slane %v1305_v6, 2  ;;  %v867_v6 = vstv %s4126_s0  ;;  %s4202_s0 = sld [smem:[#allocation6 + $0x28]] }
  0x8e   : > { %1077 = vrot.lane.b32.xlu2 %v1074_v20, %s4605_s24  ;;  %v652_v20 = vld [vmem:[%s6662_s5 + $0x8] sm:$0xff]  ;;  %1449 = vmatpush.msra.mxu1 %v665_v17  ;;  %v870_v43 = vmul.f32 %v867_v6, %v4787_v15 }
  0x8f   : > { %1409 = vmatpush.msra.mxu0 %v652_v20  ;;  %v1313_v10 = vsel %vm1093_vm1, %v1310_v49, %v1312_v18  ;;  %4370 = vmatpush.msra.mxu2 %v652_v20 }
  0x90   : > { %v4974_v30 = vpop.permute.xlu2 %1014  ;;  %1450 = vmatpush.msra.mxu1 %v664_v27 }
  0x91   : > { %1410 = vmatpush.msra.mxu0 %v651_v28  ;;  %4371 = vmatpush.msra.mxu2 %v651_v28 }
  0x92   : > { %1451 = vmatpush.msra.mxu1 %v663_v31 }
  0x95   : > { %1211 = vrot.lane.b32.xlu1 %v1208_v35, %s4604_s23  ;;  %842 = vrot.lane.b32.xlu0 %v837_v34, %s4605_s24  ;;  %v859_v35 = vsel %vm856_vm0, %v857_v26, %v858_v13  ;;  %v1104_v26 = vstv %s4138_s25  ;;  %s4192_s25 = sld [smem:[#allocation6 + $0x6d]] }
  0x96   : > { %1230 = vrot.lane.b32.xlu2 %v1227_v39, %s4604_s23  ;;  %v1094_v39 = vrot.slane %v1087_v22, 2  ;;  %v1105_v29 = vmul.f32 %v1104_v26, %v4773_v2  ;;  %v1106_v31 = vmul.f32 %v1104_v26, %v4770_v1 }
  0x98   : > { %v5031_v51 = vpop.permute.xlu2 %1251  ;;  %v1096_v45 = vsel %vm1093_vm1, %v1094_v39, %v1095_v40 }
  0x9d   : > { %995 = vrot.lane.b32.xlu1 %v992_v55, %s4604_s23  ;;  %1295 = vrot.lane.b32.xlu0 %v1292_v57, %s4605_s24  ;;  %v861_v57 = vsel %vm856_vm0, %v858_v13, %v860_v48  ;;  %v877_v48 = vrot.slane %v870_v43, 1 }
  0x9e   : > { %1314 = vrot.lane.b32.xlu2 %v1311_v61, %s4605_s24 }
  0x9f   : > { %v745_v8 = vpop.permute.xlu1 %744  ;;  %v743_v9 = vpop.permute.xlu0 %742 }
  0xa0   : > { %v5077_v16 = vpop.permute.xlu2 %812  ;;  %v748_v33 = vadd.f32 %v743_v9, %v716_v21  ;;  %v749_v46 = vadd.f32 %v745_v8, %v717_v41  ;;  %v722_v8 = vadd.f32 %v720_v60, %v707_v63  ;;  %v869_v9 = vmul.f32 %v867_v6, %v4770_v1 }
  0xa2   : > { %v805_v54 = vadd.f32 %v4942_v14, %v749_v46  ;;  %v875_v18 = vrot.slane %v869_v9, 1 }
  0xa4   : > { %v865_v61 = vadd.f32 %v861_v57, %v805_v54 }
  0xa5   : > { %1079 = vrot.lane.b32.xlu0 %v1076_v23, %s4605_s24  ;;  %1232 = vrot.lane.b32.xlu1 %v1229_v24, %s4604_s23 }
  0xa6   : > { %1316 = vrot.lane.b32.xlu2 %v1313_v10, %s4605_s24 }
  0xa7   : > { %v931_v34 = vpop.permute.xlu1 %930  ;;  %v799_v36 = vpop.permute.xlu0 %798 }
  0xa8   : > { %v804_v37 = vadd.f32 %v799_v36, %v748_v33  ;;  %v1254_v38 = vpop.permute.xlu2 %1253 }
  0xaa   : > { %v864_v42 = vadd.f32 %v859_v35, %v804_v37  ;;  %v1111_v37 = vrot.slane %v1105_v29, 2 }
  0xac   : > { %v936_v44 = vadd.f32 %v931_v34, %v864_v42  ;;  %v721_v34 = vmul.f32 %v719_v58, %v4770_v1 }
  0xae   : > { %v1020_v47 = vadd.f32 %v4974_v30, %v936_v44  ;;  %v723_v42 = vadd.f32 %v721_v34, %v707_v63  ;;  %v711_v34 = vstv %s5163_s30  ;;  %s4189_s30 = sld [smem:[#allocation6 + $0x1]] }
  0xaf   : > { %v933_v49 = vpop.permute.xlu1 %932  ;;  %v1168_v50 = vpop.permute.xlu0 %1167 }
  0xb0   : > { %v1101_v52 = vadd.f32 %v1096_v45, %v1020_v47  ;;  %v5117_v53 = vpop.permute.xlu2 %814  ;;  %v937_v4 = vadd.f32 %v933_v49, %v865_v61  ;;  %v1107_v61 = vmul.f32 %v1104_v26, %v4787_v15  ;;  %v731_v26 = vstv %s5154_s26  ;;  %s4196_s26 = sld [smem:[#allocation6 + $0x6e]] }
  0xb1   : > { %v732_v29 = vmul.f32 %v731_v26, %v4773_v2 }
  0xb2   : > { %v1173_v55 = vadd.f32 %v1168_v50, %v1101_v52  ;;  %v1114_v3 = vrot.slane %v1107_v61, 2 }
  0xb4   : > { %v1257_v30 = vadd.f32 %v5031_v51, %v1173_v55  ;;  %v868_v51 = vmul.f32 %v867_v6, %v4773_v2 }
  0xb6   : > { %v1324_v56 = vmin.f32 %v1257_v30, 0.0  ;;  %v874_v20 = vrot.slane %v868_v51, 1  ;;  %vm1322_vm3 = vcmp.gt.f32.partialorder %v1257_v30, 0.0 }
  0xb7   : > { %v1017_v62 = vpop.permute.xlu1 %1016  ;;  %v757_v0 = vpop.permute.xlu0 %756 }
  0xb8   : > { %v1273_v5 = vpop.permute.xlu2 %1272  ;;  %v1326_v14 = vmul.f32 1.442695, %v1324_v56  ;;  %v1021_v7 = vadd.f32 %v1017_v62, %v937_v4  ;;  %v762_v12 = vadd.f32 %v757_v0, %v722_v8  ;;  %v876_v13 = vsel %vm856_vm0, %v874_v20, %v875_v18 }
  0xb9   : > { %v725_v0 = vstv %s5140_s1  ;;  %v5160_v8 = vstv %s4127_s3  ;;  %s4191_s1 = sld [smem:[#allocation6 + $0x49]] }
  0xba   : > { %4430 = vpow2.f32 %v1326_v14  ;;  %v1102_v17 = vadd.f32 %v1098_v11, %v1021_v7  ;;  %v818_v28 = vadd.f32 %v5077_v16, %v762_v12  ;;  %v726_v14 = vmul.f32 %v725_v0, %v4773_v2  ;;  %s4206_s3 = sld [smem:[#allocation6 + $0x29]] }
  0xbb   : > { %v709_v7 = vstv %s5147_s2  ;;  %v5169_v12 = vmul.f32 %v5160_v8, %v4770_v1  ;;  %s4213_s2 = sld [smem:[#allocation6 + $0x7]] }
  0xbc   : > { %v881_v33 = vadd.f32 %v876_v13, %v818_v28  ;;  %v728_v11 = vadd.f32 %v726_v14, %v709_v7 }
  0xbf   : > { %v952_v19 = vpop.permute.xlu1 %951  ;;  %v1170_v21 = vpop.permute.xlu0 %1169 }
  0xc0   : > { %v4431_v23 = vpop.eup %4430  ;;  %v1174_v24 = vadd.f32 %v1170_v21, %v1102_v17  ;;  %v5129_v25 = vpop.permute.xlu2 %826  ;;  %v957_v39 = vadd.f32 %v952_v19, %v881_v33  ;;  %v885_v17 = vmul.f32 %v5160_v8, %v4773_v2  ;;  %v5182_v33 = vstv %s4128_s21  ;;  %s4193_s21 = sld [smem:[#allocation6 + $0x2]] }
  0xc1   : > { %v4149_v27 = vadd.f32 -1.0, %v4431_v23 }
  0xc2   : > { %v1258_v10 = vadd.f32 %v1254_v38, %v1174_v24  ;;  %v1112_v38 = vrot.slane %v1106_v31, 2  ;;  %v891_v13 = vrot.slane %v885_v17, 1 }
  0xc3   : > { %v1332_v22 = vsel %vm1322_vm3, %v1257_v30, %v4149_v27  ;;  %v878_v30 = vsel %vm856_vm0, %v875_v18, %v877_v48 }
  0xc4   : > { %v1325_v32 = vmin.f32 %v1258_v10, 0.0  ;;  %4157 = vmatmul.msk.f32.vlgmr.msra.gmra.mxu0 %vm1370_vm2, %v1332_v22  ;;  %4165 = vmatmul.msk.f32.vlgmr.msra.gmra.mxu1 %vm1370_vm2, %v1332_v22  ;;  %v1113_v44 = vsel %vm1093_vm1, %v1111_v37, %v1112_v38  ;;  %vm1323_vm4 = vcmp.gt.f32.partialorder %v1258_v10, 0.0  ;;  %v1115_v9 = vsel %vm1093_vm1, %v1112_v38, %v1114_v3 }
  0xc6   : > { %v1328_v35 = vmul.f32 1.442695, %v1325_v32  ;;  %v5180_v32 = vstv %s4139_s28  ;;  %s4194_s28 = sld [smem:[#allocation6 + $0x26]] }
  0xc7   : > { %v1036_v36 = vpop.permute.xlu1 %1035  ;;  %v759_v16 = vpop.permute.xlu0 %758  ;;  %v1122_v37 = vmul.f32 %v5180_v32, %v4773_v2  ;;  %v5193_v38 = vmul.f32 %v5180_v32, %v4770_v1 }
  0xc8   : > { %v1275_v40 = vpop.permute.xlu2 %1274  ;;  %4432 = vpow2.f32 %v1328_v35  ;;  %v1041_v41 = vadd.f32 %v1036_v36, %v957_v39  ;;  %v763_v46 = vadd.f32 %v759_v16, %v723_v42  ;;  %v734_v42 = vadd.f32 %v732_v29, %v711_v34 }
  0xca   : > { %v1118_v47 = vadd.f32 %v1113_v44, %v1041_v41  ;;  %v819_v58 = vadd.f32 %v5117_v53, %v763_v46  ;;  %v902_v41 = vmul.f32 %v5182_v33, %v4773_v2  ;;  %v1128_v46 = vrot.slane %v1122_v37, 2 }
  0xcc   : > { %v882_v60 = vadd.f32 %v878_v30, %v819_v58  ;;  %v908_v48 = vrot.slane %v902_v41, 1 }
  0xce   : > { %v4433_v45 = vpop.eup %4432 }
  0xcf   : > { %v954_v49 = vpop.permute.xlu1 %953  ;;  %v1189_v50 = vpop.permute.xlu0 %1188  ;;  %v4150_v52 = vadd.f32 -1.0, %v4433_v45  ;;  %v5203_v45 = vstv %s4140_s27  ;;  %s4205_s27 = sld [smem:[#allocation6 + $0x5]] }
  0xd0   : > { %v1194_v54 = vadd.f32 %v1189_v50, %v1118_v47  ;;  %v5142_v55 = vpop.permute.xlu2 %784  ;;  %v958_v4 = vadd.f32 %v954_v49, %v882_v60  ;;  %v1129_v47 = vrot.slane %v5193_v38, 2 }
  0xd1   : > { %v1333_v57 = vsel %vm1323_vm4, %v1258_v10, %v4150_v52  ;;  %v892_v10 = vrot.slane %v5169_v12, 1  ;;  %v790_v50 = vadd.f32 %v5142_v55, %v734_v42 }
  0xd2   : > { %v1278_v59 = vadd.f32 %v1273_v5, %v1194_v54  ;;  %4158 = vmatmul.msk.f32.gmra.mxu0 %vm1370_vm2, %v1333_v57  ;;  %4166 = vmatmul.msk.f32.gmra.mxu1 %vm1370_vm2, %v1333_v57  ;;  %v1139_v54 = vmul.f32 %v5203_v45, %v4773_v2  ;;  %v5212_v57 = vmul.f32 %v5203_v45, %v4770_v1 }
  0xd3   : > { %v893_v36 = vsel %vm856_vm0, %v891_v13, %v892_v10  ;;  %v1130_v30 = vsel %vm1093_vm1, %v1128_v46, %v1129_v47 }
  0xd4   : > { %v1336_v56 = vmin.f32 %v1278_v59, 0.0  ;;  %vm1334_vm5 = vcmp.gt.f32.partialorder %v1278_v59, 0.0  ;;  %v1146_v3 = vrot.slane %v5212_v57, 2 }
  0xd6   : > { %v1338_v62 = vmul.f32 1.442695, %v1336_v56 }
  0xd7   : > { %v1038_v63 = vpop.permute.xlu1 %1037  ;;  %v771_v53 = vpop.permute.xlu0 %770 }
  0xd8   : > { %v5152_v5 = vpop.permute.xlu2 %1209  ;;  %4434 = vpow2.f32 %v1338_v62  ;;  %v1042_v6 = vadd.f32 %v1038_v63, %v958_v4  ;;  %v776_v28 = vadd.f32 %v771_v53, %v728_v11  ;;  %v1145_v53 = vrot.slane %v1139_v54, 2 }
  0xda   : > { %v1119_v18 = vadd.f32 %v1115_v9, %v1042_v6  ;;  %v832_v35 = vadd.f32 %v5129_v25, %v776_v28  ;;  %v5199_v25 = vmul.f32 %v5182_v33, %v4770_v1  ;;  %v1147_v9 = vsel %vm1093_vm1, %v1145_v53, %v1146_v3 }
  0xdc   : > { %v898_v44 = vadd.f32 %v893_v36, %v832_v35  ;;  %v909_v49 = vrot.slane %v5199_v25, 1 }
  0xde   : > { %v4435_v51 = vpop.eup %4434  ;;  %v910_v61 = vsel %vm856_vm0, %v908_v48, %v909_v49 }
  0xdf   : > { %v973_v19 = vpop.permute.xlu1 %972  ;;  %v1191_v20 = vpop.permute.xlu0 %1190  ;;  %v4151_v21 = vadd.f32 -1.0, %v4435_v51  ;;  %v727_v51 = vmul.f32 %v725_v0, %v4770_v1 }
  0xe0   : > { %v1195_v23 = vadd.f32 %v1191_v20, %v1119_v18  ;;  %v994_v24 = vpop.permute.xlu2 %993  ;;  %v978_v52 = vadd.f32 %v973_v19, %v898_v44 }
  0xe1   : > { %v1344_v27 = vsel %vm1334_vm5, %v1278_v59, %v4151_v21 }
  0xe2   : > { %v1279_v22 = vadd.f32 %v1275_v40, %v1195_v23  ;;  %4159 = vmatmul.msk.f32.gmra.mxu0 %vm1370_vm2, %v1344_v27  ;;  %4167 = vmatmul.msk.f32.gmra.mxu1 %vm1370_vm2, %v1344_v27  ;;  %v887_v23 = vmul.f32 %v5160_v8, %v4787_v15  ;;  %v4518_v8 = vld [vmem:[%s4767_s20 + $0x10] sm:$0x3] }
  0xe3   : > { %v904_v54 = vmul.f32 %v4518_v8, %v5182_v33 }
  0xe4   : > { %v1337_v31 = vmin.f32 %v1279_v22, 0.0  ;;  %vm1335_vm6 = vcmp.gt.f32.partialorder %v1279_v22, 0.0 }
  0xe6   : > { %v1340_v16 = vmul.f32 1.442695, %v1337_v31  ;;  %v894_v31 = vrot.slane %v887_v23, 1 }
  0xe7   : > { %v1057_v39 = vpop.permute.xlu1 %1056  ;;  %v773_v40 = vpop.permute.xlu0 %772 }
  0xe8   : > { %v1078_v43 = vpop.permute.xlu2 %1077  ;;  %4436 = vpow2.f32 %v1340_v16  ;;  %v1062_v59 = vadd.f32 %v1057_v39, %v978_v52  ;;  %v895_v15 = vsel %vm856_vm0, %v892_v10, %v894_v31 }
  0xea   : > { %v1135_v4 = vadd.f32 %v1130_v30, %v1062_v59  ;;  %v911_v30 = vrot.slane %v904_v54, 1  ;;  %v678_v54 = vld [vmem:[%s6664_s7 + $0x18] sm:$0xff] }
  0xec   : > { %v1215_v17 = vadd.f32 %v5152_v5, %v1135_v4 }
  0xee   : > { %v4437_v58 = vpop.eup %4436 }
  0xef   : > { %v841_v55 = vpop.permute.xlu1 %840  ;;  %v829_v56 = vpop.permute.xlu0 %828  ;;  %v4152_v60 = vadd.f32 -1.0, %v4437_v58 }
  0xf0   : > { %v846_v62 = vadd.f32 %v841_v55, %v790_v50  ;;  %v1231_v2 = vpop.permute.xlu2 %1230 }
  0xf1   : > { %v1345_v63 = vsel %vm1335_vm6, %v1279_v22, %v4152_v60  ;;  %v1141_v60 = vmul.f32 %v4518_v8, %v5203_v45 }
  0xf2   : > { %v915_v6 = vadd.f32 %v910_v61, %v846_v62  ;;  %4160 = vmatmul.msk.f32.gmra.mxu0 %vm1370_vm2, %v1345_v63  ;;  %4168 = vmatmul.msk.f32.gmra.mxu1 %vm1370_vm2, %v1345_v63 }
  0xf4   : > { %v999_v14 = vadd.f32 %v994_v24, %v915_v6  ;;  %v729_v24 = vadd.f32 %v727_v51, %v709_v7  ;;  %v1124_v7 = vmul.f32 %v4518_v8, %v5180_v32 }
  0xf6   : > { %v1083_v11 = vadd.f32 %v1078_v43, %v999_v14  ;;  %v777_v1 = vadd.f32 %v773_v40, %v729_v24  ;;  %v1131_v41 = vrot.slane %v1124_v7, 2  ;;  %v4519_v43 = vld [vmem:[%s4767_s20 + $0x8] sm:$0xff]  ;;  %s4195_s20 = sld [smem:[#allocation6 + $0x4a]] }
  0xf7   : > { %v1294_v18 = vpop.permute.xlu1 %1293  ;;  %v975_v19 = vpop.permute.xlu0 %974  ;;  %v733_v44 = vmul.f32 %v4519_v43, %v731_v26 }
  0xf8   : > { %v1152_v20 = vadd.f32 %v1147_v9, %v1083_v11  ;;  %v1299_v21 = vadd.f32 %v1294_v18, %v1215_v17  ;;  %v1315_v27 = vpop.permute.xlu2 %1314  ;;  %v833_v36 = vadd.f32 %v829_v56, %v777_v1  ;;  %v1132_v10 = vsel %vm1093_vm1, %v1129_v47, %v1131_v41 }
  0xf9   : > { %v735_v58 = vadd.f32 %v733_v44, %v711_v34  ;;  %v912_v47 = vsel %vm856_vm0, %v909_v49, %v911_v30  ;;  %v1148_v34 = vrot.slane %v1141_v60, 2  ;;  %v1610_v60 = vstv %s4189_s30  ;;  %s4214_s30 = sld [smem:[#allocation6 + $0x2b]] }
  0xfa   : > { %v1236_v28 = vadd.f32 %v1231_v2, %v1152_v20  ;;  %v1348_v13 = vmin.f32 %v1299_v21, 0.0  ;;  %v899_v39 = vadd.f32 %v895_v15, %v833_v36  ;;  %vm1346_vm7 = vcmp.gt.f32.partialorder %v1299_v21, 0.0 }
  0xfb   : > { %v1149_v14 = vsel %vm1093_vm1, %v1146_v3, %v1148_v34 }
  0xfc   : > { %v1350_v22 = vmul.f32 1.442695, %v1348_v13  ;;  %v1320_v29 = vadd.f32 %v1315_v27, %v1236_v28  ;;  %v979_v42 = vadd.f32 %v975_v19, %v899_v39 }
  0xfe   : > { %4438 = vpow2.f32 %v1350_v22  ;;  %v1360_v0 = vmin.f32 %v1320_v29, 0.0  ;;  %vm1358_vm8 = vcmp.gt.f32.partialorder %v1320_v29, 0.0 }
  0xff   : > { %v787_v5 = vpop.permute.xlu1 %786  ;;  %v1059_v35 = vpop.permute.xlu0 %1058 }
 0x100   : > { %v1362_v16 = vmul.f32 1.442695, %v1360_v0  ;;  %v1063_v52 = vadd.f32 %v1059_v35, %v979_v42  ;;  %v791_v61 = vadd.f32 %v787_v5, %v735_v58  ;;  %v1317_v11 = vpop.permute.xlu2 %1316  ;;  %v683_v58 = vld [vmem:[%s6665_s8 + $0x18] sm:$0xff] }
 0x102   : > { %4440 = vpow2.f32 %v1362_v16  ;;  %v1136_v59 = vadd.f32 %v1132_v10, %v1063_v52  ;;  %v681_v52 = vld [vmem:[%s6665_s8 + $0x8] sm:$0xff]  ;;  %v677_v10 = vld [vmem:[%s6664_s7 + $0x10] sm:$0xff] }
 0x104   : > { %v4439_v37 = vpop.eup %4438 }
 0x105   : > { %v4153_v40 = vadd.f32 -1.0, %v4439_v37 }
 0x107   : > { %v1212_v46 = vpop.permute.xlu1 %1211  ;;  %v843_v48 = vpop.permute.xlu0 %842  ;;  %v1356_v50 = vsel %vm1346_vm7, %v1299_v21, %v4153_v40  ;;  %vm3337_vm7 = vcmask 261120  }
 0x108   : > { %v4441_v12 = vpop.eup %4440  ;;  %4161 = vmatmul.msk.f32.gmra.mxu0 %vm1370_vm2, %v1356_v50  ;;  %4169 = vmatmul.msk.f32.gmra.mxu1 %vm1370_vm2, %v1356_v50  ;;  %v1216_v55 = vadd.f32 %v1212_v46, %v1136_v59  ;;  %v847_v62 = vadd.f32 %v843_v48, %v791_v61  ;;  %v675_v48 = vld [vmem:[%s6664_s7] sm:$0xff] }
 0x109   : > { %v4155_v32 = vadd.f32 -1.0, %v4441_v12  ;;  %v680_v50 = vld [vmem:[%s6665_s8] sm:$0xff]  ;;  %v676_v12 = vld [vmem:[%s6664_s7 + $0x8] sm:$0xff] }
 0x10a   : > { %v916_v63 = vadd.f32 %v912_v47, %v847_v62  ;;  %v684_v59 = vld [vmem:[%s6665_s8 + $0x20] sm:$0xff] }
 0x10b   : > { %v1368_v26 = vsel %vm1358_vm8, %v1320_v29, %v4155_v32  ;;  %v682_v32 = vld [vmem:[%s6665_s8 + $0x10] sm:$0xff]  ;;  %vm3411_vm8 = vcmask 195584  }
 0x10c   : > { %4163 = vmatmul.msk.f32.vlgmr.msra.gmra.mxu2 %vm1370_vm2, %v1368_v26 }
 0x10f   : > { %v1296_v56 = vpop.permute.xlu0 %1295  ;;  %v996_v33 = vpop.permute.xlu1 %995 }
 0x110   : > { %v1300_v38 = vadd.f32 %v1296_v56, %v1216_v55  ;;  %v1000_v4 = vadd.f32 %v996_v33, %v916_v63  ;;  %v1650_v55 = vstv %s4194_s28  ;;  %v1642_v56 = vstv %s4193_s21  ;;  %s5324_s28 = sld [smem:[#allocation6 + $0x4]] }
 0x111   : > { %s5327_s21 = sld [smem:[#allocation6 + $0x4c]] }
 0x112   : > { %v1349_v2 = vmin.f32 %v1300_v38, 0.0  ;;  %vm1347_vm9 = vcmp.gt.f32.partialorder %v1300_v38, 0.0 }
 0x114   : > { %v1352_v53 = vmul.f32 1.442695, %v1349_v2  ;;  %v1770_v2 = vstv %s4205_s27  ;;  %s5339_s27 = sld [smem:[#allocation6 + $0x8]] }
 0x116   : > { %4442 = vpow2.f32 %v1352_v53  ;;  %v1658_v53 = vstv %s4195_s20  ;;  %s5343_s20 = sld [smem:[#allocation6 + $0x4d]] }
 0x117   : > { %v1080_v6 = vpop.permute.xlu0 %1079  ;;  %v1233_v45 = vpop.permute.xlu1 %1232 }
 0x118   : > { %v1084_v9 = vadd.f32 %v1080_v6, %v1000_v4  ;;  %v1618_v6 = vstv %s4190_s29  ;;  %s5350_s29 = sld [smem:[#allocation6 + $0x2c]] }
 0x11a   : > { %v1153_v51 = vadd.f32 %v1149_v14, %v1084_v9 }
 0x11c   : > { %v4443_v17 = vpop.eup %4442  ;;  %v1237_v25 = vadd.f32 %v1233_v45, %v1153_v51 }
 0x11d   : > { %v4154_v18 = vadd.f32 -1.0, %v4443_v17 }
 0x11e   : > { %v1321_v49 = vadd.f32 %v1317_v11, %v1237_v25  ;;  %v1731_v25 = vstv %s4202_s0  ;;  %s5358_s0 = sld [smem:[#allocation6 + $0x4f]] }
 0x11f   : > { %v1357_v19 = vsel %vm1347_vm9, %v1300_v38, %v4154_v18  ;;  %vm3414_vm9 = vcmask 588800  }
 0x120   : > { %v1361_v20 = vmin.f32 %v1321_v49, 0.0  ;;  %4162 = vmatmul.msk.f32.gmra.mxu0 %vm1370_vm2, %v1357_v19  ;;  %4170 = vmatmul.msk.f32.gmra.mxu1 %vm1370_vm2, %v1357_v19  ;;  %vm1359_vm10 = vcmp.gt.f32.partialorder %v1321_v49, 0.0  ;;  %v1634_v19 = vstv %s4192_s25  ;;  %s5363_s25 = sld [smem:[#allocation6 + $0x73]] }
 0x122   : > { %v1364_v21 = vmul.f32 1.442695, %v1361_v20  ;;  %v1626_v20 = vstv %s4191_s1  ;;  %s5371_s1 = sld [smem:[#allocation6 + $0x70]] }
 0x124   : > { %4444 = vpow2.f32 %v1364_v21 }
 0x128   : > { %4171 = vmatmul.msk.f32.gmra.mxu1 %vm1370_vm2, %v1368_v26  ;;  %v679_v26 = vld [vmem:[%s6664_s7 + $0x20] sm:$0xff] }
 0x12a   : > { %v4445_v57 = vpop.eup %4444 }
 0x12b   : > { %v4156_v3 = vadd.f32 -1.0, %v4445_v57 }
 0x12d   : > { %v1369_v23 = vsel %vm1359_vm10, %v1321_v49, %v4156_v3 }
 0x12e   : > { %4164 = vmatmul.msk.f32.gmra.mxu2 %vm1370_vm2, %v1369_v23 }
 0x130   : > { %4172 = vmatmul.msk.f32.gmra.mxu1 %vm1370_vm2, %v1369_v23 }
 0x141   : > { %v1453_v27 = vpop.f32.mrf.mxu1  ;;  %v1412_v13 = vpop.f32.mrf.mxu0 }
 0x142   : > { %v1477_v46 = vmax.f32 %v1412_v13, %v1453_v27  ;;  %v1866_v27 = vstv %s4213_s2  ;;  %v1783_v13 = vstv %s4206_s3  ;;  %s5379_s2 = sld [smem:[#allocation6 + $0x50]] }
 0x143   : > { %s5384_s3 = sld [smem:[#allocation6 + $0x74]] }
 0x14f   : > { %v1456_v24 = vpop.f32.mrf.mxu1  ;;  %v1415_v29 = vpop.f32.mrf.mxu0 }
 0x150   : > { %v1478_v44 = vmax.f32 %v1415_v29, %v1456_v24 }
 0x15f   : > { %v1459_v28 = vpop.f32.mrf.mxu1  ;;  %v1418_v1 = vpop.f32.mrf.mxu0 }
 0x160   : > { %v1479_v43 = vmax.f32 %v1418_v1, %v1459_v28  ;;  %v1666_v1 = vstv %s4196_s26  ;;  %s5392_s26 = sld [smem:[#allocation6 + $0x71]] }
 0x16f   : > { %v1462_v22 = vpop.f32.mrf.mxu1  ;;  %v1421_v5 = vpop.f32.mrf.mxu0 }
 0x170   : > { %v1480_v42 = vmax.f32 %v1421_v5, %v1462_v22 }
 0x185   : > { %v1465_v31 = vpop.f32.mrf.mxu1  ;;  %v1424_v16 = vpop.f32.mrf.mxu0 }
 0x186   : > { %v1481_v40 = vmax.f32 %v1424_v16, %v1465_v31 }
 0x18f   : > { %v1430_v36 = vpop.f32.mrf.mxu2 }
 0x19d   : > { %v1468_v0 = vpop.f32.mrf.mxu1  ;;  %v1427_v37 = vpop.f32.mrf.mxu0 }
 0x19e   : > { %v1482_v41 = vmax.f32 %v1427_v37, %v1468_v0 }
 0x1a5   : > { %v1471_v35 = vpop.f32.mrf.mxu1 }
 0x1a6   : > { %v1483_v39 = vmax.f32 %v1430_v36, %v1471_v35 }
 0x1ad   : > { %v1474_v15 = vpop.f32.mrf.mxu1 }
 0x1b1   : > { %v1433_v8 = vpop.f32.mrf.mxu2 }
 0x1b2   : > { %v1484_v7 = vmax.f32 %v1433_v8, %v1474_v15  ;;  %v1718_v15 = vstv %s5324_s28  ;;  %v1744_v8 = vstv %s5327_s21  ;;  %s5400_s28 = sld [smem:[#allocation6 + $0xb]] }
 0x1b3   : > { %s5405_s21 = sld [smem:[#allocation6 + $0xa]] }
 0x1b4   : > { %1509 = vmatpush.msrb.mxu2 %v1484_v7  ;;  %1556 = vmatpush.msra.mxu3 %v1484_v7 }
 0x1b6   : > { %1510 = vmatpush.msrb.mxu2 %v1483_v39  ;;  %1557 = vmatpush.msra.mxu3 %v1483_v39 }
 0x1b8   : > { %1511 = vmatpush.msrb.mxu2 %v1482_v41  ;;  %1558 = vmatpush.msra.mxu3 %v1482_v41 }
 0x1ba   : > { %1512 = vmatpush.msrb.mxu2 %v1481_v40  ;;  %1559 = vmatpush.msra.mxu3 %v1481_v40 }
 0x1bc   : > { %1513 = vmatpush.msrb.mxu2 %v1480_v42  ;;  %1560 = vmatpush.msra.mxu3 %v1480_v42  ;;  %v1879_v42 = vstv %s4214_s30  ;;  %s5413_s30 = sld [smem:[#allocation6 + $0xd]] }
 0x1be   : > { %1514 = vmatpush.msrb.mxu2 %v1479_v43  ;;  %1561 = vmatpush.msra.mxu3 %v1479_v43 }
 0x1c0   : > { %1515 = vmatpush.msrb.mxu2 %v1478_v44  ;;  %1562 = vmatpush.msra.mxu3 %v1478_v44 }
 0x1c2   : > { %1516 = vmatpush.msrb.mxu2 %v1477_v46  ;;  %1563 = vmatpush.msra.mxu3 %v1477_v46 }
 0x1c3   : > { %4173 = vmatmul.msk.f32.vlgmr.msrb.gmra.mxu2 %vm1485_vm11, %v675_v48  ;;  %4178 = vmatmul.msk.f32.vlgmr.msra.gmra.mxu3 %vm1485_vm11, %v680_v50 }
 0x1cb   : > { %4174 = vmatmul.msk.f32.gmra.mxu2 %vm1485_vm11, %v676_v12  ;;  %4179 = vmatmul.msk.f32.gmra.mxu3 %vm1485_vm11, %v681_v52 }
 0x1d3   : > { %4175 = vmatmul.msk.f32.gmra.mxu2 %vm1485_vm11, %v677_v10  ;;  %4180 = vmatmul.msk.f32.gmra.mxu3 %vm1485_vm11, %v682_v32 }
 0x1db   : > { %4176 = vmatmul.msk.f32.gmra.mxu2 %vm1485_vm11, %v678_v54  ;;  %4181 = vmatmul.msk.f32.gmra.mxu3 %vm1485_vm11, %v683_v58  ;;  %v1918_v54 = vstv %s5339_s27  ;;  %s5423_s27 = sld [smem:[#allocation6 + $0x31]] }
 0x1e3   : > { %4177 = vmatmul.msk.f32.gmra.mxu2 %vm1485_vm11, %v679_v26  ;;  %4182 = vmatmul.msk.f32.gmra.mxu3 %vm1485_vm11, %v684_v59  ;;  %v1796_v26 = vstv %s5343_s20  ;;  %s5428_s20 = sld [smem:[#allocation6 + $0x2e]] }
 0x246   : > { %v1518_v30 = vpop.f32.mrf.mxu2  ;;  %v1565_v61 = vpop.f32.mrf.mxu3 }
 0x247   : > { %v5303_v62 = vmax.f32 %v1518_v30, %v1565_v61 }
 0x249   : > { %v1651_v38 = vmul.f32 %v1650_v55, %v5303_v62  ;;  %v1643_v47 = vmul.f32 %v1642_v56, %v5303_v62  ;;  %v1611_v33 = vmul.f32 %v1610_v60, %v5303_v62  ;;  %v1771_v14 = vmul.f32 %v1770_v2, %v5303_v62 }
 0x24a   : > { %v1659_v9 = vmul.f32 %v1658_v53, %v5303_v62  ;;  %v1619_v51 = vmul.f32 %v1618_v6, %v5303_v62  ;;  %v1732_v21 = vmul.f32 %v1731_v25, %v5303_v62  ;;  %v1635_v57 = vmul.f32 %v1634_v19, %v5303_v62 }
 0x24b   : > { %1653 = vrot.lane.b32.xlu2 %v1651_v38, %s4605_s24  ;;  %1645 = vrot.lane.b32.xlu1 %v1643_v47, %s4605_s24  ;;  %v1775_v11 = vrot.slane %v1771_v14, 1  ;;  %v1627_v23 = vmul.f32 %v1626_v20, %v5303_v62  ;;  %v1867_v29 = vmul.f32 %v1866_v27, %v5303_v62  ;;  %v1784_v5 = vmul.f32 %v1783_v13, %v5303_v62 }
 0x24c   : > { %1613 = vrot.lane.b32.xlu0 %v1611_v33, %s4604_s23  ;;  %v1736_v24 = vrot.slane %v1732_v21, 1  ;;  %v1667_v35 = vmul.f32 %v1666_v1, %v5303_v62  ;;  %v1719_v40 = vmul.f32 %v1718_v15, %v5303_v62  ;;  %v1745_v44 = vmul.f32 %v1744_v8, %v5303_v62 }
 0x24d   : > { %v1871_v36 = vrot.slane %v1867_v29, 2  ;;  %v1788_v39 = vrot.slane %v1784_v5, 1  ;;  %v1880_v12 = vmul.f32 %v1879_v42, %v5303_v62  ;;  %v1919_v56 = vmul.f32 %v1918_v54, %v5303_v62 }
 0x24e   : > { %v1521_v34 = vpop.f32.mrf.mxu2  ;;  %v1568_v63 = vpop.f32.mrf.mxu3  ;;  %v1723_v52 = vrot.slane %v1719_v40, 1  ;;  %v1749_v10 = vrot.slane %v1745_v44, 1  ;;  %v1931_v60 = vstv %s5350_s29  ;;  %v1797_v47 = vmul.f32 %v1796_v26, %v5303_v62  ;;  %s5436_s29 = sld [smem:[#allocation6 + $0xe]] }
 0x24f   : > { %v5311_v4 = vmax.f32 %v1521_v34, %v1568_v63  ;;  %v1884_v61 = vrot.slane %v1880_v12, 2  ;;  %v1932_v63 = vmul.f32 %v1931_v60, %v5303_v62  ;;  %v1923_v53 = vrot.slane %v1919_v56, 2 }
 0x250   : > { %v1801_v6 = vrot.slane %v1797_v47, 1  ;;  %v1757_v19 = vstv %s5371_s1  ;;  %s5457_s1 = sld [smem:[#allocation6 + $0x52]] }
 0x251   : > { %v1772_v45 = vmul.f32 %v1770_v2, %v5311_v4  ;;  %v1733_v49 = vmul.f32 %v1731_v25, %v5311_v4  ;;  %v1868_v28 = vmul.f32 %v1866_v27, %v5311_v4  ;;  %v1785_v31 = vmul.f32 %v1783_v13, %v5311_v4 }
 0x252   : > { %v1720_v7 = vmul.f32 %v1718_v15, %v5311_v4  ;;  %v1746_v41 = vmul.f32 %v1744_v8, %v5311_v4  ;;  %v1881_v46 = vmul.f32 %v1879_v42, %v5311_v4  ;;  %v1920_v59 = vmul.f32 %v1918_v54, %v5311_v4 }
 0x253   : > { %1661 = vrot.lane.b32.xlu2 %v1659_v9, %s4605_s24  ;;  %v1776_v17 = vrot.slane %v1772_v45, 1  ;;  %v1737_v3 = vrot.slane %v1733_v49, 1  ;;  %v1872_v0 = vrot.slane %v1868_v28, 2  ;;  %v1789_v16 = vrot.slane %v1785_v31, 1 }
 0x254   : > { %1621 = vrot.lane.b32.xlu0 %v1619_v51, %s4604_s23  ;;  %v1724_v48 = vrot.slane %v1720_v7, 1  ;;  %v1750_v50 = vrot.slane %v1746_v41, 1  ;;  %v1885_v32 = vrot.slane %v1881_v46, 2  ;;  %v1798_v55 = vmul.f32 %v1796_v26, %v5311_v4 }
 0x255   : > { %v1777_v18 = vsel %vm856_vm0, %v1775_v11, %v1776_v17  ;;  %v1738_v22 = vsel %vm856_vm0, %v1736_v24, %v1737_v3  ;;  %v1873_v37 = vsel %vm1093_vm1, %v1871_v36, %v1872_v0  ;;  %v1790_v43 = vsel %vm856_vm0, %v1788_v39, %v1789_v16 }
 0x256   : > { %1778 = vrot.lane.b32.xlu1 %v1777_v18, %s4605_s24  ;;  %v1725_v58 = vsel %vm856_vm0, %v1723_v52, %v1724_v48  ;;  %v1751_v30 = vsel %vm856_vm0, %v1749_v10, %v1750_v50  ;;  %v1886_v38 = vsel %vm1093_vm1, %v1884_v61, %v1885_v32  ;;  %v1933_v33 = vmul.f32 %v1931_v60, %v5311_v4  ;;  %v1571_v0 = vpop.f32.mrf.mxu3  ;;  %v1524_v5 = vpop.f32.mrf.mxu2 }
 0x257   : > { %v1924_v2 = vrot.slane %v1920_v59, 2  ;;  %v1802_v34 = vrot.slane %v1798_v55, 1  ;;  %v1892_v9 = vstv %s5358_s0  ;;  %v1905_v51 = vstv %s5363_s25  ;;  %s5444_s0 = sld [smem:[#allocation6 + $0x32]] }
 0x258   : > { %v1937_v14 = vrot.slane %v1933_v33, 2  ;;  %v1894_v11 = vmul.f32 %v1892_v9, %v5311_v4  ;;  %v1936_v25 = vrot.slane %v1932_v63, 2  ;;  %v1907_v18 = vmul.f32 %v1905_v51, %v5311_v4  ;;  %s5449_s25 = sld [smem:[#allocation6 + $0x2f]] }
 0x259   : > { %v1925_v45 = vsel %vm1093_vm1, %v1923_v53, %v1924_v2  ;;  %v1803_v17 = vsel %vm856_vm0, %v1801_v6, %v1802_v34  ;;  %v1893_v49 = vmul.f32 %v1892_v9, %v5303_v62  ;;  %v1906_v21 = vmul.f32 %v1905_v51, %v5303_v62 }
 0x25a   : > { %v1938_v20 = vsel %vm1093_vm1, %v1936_v25, %v1937_v14  ;;  %v1898_v3 = vrot.slane %v1894_v11, 2  ;;  %v1758_v27 = vmul.f32 %v1757_v19, %v5303_v62  ;;  %v1957_v31 = vstv %s5384_s3  ;;  %s5470_s3 = sld [smem:[#allocation6 + $0x10]] }
 0x25b   : > { %1637 = vrot.lane.b32.xlu2 %v1635_v57, %s4604_s23  ;;  %v1759_v57 = vmul.f32 %v1757_v19, %v5311_v4  ;;  %v1897_v24 = vrot.slane %v1893_v49, 2  ;;  %v1910_v28 = vrot.slane %v1906_v21, 2  ;;  %v1959_v16 = vmul.f32 %v1957_v31, %v5311_v4 }
 0x25c   : > { %1629 = vrot.lane.b32.xlu0 %v1627_v23, %s4604_s23  ;;  %v1911_v23 = vrot.slane %v1907_v18, 2  ;;  %v1762_v36 = vrot.slane %v1758_v27, 1  ;;  %v1809_v8 = vstv %s5392_s26  ;;  %v5418_v41 = vmax.f32 %v1524_v5, %v1571_v0  ;;  %s5478_s26 = sld [smem:[#allocation6 + $0x53]] }
 0x25d   : > { %v1763_v13 = vrot.slane %v1759_v57, 1  ;;  %v1899_v29 = vsel %vm1093_vm1, %v1897_v24, %v1898_v3  ;;  %v1811_v39 = vmul.f32 %v1809_v8, %v5311_v4  ;;  %v1963_v42 = vrot.slane %v1959_v16, 2 }
 0x25e   : > { %1739 = vrot.lane.b32.xlu1 %v1738_v22, %s4604_s23  ;;  %v1944_v22 = vstv %s5379_s2  ;;  %v2066_v50 = vstv %s5400_s28  ;;  %v2014_v10 = vstv %s5405_s21  ;;  %s5465_s2 = sld [smem:[#allocation6 + $0x76]] }
 0x25f   : > { %v1946_v1 = vmul.f32 %v1944_v22, %v5311_v4  ;;  %v1945_v15 = vmul.f32 %v1944_v22, %v5303_v62  ;;  %v1764_v7 = vsel %vm856_vm0, %v1762_v36, %v1763_v13  ;;  %v1815_v48 = vrot.slane %v1811_v39, 1  ;;  %s5486_s28 = sld [smem:[#allocation6 + $0x77]] }
 0x260   : > { %v2068_v52 = vmul.f32 %v2066_v50, %v5418_v41  ;;  %v2067_v26 = vmul.f32 %v2066_v50, %v5311_v4  ;;  %v2163_v59 = vstv %s5413_s30  ;;  %v2015_v61 = vmul.f32 %v2014_v10, %v5311_v4  ;;  %s5491_s21 = sld [smem:[#allocation6 + $0x11]] }
 0x261   : > { %v1950_v40 = vrot.slane %v1946_v1, 2  ;;  %v1949_v44 = vrot.slane %v1945_v15, 2  ;;  %v2165_v55 = vmul.f32 %v2163_v59, %v5418_v41  ;;  %v2176_v34 = vstv %s5423_s27  ;;  %s5499_s30 = sld [smem:[#allocation6 + $0x34]] }
 0x262   : > { %v2072_v56 = vrot.slane %v2068_v52, 2  ;;  %v2071_v47 = vrot.slane %v2067_v26, 2  ;;  %v2019_v33 = vrot.slane %v2015_v61, 2  ;;  %v2178_v53 = vmul.f32 %v2176_v34, %v5418_v41  ;;  %s5507_s27 = sld [smem:[#allocation6 + $0x58]] }
 0x263   : > { %1669 = vrot.lane.b32.xlu2 %v1667_v35, %s4605_s24  ;;  %v1912_v35 = vsel %vm1093_vm1, %v1910_v28, %v1911_v23  ;;  %v1951_v12 = vsel %vm1093_vm1, %v1949_v44, %v1950_v40  ;;  %v2169_v2 = vrot.slane %v2165_v55, 3  ;;  %v2027_v6 = vstv %s5428_s20  ;;  %s5512_s20 = sld [smem:[#allocation6 + $0x55]] }
 0x264   : > { %1874 = vrot.lane.b32.xlu0 %v1873_v37, %s4604_s23  ;;  %v1958_v37 = vmul.f32 %v1957_v31, %v5303_v62  ;;  %v2073_v63 = vsel %vm1093_vm1, %v2071_v47, %v2072_v56  ;;  %v2177_v51 = vmul.f32 %v2176_v34, %v5311_v4  ;;  %v2215_v11 = vstv %s5436_s29  ;;  %s5520_s29 = sld [smem:[#allocation6 + $0x35]] }
 0x265   : > { %v2028_v25 = vmul.f32 %v2027_v6, %v5311_v4  ;;  %v2217_v18 = vmul.f32 %v2215_v11, %v5418_v41  ;;  %v2182_v49 = vrot.slane %v2178_v53, 3  ;;  %v2228_v23 = vstv %s5444_s0  ;;  %s5528_s0 = sld [smem:[#allocation6 + $0x59]] }
 0x266   : > { %1791 = vrot.lane.b32.xlu1 %v1790_v43, %s4605_s24  ;;  %v1810_v43 = vmul.f32 %v1809_v8, %v5303_v62  ;;  %v1962_v46 = vrot.slane %v1958_v37, 2  ;;  %v2181_v21 = vrot.slane %v2177_v51, 3  ;;  %v2230_v24 = vmul.f32 %v2228_v23, %v5418_v41 }
 0x267   : > { %v2032_v57 = vrot.slane %v2028_v25, 2  ;;  %v2221_v3 = vrot.slane %v2217_v18, 3  ;;  %v2079_v28 = vstv %s5449_s25  ;;  %v2229_v31 = vmul.f32 %v2228_v23, %v5311_v4  ;;  %s5531_s25 = sld [smem:[#allocation6 + $0x56]] }
 0x268   : > { %v1964_v32 = vsel %vm1093_vm1, %v1962_v46, %v1963_v42  ;;  %v1814_v54 = vrot.slane %v1810_v43, 1  ;;  %v2183_v27 = vsel %vm2123_vm12, %v2181_v21, %v2182_v49  ;;  %v2040_v1 = vstv %s5457_s1  ;;  %s5533_s1 = sld [smem:[#allocation6 + $0x6c]] }
 0x269   : > { %v2080_v5 = vmul.f32 %v2079_v28, %v5311_v4  ;;  %v2234_v36 = vrot.slane %v2230_v24, 3  ;;  %v2041_v15 = vmul.f32 %v2040_v1, %v5311_v4  ;;  %v2233_v8 = vrot.slane %v2229_v31, 3 }
 0x26a   : > { %v2053_v39 = vstv %s5465_s2  ;;  %v2312_v43 = vstv %s5470_s3  ;;  %v2105_v55 = vstv %s5486_s28  ;;  %v2338_v49 = vstv %s5507_s27  ;;  %s5542_s2 = sld [smem:[#allocation6]] }
 0x26b   : > { %1726 = vrot.lane.b32.xlu2 %v1725_v58, %s4604_s23  ;;  %v2016_v58 = vmul.f32 %v2014_v10, %v5418_v41  ;;  %v2235_v40 = vsel %vm2123_vm12, %v2233_v8, %v2234_v36  ;;  %v2055_v42 = vmul.f32 %v2053_v39, %v5418_v41  ;;  %v2045_v46 = vrot.slane %v2041_v15, 2  ;;  %s5547_s3 = sld [smem:[#allocation6 + $0x79]] }
 0x26c   : > { %1752 = vrot.lane.b32.xlu0 %v1751_v30, %s4604_s23  ;;  %v1816_v30 = vsel %vm856_vm0, %v1814_v54, %v1815_v48  ;;  %v2314_v48 = vmul.f32 %v2312_v43, %v5418_v41  ;;  %v2054_v50 = vmul.f32 %v2053_v39, %v5311_v4  ;;  %v2313_v10 = vmul.f32 %v2312_v43, %v5311_v4  ;;  %s5557_s28 = sld [smem:[#allocation6 + $0x7c]]  ;;  %v1574_v43 = vpop.f32.mrf.mxu3 }
 0x26d   : > { %v2020_v60 = vrot.slane %v2016_v58, 2  ;;  %v2059_v54 = vrot.slane %v2055_v42, 2  ;;  %v2106_v34 = vmul.f32 %v2105_v55, %v5311_v4  ;;  %v2189_v21 = vstv %s5512_s20  ;;  %s5569_s27 = sld [smem:[#allocation6 + $0x24]] }
 0x26e   : > { %1887 = vrot.lane.b32.xlu1 %v1886_v38, %s4604_s23  ;;  %v2164_v38 = vmul.f32 %v2163_v59, %v5311_v4  ;;  %v2318_v58 = vrot.slane %v2314_v48, 4  ;;  %v2058_v59 = vrot.slane %v2054_v50, 2  ;;  %v2191_v23 = vmul.f32 %v2189_v21, %v5418_v41  ;;  %s5574_s20 = sld [smem:[#allocation6 + $0x3]] }
 0x26f   : > { %v2021_v14 = vsel %vm1093_vm1, %v2019_v33, %v2020_v60  ;;  %v2107_v60 = vmul.f32 %v2105_v55, %v5418_v41  ;;  %v2377_v24 = vstv %s5520_s29  ;;  %s5578_s29 = sld [smem:[#allocation7 + $0x1]] }
 0x270   : > { %v2168_v9 = vrot.slane %v2164_v38, 3  ;;  %v2060_v56 = vsel %vm1093_vm1, %v2058_v59, %v2059_v54  ;;  %v2364_v38 = vstv %s5491_s21  ;;  %s5562_s21 = sld [smem:[#allocation6 + $0x13]] }
 0x273   : > { %1926 = vrot.lane.b32.xlu2 %v1925_v45, %s4605_s24  ;;  %v2029_v45 = vmul.f32 %v2027_v6, %v5418_v41 }
 0x274   : > { %1804 = vrot.lane.b32.xlu0 %v1803_v17, %s4605_s24  ;;  %v2170_v17 = vsel %vm2123_vm12, %v2168_v9, %v2169_v2  ;;  %v2366_v2 = vmul.f32 %v2364_v38, %v5418_v41 }
 0x275   : > { %v2033_v19 = vrot.slane %v2029_v45, 2  ;;  %v2111_v45 = vrot.slane %v2107_v60, 2 }
 0x276   : > { %1939 = vrot.lane.b32.xlu1 %v1938_v20, %s4605_s24  ;;  %v2216_v20 = vmul.f32 %v2215_v11, %v5311_v4  ;;  %v2370_v51 = vrot.slane %v2366_v2, 4 }
 0x277   : > { %v2034_v13 = vsel %vm1093_vm1, %v2032_v57, %v2033_v19 }
 0x278   : > { %v2220_v22 = vrot.slane %v2216_v20, 3  ;;  %v2340_v20 = vmul.f32 %v2338_v49, %v5418_v41 }
 0x27a   : > { %v2222_v0 = vsel %vm2123_vm12, %v2220_v22, %v2221_v3  ;;  %v2190_v22 = vmul.f32 %v2189_v21, %v5311_v4  ;;  %v2344_v31 = vrot.slane %v2340_v20, 4  ;;  %v1598_v21 = vstv %s5569_s27  ;;  %s5639_s27 = sld [smem:[#allocation6 + $0x6]] }
 0x27b   : > { %1900 = vrot.lane.b32.xlu2 %v1899_v29, %s4604_s23  ;;  %v2081_v29 = vmul.f32 %v2079_v28, %v5418_v41 }
 0x27c   : > { %1913 = vrot.lane.b32.xlu0 %v1912_v35, %s4604_s23  ;;  %v2042_v35 = vmul.f32 %v2040_v1, %v5418_v41  ;;  %v2195_v1 = vrot.slane %v2191_v23, 3  ;;  %v2194_v15 = vrot.slane %v2190_v22, 3 }
 0x27d   : > { %v2085_v16 = vrot.slane %v2081_v29, 2  ;;  %v2379_v29 = vmul.f32 %v2377_v24, %v5418_v41 }
 0x27e   : > { %1765 = vrot.lane.b32.xlu1 %v1764_v7, %s4604_s23  ;;  %v2084_v7 = vrot.slane %v2080_v5, 2  ;;  %v2046_v37 = vrot.slane %v2042_v35, 2  ;;  %v2390_v5 = vstv %s5528_s0  ;;  %v2241_v35 = vstv %s5531_s25  ;;  %s5584_s0 = sld [smem:[#allocation6 + $0x7a]] }
 0x27f   : > { %v2383_v8 = vrot.slane %v2379_v29, 4  ;;  %v2242_v42 = vmul.f32 %v2241_v35, %v5311_v4  ;;  %s5588_s25 = sld [smem:[#allocation6 + $0x14]] }
 0x280   : > { %v2086_v44 = vsel %vm1093_vm1, %v2084_v7, %v2085_v16  ;;  %v2047_v52 = vsel %vm1093_vm1, %v2045_v46, %v2046_v37  ;;  %v1606_v16 = vstv %s5533_s1  ;;  %v2392_v7 = vmul.f32 %v2390_v5, %v5418_v41  ;;  %s5598_s1 = sld [smem:[#allocation6 + $0x7d]] }
 0x281   : > { %v2243_v37 = vmul.f32 %v2241_v35, %v5418_v41  ;;  %v2196_v46 = vsel %vm2123_vm12, %v2194_v15, %v2195_v1  ;;  %v1607_v50 = vmul.f32 %v1606_v16, %v5303_v62  ;;  %v2246_v55 = vrot.slane %v2242_v42, 3 }
 0x282   : > { %v2396_v54 = vrot.slane %v2392_v7, 4  ;;  %v1599_v7 = vmul.f32 %v1598_v21, %v5303_v62 }
 0x283   : > { %1952 = vrot.lane.b32.xlu2 %v1951_v12, %s4605_s24  ;;  %v2092_v12 = vstv %s5478_s26  ;;  %s5553_s26 = sld [smem:[#allocation7 + $0x3]] }
 0x284   : > { %1965 = vrot.lane.b32.xlu0 %v1964_v32, %s4605_s24  ;;  %v2094_v32 = vmul.f32 %v2092_v12, %v5418_v41  ;;  %v2093_v26 = vmul.f32 %v2092_v12, %v5311_v4  ;;  %v1594_v12 = vstv %s5542_s2  ;;  %s5604_s2 = sld [smem:[#allocation6 + $0x16]] }
 0x286   : > { %1817 = vrot.lane.b32.xlu1 %v1816_v30, %s4605_s24  ;;  %v2317_v30 = vrot.slane %v2313_v10, 4  ;;  %v2098_v61 = vrot.slane %v2094_v32, 2  ;;  %v2097_v33 = vrot.slane %v2093_v26, 2  ;;  %v2403_v16 = vstv %s5598_s1  ;;  %s5672_s1 = sld [smem:[#allocation6 + $0x5b]] }
 0x288   : > { %v2319_v47 = vsel %vm2272_vm13, %v2317_v30, %v2318_v58  ;;  %v2099_v6 = vsel %vm1093_vm1, %v2097_v33, %v2098_v61  ;;  %v2247_v58 = vrot.slane %v2243_v37, 3 }
 0x289   : > { %v1592_v30 = vstv %s5553_s26  ;;  %s5615_s26 = sld [smem:[#allocation6 + $0x48]] }
 0x28b   : > { %2074 = vrot.lane.b32.xlu2 %v2073_v63, %s4605_s24  ;;  %v2325_v63 = vstv %s5499_s30  ;;  %s5565_s30 = sld [smem:[#allocation7]] }
 0x28c   : > { %2022 = vrot.lane.b32.xlu0 %v2021_v14, %s4604_s23  ;;  %v2365_v14 = vmul.f32 %v2364_v38, %v5311_v4  ;;  %v2327_v9 = vmul.f32 %v2325_v63, %v5418_v41  ;;  %v2326_v11 = vmul.f32 %v2325_v63, %v5311_v4  ;;  %v2351_v38 = vstv %s5557_s28  ;;  %s5624_s28 = sld [smem:[#allocation7 + $0x2]] }
 0x28d   : > { %v2353_v2 = vmul.f32 %v2351_v38, %v5418_v41 }
 0x28e   : > { %2171 = vrot.lane.b32.xlu1 %v2170_v17, %s4604_s23  ;;  %v2110_v17 = vrot.slane %v2106_v34, 2  ;;  %v2369_v25 = vrot.slane %v2365_v14, 4  ;;  %v2331_v18 = vrot.slane %v2327_v9, 4  ;;  %v2330_v3 = vrot.slane %v2326_v11, 4 }
 0x28f   : > { %v1608_v34 = vadd.f32 %v1607_v50, %v1592_v30  ;;  %v2352_v9 = vmul.f32 %v2351_v38, %v5311_v4  ;;  %v1674_v11 = vstv %s5574_s20  ;;  %v2357_v20 = vrot.slane %v2353_v2, 4  ;;  %s5642_s20 = sld [smem:[#allocation6 + $0x17]] }
 0x290   : > { %v2112_v19 = vsel %vm1093_vm1, %v2110_v17, %v2111_v45  ;;  %v2371_v57 = vsel %vm2272_vm13, %v2369_v25, %v2370_v51  ;;  %v2405_v50 = vmul.f32 %v2403_v16, %v5418_v41 }
 0x291   : > { %v1586_v33 = vstv %s5565_s30  ;;  %s5633_s30 = sld [smem:[#allocation6 + $0x3a]] }
 0x292   : > { %v1590_v38 = vstv %s5624_s28  ;;  %s5704_s28 = sld [smem:[#allocation6 + $0x5c]] }
 0x293   : > { %2184 = vrot.lane.b32.xlu2 %v2183_v27, %s4604_s23  ;;  %v2339_v27 = vmul.f32 %v2338_v49, %v5311_v4  ;;  %v1676_v49 = vmul.f32 %v1674_v11, %v5311_v4 }
 0x294   : > { %2035 = vrot.lane.b32.xlu0 %v2034_v13, %s4604_s23  ;;  %v2332_v13 = vsel %vm2272_vm13, %v2330_v3, %v2331_v18  ;;  %v1588_v18 = vstv %s5578_s29  ;;  %s5654_s29 = sld [smem:[#allocation6 + $0x4b]] }
 0x295   : > { %v2343_v36 = vrot.slane %v2339_v27, 4  ;;  %v1675_v27 = vmul.f32 %v1674_v11, %v5303_v62  ;;  %v1680_v35 = vrot.slane %v1676_v49, 1  ;;  %v1822_v49 = vstv %s5639_s27  ;;  %s5727_s27 = sld [smem:[#allocation6 + $0x1a]] }
 0x296   : > { %2223 = vrot.lane.b32.xlu1 %v2222_v0, %s4605_s24  ;;  %v2378_v0 = vmul.f32 %v2377_v24, %v5311_v4 }
 0x297   : > { %v2345_v39 = vsel %vm2272_vm13, %v2343_v36, %v2344_v31  ;;  %v2356_v31 = vrot.slane %v2352_v9, 4  ;;  %v1679_v42 = vrot.slane %v1675_v27, 1 }
 0x298   : > { %v2382_v48 = vrot.slane %v2378_v0, 4 }
 0x29a   : > { %v2384_v32 = vsel %vm2272_vm13, %v2382_v48, %v2383_v8  ;;  %v2358_v8 = vsel %vm2272_vm13, %v2356_v31, %v2357_v20  ;;  %v2404_v48 = vmul.f32 %v2403_v16, %v5311_v4  ;;  %v1824_v31 = vmul.f32 %v1822_v49, %v5311_v4 }
 0x29b   : > { %2236 = vrot.lane.b32.xlu2 %v2235_v40, %s4605_s24  ;;  %v2391_v40 = vmul.f32 %v2390_v5, %v5311_v4 }
 0x29c   : > { %2087 = vrot.lane.b32.xlu0 %v2086_v44, %s4605_s24  ;;  %v1527_v44 = vpop.f32.mrf.mxu2 }
 0x29d   : > { %v5590_v59 = vmax.f32 %v1527_v44, %v1574_v43  ;;  %v2395_v61 = vrot.slane %v2391_v40, 4  ;;  %v2609_v44 = vstv %s5604_s2  ;;  %s5680_s2 = sld [smem:[#allocation6 + $0x2a]] }
 0x29e   : > { %2048 = vrot.lane.b32.xlu1 %v2047_v52, %s4604_s23  ;;  %v2202_v52 = vstv %s5547_s3  ;;  %s5610_s3 = sld [smem:[#allocation6 + $0x27]] }
 0x29f   : > { %v2204_v26 = vmul.f32 %v2202_v52, %v5418_v41  ;;  %v2203_v60 = vmul.f32 %v2202_v52, %v5311_v4  ;;  %v2397_v63 = vsel %vm2272_vm13, %v2395_v61, %v2396_v54  ;;  %v1681_v52 = vsel %vm856_vm0, %v1679_v42, %v1680_v35 }
 0x2a0   : > { %v2610_v61 = vmul.f32 %v2609_v44, %v5418_v41 }
 0x2a1   : > { %v2208_v14 = vrot.slane %v2204_v26, 3  ;;  %v2207_v25 = vrot.slane %v2203_v60, 3 }
 0x2a3   : > { %2061 = vrot.lane.b32.xlu2 %v2060_v56, %s4604_s23  ;;  %v1595_v56 = vmul.f32 %v1594_v12, %v5303_v62  ;;  %v2209_v23 = vsel %vm2123_vm12, %v2207_v25, %v2208_v14  ;;  %v2614_v25 = vrot.slane %v2610_v61, 5 }
 0x2a4   : > { %2320 = vrot.lane.b32.xlu0 %v2319_v47, %s4604_s23  ;;  %v2460_v47 = vstv %s5562_s21  ;;  %s5629_s21 = sld [smem:[#allocation6 + $0x37]]  ;;  %v1685_v12 = vstv %s5610_s3 }
 0x2a5   : > { %v5522_v53 = vpop.permute.xlu2 %1653  ;;  %v2461_v45 = vmul.f32 %v2460_v47, %v5418_v41  ;;  %v2462_v51 = vmul.f32 %v2460_v47, %v5590_v59  ;;  %v1596_v17 = vadd.f32 %v1595_v56, %v1586_v33  ;;  %v1687_v54 = vmul.f32 %v1685_v12, %v5311_v4  ;;  %s5692_s3 = sld [smem:[#allocation6 + $0x19]] }
 0x2a6   : > { %2100 = vrot.lane.b32.xlu1 %v2099_v6, %s4605_s24  ;;  %v2248_v6 = vsel %vm2123_vm12, %v2246_v55, %v2247_v58  ;;  %v1600_v55 = vadd.f32 %v1599_v7, %v1588_v18  ;;  %v2611_v47 = vmul.f32 %v2609_v44, %v5590_v59  ;;  %v1686_v9 = vmul.f32 %v1685_v12, %v5303_v62 }
 0x2a7   : > { %v2465_v1 = vrot.slane %v2461_v45, 4  ;;  %v2466_v0 = vrot.slane %v2462_v51, 4  ;;  %v2622_v51 = vstv %s5633_s30  ;;  %v1691_v18 = vrot.slane %v1687_v54, 1  ;;  %s5724_s30 = sld [smem:[#allocation6 + $0x80]] }
 0x2a8   : > { %v2615_v21 = vrot.slane %v2611_v47, 5  ;;  %v2624_v27 = vmul.f32 %v2622_v51, %v5590_v59  ;;  %v1833_v47 = vstv %s5680_s2  ;;  %s5767_s2 = sld [smem:[#allocation6 + $0x3e]] }
 0x2aa   : > { %v2473_v45 = vstv %s5629_s21  ;;  %v2616_v35 = vsel %vm2569_vm14, %v2614_v25, %v2615_v21  ;;  %s5716_s21 = sld [smem:[#allocation6 + $0x4e]] }
 0x2ab   : > { %2113 = vrot.lane.b32.xlu2 %v2112_v19, %s4605_s24 }
 0x2ac   : > { %2372 = vrot.lane.b32.xlu0 %v2371_v57, %s4605_s24  ;;  %v2254_v57 = vstv %s5584_s0  ;;  %s5659_s0 = sld [smem:[#allocation6 + $0x3b]] }
 0x2ad   : > { %v5549_v28 = vpop.permute.xlu2 %1661  ;;  %v2256_v24 = vmul.f32 %v2254_v57, %v5418_v41  ;;  %v2255_v36 = vmul.f32 %v2254_v57, %v5311_v4  ;;  %v2661_v57 = vstv %s5642_s20  ;;  %s5736_s20 = sld [smem:[#allocation6 + $0x3d]] }
 0x2ae   : > { %2333 = vrot.lane.b32.xlu1 %v2332_v13, %s4604_s23  ;;  %v2512_v13 = vstv %s5588_s25  ;;  %s5666_s25 = sld [smem:[#allocation6 + $0x38]] }
 0x2af   : > { %v2513_v37 = vmul.f32 %v2512_v13, %v5418_v41  ;;  %v2260_v43 = vrot.slane %v2256_v24, 3 }
 0x2b1   : > { %v2517_v26 = vrot.slane %v2513_v37, 4 }
 0x2b2   : > { %v2674_v16 = vstv %s5659_s0  ;;  %s5753_s0 = sld [smem:[#allocation6 + $0x72]] }
 0x2b3   : > { %2346 = vrot.lane.b32.xlu2 %v2345_v39, %s4604_s23  ;;  %v2514_v39 = vmul.f32 %v2512_v13, %v5590_v59 }
 0x2b4   : > { %2197 = vrot.lane.b32.xlu0 %v2196_v46, %s4604_s23  ;;  %v2467_v46 = vsel %vm2272_vm13, %v2465_v1, %v2466_v0  ;;  %v2662_v1 = vmul.f32 %v2661_v57, %v5418_v41  ;;  %v2663_v0 = vmul.f32 %v2661_v57, %v5590_v59 }
 0x2b5   : > { %v1638_v10 = vpop.permute.xlu2 %1637  ;;  %v2518_v30 = vrot.slane %v2514_v39, 4 }
 0x2b6   : > { %2385 = vrot.lane.b32.xlu1 %v2384_v32, %s4605_s24  ;;  %v1640_v19 = vadd.f32 %v1638_v10, %v1608_v34  ;;  %v2259_v10 = vrot.slane %v2255_v36, 3  ;;  %v1602_v32 = vstv %s5615_s26  ;;  %v2408_v34 = vrot.slane %v2404_v48, 4  ;;  %s5695_s26 = sld [smem:[#allocation6 + $0x7f]] }
 0x2b7   : > { %v1823_v36 = vmul.f32 %v1822_v49, %v5303_v62  ;;  %v2666_v12 = vrot.slane %v2662_v1, 5 }
 0x2b8   : > { %v2261_v60 = vsel %vm2123_vm12, %v2259_v10, %v2260_v43  ;;  %v2675_v10 = vmul.f32 %v2674_v16, %v5418_v41 }
 0x2b9   : > { %v1827_v61 = vrot.slane %v1823_v36, 2 }
 0x2bb   : > { %2398 = vrot.lane.b32.xlu2 %v2397_v63, %s4605_s24  ;;  %v2409_v63 = vrot.slane %v2405_v50, 4  ;;  %v1828_v50 = vrot.slane %v1824_v31, 2 }
 0x2bc   : > { %2249 = vrot.lane.b32.xlu0 %v2248_v6, %s4605_s24  ;;  %v1603_v6 = vmul.f32 %v1602_v32, %v5303_v62  ;;  %v2499_v21 = vstv %s5695_s26  ;;  %s5785_s26 = sld [smem:[#allocation6 + $0x9]] }
 0x2bd   : > { %v1670_v3 = vpop.permute.xlu2 %1669  ;;  %v1646_v15 = vpop.permute.xlu1 %1645  ;;  %v2410_v24 = vsel %vm2272_vm13, %v2408_v34, %v2409_v63  ;;  %v1835_v63 = vmul.f32 %v1833_v47, %v5311_v4  ;;  %v2500_v1 = vmul.f32 %v2499_v21, %v5418_v41 }
 0x2be   : > { %v5626_v22 = vadd.f32 %v1670_v3, %v1640_v19  ;;  %v1614_v29 = vpop.permute.xlu0 %1613  ;;  %2210 = vrot.lane.b32.xlu1 %v2209_v23, %s4604_s23  ;;  %v2474_v3 = vmul.f32 %v2473_v45, %v5418_v41  ;;  %v2623_v23 = vmul.f32 %v2622_v51, %v5418_v41  ;;  %v1604_v13 = vadd.f32 %v1603_v6, %v1590_v38 }
 0x2bf   : > { %v1616_v5 = vadd.f32 %v1614_v29, %v1596_v17  ;;  %v2519_v17 = vsel %vm2272_vm13, %v2517_v26, %v2518_v30  ;;  %v1690_v29 = vrot.slane %v1686_v9, 1  ;;  %v2486_v26 = vstv %s5672_s1  ;;  %s5760_s1 = sld [smem:[#allocation6 + $0x5e]] }
 0x2c0   : > { %v2478_v37 = vrot.slane %v2474_v3, 4  ;;  %v2627_v39 = vrot.slane %v2623_v23, 5  ;;  %v2487_v34 = vmul.f32 %v2486_v26, %v5418_v41  ;;  %v2679_v9 = vrot.slane %v2675_v10, 5 }
 0x2c1   : > { %v1648_v40 = vadd.f32 %v1646_v15, %v1616_v5  ;;  %v1696_v15 = vstv %s5654_s29  ;;  %v1692_v7 = vsel %vm856_vm0, %v1690_v29, %v1691_v18  ;;  %v2488_v51 = vmul.f32 %v2486_v26, %v5590_v59  ;;  %s5741_s29 = sld [smem:[#allocation6 + $0x6f]] }
 0x2c2   : > { %v2491_v3 = vrot.slane %v2487_v34, 4  ;;  %v1834_v23 = vmul.f32 %v1833_v47, %v5303_v62  ;;  %v2810_v26 = vstv %s5727_s27  ;;  %v2771_v47 = vstv %s5736_s20  ;;  %s5817_s27 = sld [smem:[#allocation6 + $0xc]] }
 0x2c3   : > { %2468 = vrot.lane.b32.xlu2 %v2467_v46, %s4604_s23  ;;  %v1683_v58 = vadd.f32 %v1681_v52, %v1648_v40  ;;  %v2628_v40 = vrot.slane %v2624_v27, 5  ;;  %v2525_v46 = vstv %s5666_s25  ;;  %v2667_v52 = vrot.slane %v2663_v0, 5  ;;  %s5756_s25 = sld [smem:[#allocation6 + $0x61]] }
 0x2c4   : > { %2359 = vrot.lane.b32.xlu0 %v2358_v8, %s4604_s23  ;;  %v2527_v38 = vmul.f32 %v2525_v46, %v5590_v59  ;;  %v1839_v27 = vrot.slane %v1835_v63, 2  ;;  %v2492_v29 = vrot.slane %v2488_v51, 4  ;;  %v2501_v0 = vmul.f32 %v2499_v21, %v5590_v59  ;;  %s5824_s20 = sld [smem:[#allocation6 + $0x2d]] }
 0x2c5   : > { %v1727_v56 = vpop.permute.xlu2 %1726  ;;  %v2629_v30 = vsel %vm2569_vm14, %v2627_v39, %v2628_v40  ;;  %v2812_v34 = vmul.f32 %v2810_v26, %v5590_v59 }
 0x2c6   : > { %v1622_v33 = vpop.permute.xlu0 %1621  ;;  %v1729_v2 = vadd.f32 %v1727_v56, %v1683_v58  ;;  %2262 = vrot.lane.b32.xlu1 %v2261_v60, %s4605_s24  ;;  %v2676_v58 = vmul.f32 %v2674_v16, %v5590_v59  ;;  %v1697_v56 = vmul.f32 %v1696_v15, %v5303_v62  ;;  %v2531_v49 = vrot.slane %v2527_v38, 4 }
 0x2c7   : > { %v1624_v14 = vadd.f32 %v1622_v33, %v1600_v55  ;;  %v2526_v55 = vmul.f32 %v2525_v46, %v5418_v41  ;;  %v1829_v33 = vsel %vm1093_vm1, %v1827_v61, %v1828_v50  ;;  %v2493_v39 = vsel %vm2272_vm13, %v2491_v3, %v2492_v29 }
 0x2c8   : > { %v1779_v11 = vpop.permute.xlu1 %1778  ;;  %v1701_v25 = vrot.slane %v1697_v56, 1  ;;  %v2505_v50 = vrot.slane %v2501_v0, 4  ;;  %v1707_v63 = vstv %s5741_s29  ;;  %v2816_v3 = vrot.slane %v2812_v34, 6  ;;  %s5828_s29 = sld [smem:[#allocation6 + $0x86]] }
 0x2c9   : > { %v1656_v19 = vadd.f32 %v5522_v53, %v1624_v14  ;;  %v1781_v20 = vadd.f32 %v1779_v11, %v1729_v2  ;;  %v2475_v53 = vmul.f32 %v2473_v45, %v5590_v59  ;;  %v2668_v2 = vsel %vm2569_vm14, %v2666_v12, %v2667_v52 }
 0x2ca   : > { %v2680_v45 = vrot.slane %v2676_v58, 5  ;;  %v1708_v21 = vmul.f32 %v1707_v63, %v5303_v62  ;;  %v2635_v29 = vstv %s5760_s1  ;;  %s5864_s1 = sld [smem:[#allocation6 + $0x30]] }
 0x2cb   : > { %2520 = vrot.lane.b32.xlu2 %v2519_v17, %s4605_s24  ;;  %v1694_v43 = vadd.f32 %v1692_v7, %v1656_v19  ;;  %v2479_v44 = vrot.slane %v2475_v53, 4  ;;  %v1831_v6 = vadd.f32 %v1829_v33, %v1781_v20  ;;  %v2530_v17 = vrot.slane %v2526_v55, 4 }
 0x2cc   : > { %2411 = vrot.lane.b32.xlu0 %v2410_v24, %s4605_s24  ;;  %v2758_v19 = vstv %s5692_s3  ;;  %v2681_v53 = vsel %vm2569_vm14, %v2679_v9, %v2680_v45  ;;  %v1709_v9 = vmul.f32 %v1707_v63, %v5311_v4  ;;  %s5776_s3 = sld [smem:[#allocation6 + $0x75]] }
 0x2cd   : > { %v1927_v5 = vpop.permute.xlu2 %1926  ;;  %v2480_v60 = vsel %vm2272_vm13, %v2478_v37, %v2479_v44  ;;  %v2759_v31 = vmul.f32 %v2758_v19, %v5418_v41  ;;  %v2532_v36 = vsel %vm2272_vm13, %v2530_v17, %v2531_v49  ;;  %v2773_v17 = vmul.f32 %v2771_v47, %v5590_v59 }
 0x2ce   : > { %v1630_v8 = vpop.permute.xlu0 %1629  ;;  %2617 = vrot.lane.b32.xlu1 %v2616_v35, %s4604_s23  ;;  %v2538_v35 = vstv %s5704_s28  ;;  %s5788_s28 = sld [smem:[#allocation6 + $0x62]] }
 0x2cf   : > { %v1632_v42 = vadd.f32 %v1630_v8, %v1604_v13  ;;  %v1844_v8 = vstv %s5716_s21  ;;  %v2539_v40 = vmul.f32 %v2538_v35, %v5418_v41  ;;  %v2763_v46 = vrot.slane %v2759_v31, 6  ;;  %s5793_s21 = sld [smem:[#allocation6 + $0x5f]] }
 0x2d0   : > { %v1740_v48 = vpop.permute.xlu1 %1739  ;;  %v1846_v58 = vmul.f32 %v1844_v8, %v5311_v4  ;;  %v1845_v61 = vmul.f32 %v1844_v8, %v5303_v62  ;;  %v1855_v31 = vstv %s5753_s0  ;;  %v2823_v8 = vstv %s5767_s2  ;;  %s5833_s0 = sld [smem:[#allocation6 + $0x85]] }
 0x2d1   : > { %v1664_v32 = vadd.f32 %v5549_v28, %v1632_v42  ;;  %v1742_v54 = vadd.f32 %v1740_v48, %v1694_v43  ;;  %v1698_v28 = vmul.f32 %v1696_v15, %v5311_v4  ;;  %v1838_v15 = vrot.slane %v1834_v23, 2  ;;  %s5867_s2 = sld [smem:[#allocation6 + $0x51]] }
 0x2d2   : > { %v2540_v42 = vmul.f32 %v2538_v35, %v5590_v59  ;;  %v2504_v48 = vrot.slane %v2500_v1, 4  ;;  %v2543_v55 = vrot.slane %v2539_v40, 4  ;;  %v2784_v23 = vstv %s5756_s25  ;;  %s5836_s25 = sld [smem:[#allocation6 + $0x83]] }
 0x2d3   : > { %2630 = vrot.lane.b32.xlu2 %v2629_v30, %s4604_s23  ;;  %v1702_v20 = vrot.slane %v1698_v28, 1  ;;  %v1840_v44 = vsel %vm1093_vm1, %v1838_v15, %v1839_v27  ;;  %v2786_v15 = vmul.f32 %v2784_v23, %v5590_v59  ;;  %v2636_v40 = vmul.f32 %v2635_v29, %v5418_v41 }
 0x2d4   : > { %2481 = vrot.lane.b32.xlu0 %v2480_v60, %s4604_s23  ;;  %v2544_v56 = vrot.slane %v2540_v42, 4  ;;  %v2506_v60 = vsel %vm2272_vm13, %v2504_v48, %v2505_v50  ;;  %v2637_v42 = vmul.f32 %v2635_v29, %v5590_v59  ;;  %v2824_v50 = vmul.f32 %v2823_v8, %v5418_v41 }
 0x2d5   : > { %v5718_v14 = vpop.permute.xlu2 %1900  ;;  %v1703_v16 = vsel %vm856_vm0, %v1701_v25, %v1702_v20  ;;  %v1849_v25 = vrot.slane %v1845_v61, 2  ;;  %v2640_v61 = vrot.slane %v2636_v40, 5 }
 0x2d6   : > { %v1875_v11 = vpop.permute.xlu0 %1874  ;;  %2669 = vrot.lane.b32.xlu1 %v2668_v2, %s4605_s24  ;;  %v1705_v7 = vadd.f32 %v1703_v16, %v1664_v32  ;;  %v2551_v32 = vstv %s5724_s30  ;;  %v2811_v2 = vmul.f32 %v2810_v26, %v5418_v41  ;;  %v2545_v51 = vsel %vm2272_vm13, %v2543_v55, %v2544_v56  ;;  %s5801_s30 = sld [smem:[#allocation6 + $0x82]] }
 0x2d7   : > { %v1877_v18 = vadd.f32 %v1875_v11, %v1831_v6  ;;  %v2552_v38 = vmul.f32 %v2551_v32, %v5418_v41  ;;  %v2553_v28 = vmul.f32 %v2551_v32, %v5590_v59  ;;  %v1850_v6 = vrot.slane %v1846_v58, 2 }
 0x2d8   : > { %v1792_v57 = vpop.permute.xlu1 %1791  ;;  %v2772_v11 = vmul.f32 %v2771_v47, %v5418_v41  ;;  %v2815_v20 = vrot.slane %v2811_v2, 6  ;;  %v2785_v16 = vmul.f32 %v2784_v23, %v5418_v41  ;;  %v2790_v58 = vrot.slane %v2786_v15, 6 }
 0x2d9   : > { %v5729_v24 = vadd.f32 %v1927_v5, %v1877_v18  ;;  %v1794_v13 = vadd.f32 %v1792_v57, %v1742_v54  ;;  %v2760_v5 = vmul.f32 %v2758_v19, %v5590_v59  ;;  %v2556_v49 = vrot.slane %v2552_v38, 4 }
 0x2da   : > { %v2557_v19 = vrot.slane %v2553_v28, 4  ;;  %v1851_v27 = vsel %vm1093_vm1, %v1849_v25, %v1850_v6  ;;  %v2776_v35 = vrot.slane %v2772_v11, 6  ;;  %v1970_v26 = vstv %s5785_s26  ;;  %s5884_s26 = sld [smem:[#allocation6 + $0x47]] }
 0x2db   : > { %2682 = vrot.lane.b32.xlu2 %v2681_v53, %s4605_s24  ;;  %v1842_v52 = vadd.f32 %v1840_v44, %v1794_v13  ;;  %v2764_v10 = vrot.slane %v2760_v5, 6  ;;  %v1713_v53 = vrot.slane %v1709_v9, 1  ;;  %v1857_v44 = vmul.f32 %v1855_v31, %v5311_v4 }
 0x2dc   : > { %2533 = vrot.lane.b32.xlu0 %v2532_v36, %s4605_s24  ;;  %v2777_v36 = vrot.slane %v2773_v17, 6  ;;  %v2558_v5 = vsel %vm2272_vm13, %v2556_v49, %v2557_v19  ;;  %v2641_v55 = vrot.slane %v2637_v42, 5  ;;  %v2836_v56 = vstv %s5788_s28  ;;  %s5890_s28 = sld [smem:[#allocation6 + $0x22]] }
 0x2dd   : > { %v5746_v37 = vpop.permute.xlu2 %1952  ;;  %v2765_v33 = vsel %vm2718_vm15, %v2763_v46, %v2764_v10  ;;  %v2003_v46 = vstv %s5776_s3  ;;  %v2687_v38 = vstv %s5793_s21  ;;  %v2828_v2 = vrot.slane %v2824_v50, 6  ;;  %s5873_s3 = sld [smem:[#allocation6 + $0x1f]] }
 0x2de   : > { %v1753_v43 = vpop.permute.xlu0 %1752  ;;  %2494 = vrot.lane.b32.xlu1 %v2493_v39, %s4604_s23  ;;  %v2817_v39 = vsel %vm2718_vm15, %v2815_v20, %v2816_v3  ;;  %v2004_v28 = vmul.f32 %v2003_v46, %v5311_v4  ;;  %v2005_v47 = vmul.f32 %v2003_v46, %v5418_v41  ;;  %v2837_v6 = vmul.f32 %v2836_v56, %v5418_v41  ;;  %s5893_s21 = sld [smem:[#allocation6 + $0x1c]] }
 0x2df   : > { %v1755_v12 = vadd.f32 %v1753_v43, %v1705_v7  ;;  %v1712_v43 = vrot.slane %v1708_v21, 1  ;;  %v2838_v9 = vmul.f32 %v2836_v56, %v5590_v59  ;;  %v2642_v11 = vsel %vm2569_vm14, %v2640_v61, %v2641_v55 }
 0x2e0   : > { %v1888_v54 = vpop.permute.xlu1 %1887  ;;  %v2688_v17 = vmul.f32 %v2687_v38, %v5418_v41  ;;  %v2689_v25 = vmul.f32 %v2687_v38, %v5590_v59  ;;  %v2008_v19 = vrot.slane %v2004_v28, 2  ;;  %v2009_v21 = vrot.slane %v2005_v47, 2 }
 0x2e1   : > { %v1890_v30 = vadd.f32 %v1888_v54, %v1842_v52  ;;  %v1856_v52 = vmul.f32 %v1855_v31, %v5303_v62  ;;  %v1714_v32 = vsel %vm856_vm0, %v1712_v43, %v1713_v53  ;;  %v2789_v54 = vrot.slane %v2785_v16, 6 }
 0x2e2   : > { %v2841_v29 = vrot.slane %v2837_v6, 6  ;;  %v2842_v31 = vrot.slane %v2838_v9, 6  ;;  %v2849_v16 = vstv %s5828_s29  ;;  %v2797_v40 = vstv %s5833_s0  ;;  %s5924_s29 = sld [smem:[#allocation6 + $0x1d]] }
 0x2e3   : > { %2507 = vrot.lane.b32.xlu2 %v2506_v60, %s4604_s23  ;;  %v1861_v60 = vrot.slane %v1857_v44, 2  ;;  %v2791_v63 = vsel %vm2718_vm15, %v2789_v54, %v2790_v58  ;;  %v1860_v49 = vrot.slane %v1856_v52, 2  ;;  %v2700_v46 = vstv %s5836_s25  ;;  %s5928_s0 = sld [smem:[#allocation6 + $0x23]] }
 0x2e4   : > { %2766 = vrot.lane.b32.xlu0 %v2765_v33, %s4604_s23  ;;  %v2850_v50 = vmul.f32 %v2849_v16, %v5418_v41  ;;  %v2798_v58 = vmul.f32 %v2797_v40, %v5418_v41  ;;  %v2701_v55 = vmul.f32 %v2700_v46, %v5418_v41  ;;  %v2702_v56 = vmul.f32 %v2700_v46, %v5590_v59  ;;  %s5934_s25 = sld [smem:[#allocation6 + $0x64]] }
 0x2e5   : > { %v5778_v45 = vpop.permute.xlu2 %2074  ;;  %v1862_v53 = vsel %vm1093_vm1, %v1860_v49, %v1861_v60  ;;  %vm3015_vm0 = vcmask 1040384  }
 0x2e6   : > { %v1805_v18 = vpop.permute.xlu0 %1804  ;;  %2546 = vrot.lane.b32.xlu1 %v2545_v51, %s4605_s24  ;;  %v2648_v51 = vstv %s5801_s30  ;;  %v2705_v49 = vrot.slane %v2701_v55, 5  ;;  %s5896_s30 = sld [smem:[#allocation6 + $0xf]] }
 0x2e7   : > { %v1807_v57 = vadd.f32 %v1805_v18, %v1755_v12  ;;  %v2825_v12 = vmul.f32 %v2823_v8, %v5590_v59  ;;  %v2649_v23 = vmul.f32 %v2648_v51, %v5418_v41 }
 0x2e8   : > { %v1940_v13 = vpop.permute.xlu1 %1939 }
 0x2e9   : > { %v1853_v1 = vadd.f32 %v1851_v27, %v1807_v57  ;;  %v5795_v0 = vadd.f32 %v1940_v13, %v1890_v30  ;;  %v1716_v30 = vadd.f32 %v1714_v32, %v5626_v22  ;;  %v2829_v34 = vrot.slane %v2825_v12, 6 }
 0x2ea   : > { %v1971_v22 = vmul.f32 %v1970_v26, %v5311_v4  ;;  %v1972_v57 = vmul.f32 %v1970_v26, %v5418_v41  ;;  %v2650_v27 = vmul.f32 %v2648_v51, %v5590_v59  ;;  %v2653_v43 = vrot.slane %v2649_v23, 5 }
 0x2eb   : > { %v1903_v7 = vadd.f32 %v5718_v14, %v1853_v1  ;;  %2559 = vrot.lane.b32.xlu2 %v2558_v5, %s4605_s24  ;;  %v2778_v14 = vsel %vm2718_vm15, %v2776_v35, %v2777_v36  ;;  %v2830_v3 = vsel %vm2718_vm15, %v2828_v2, %v2829_v34  ;;  %v1981_v1 = vstv %s5824_s20  ;;  %v1577_v2 = vpop.f32.mrf.mxu3  ;;  %s5918_s20 = sld [smem:[#allocation6 + $0x33]] }
 0x2ec   : > { %2818 = vrot.lane.b32.xlu0 %v2817_v39, %s4605_s24  ;;  %v2692_v35 = vrot.slane %v2688_v17, 5  ;;  %v2693_v36 = vrot.slane %v2689_v25, 5  ;;  %v1975_v5 = vrot.slane %v1971_v22, 2  ;;  %v1976_v8 = vrot.slane %v1972_v57, 2 }
 0x2ed   : > { %v5811_v48 = vpop.permute.xlu2 %2184  ;;  %v5847_v18 = vadd.f32 %v5746_v37, %v1903_v7  ;;  %v2118_v37 = vstv %s5817_s27  ;;  %v2654_v44 = vrot.slane %v2650_v27, 5  ;;  %v2851_v12 = vmul.f32 %v2849_v16, %v5590_v59  ;;  %s5905_s27 = sld [smem:[#allocation6 + $0x20]] }
 0x2ee   : > { %v5819_v10 = vpop.permute.xlu0 %1913  ;;  %2779 = vrot.lane.b32.xlu1 %v2778_v14, %s4604_s23  ;;  %v2119_v7 = vmul.f32 %v2118_v37, %v5311_v4  ;;  %v2120_v39 = vmul.f32 %v2118_v37, %v5418_v41  ;;  %v2843_v14 = vsel %vm2718_vm15, %v2841_v29, %v2842_v31  ;;  %v1983_v52 = vmul.f32 %v1981_v1, %v5418_v41 }
 0x2ef   : > { %v2694_v54 = vsel %vm2569_vm14, %v2692_v35, %v2693_v36  ;;  %v2799_v26 = vmul.f32 %v2797_v40, %v5590_v59  ;;  %v1977_v61 = vsel %vm1093_vm1, %v1975_v5, %v1976_v8  ;;  %v2655_v47 = vsel %vm2569_vm14, %v2653_v43, %v2654_v44 }
 0x2f0   : > { %v1766_v62 = vpop.permute.xlu1 %1765  ;;  %v1979_v28 = vadd.f32 %v1977_v61, %v5729_v24  ;;  %v2125_v22 = vrot.slane %v2120_v39, 3  ;;  %v2855_v6 = vrot.slane %v2851_v12, 6  ;;  %v1987_v9 = vrot.slane %v1983_v52, 2 }
 0x2f1   : > { %v1768_v33 = vadd.f32 %v1766_v62, %v1716_v30  ;;  %v2010_v30 = vsel %vm1093_vm1, %v2008_v19, %v2009_v21  ;;  %v1530_v62 = vpop.f32.mrf.mxu2  ;;  %v2803_v24 = vrot.slane %v2799_v26, 6  ;;  %v2124_v17 = vrot.slane %v2119_v7, 3 }
 0x2f2   : > { %v2706_v19 = vrot.slane %v2702_v56, 5  ;;  %v2130_v21 = vstv %s5864_s1  ;;  %v5898_v57 = vmax.f32 %v1530_v62, %v1577_v2  ;;  %v1992_v29 = vstv %s5867_s2  ;;  %s5941_s1 = sld [smem:[#allocation6 + $0x54]] }
 0x2f3   : > { %2792 = vrot.lane.b32.xlu2 %v2791_v63, %s4604_s23  ;;  %v2854_v63 = vrot.slane %v2850_v50, 6  ;;  %v2126_v37 = vsel %vm2123_vm12, %v2124_v17, %v2125_v22  ;;  %v3215_v16 = vstv %s5884_s26  ;;  %v3175_v39 = vstv %s5890_s28  ;;  %s5945_s2 = sld [smem:[#allocation6 + $0x12]] }
 0x2f4   : > { %2643 = vrot.lane.b32.xlu0 %v2642_v11, %s4604_s23  ;;  %v2802_v11 = vrot.slane %v2798_v58, 6  ;;  %v2707_v5 = vsel %vm2569_vm14, %v2705_v49, %v2706_v19  ;;  %v2132_v50 = vmul.f32 %v2130_v21, %v5418_v41  ;;  %v2906_v12 = vstv %s5893_s21  ;;  %s5956_s26 = sld [smem:[#allocation6 + $0x46]] }
 0x2f5   : > { %v5851_v20 = vpop.permute.xlu2 %2236  ;;  %v2267_v26 = vstv %s5896_s30  ;;  %v2907_v62 = vmul.f32 %v2906_v12, %v5590_v59  ;;  %v3207_v49 = vstv %s5928_s0  ;;  %v2958_v19 = vstv %s5924_s29  ;;  %s5961_s28 = sld [smem:[#allocation6 + $0x43]] }
 0x2f6   : > { %v1966_v13 = vpop.permute.xlu0 %1965  ;;  %2831 = vrot.lane.b32.xlu1 %v2830_v3, %s4605_s24  ;;  %v2804_v35 = vsel %vm2718_vm15, %v2802_v11, %v2803_v24  ;;  %v2269_v56 = vmul.f32 %v2267_v26, %v5418_v41  ;;  %s5970_s21 = sld [smem:[#allocation6 + $0x65]] }
 0x2f7   : > { %s5988_s30 = sld [smem:[#allocation6 + $0x78]] }
 0x2f8   : > { %v1818_v15 = vpop.permute.xlu1 %1817  ;;  %v2274_v24 = vrot.slane %v2269_v56, 4  ;;  %s6005_s29 = sld [smem:[#allocation6 + $0x67]] }
 0x2f9   : > { %v1820_v42 = vadd.f32 %v1818_v15, %v1768_v33  ;;  %v1982_v33 = vmul.f32 %v1981_v1, %v5311_v4  ;;  %v1994_v15 = vmul.f32 %v1992_v29, %v5418_v41  ;;  %s6011_s0 = sld [smem:[#allocation6 + $0x57]] }
 0x2fb   : > { %v1864_v32 = vadd.f32 %v1862_v53, %v1820_v42  ;;  %2844 = vrot.lane.b32.xlu2 %v2843_v14, %s4605_s24  ;;  %v1986_v27 = vrot.slane %v1982_v33, 2  ;;  %v3055_v53 = vstv %s5873_s3  ;;  %v3216_v14 = vmul.f32 %v3215_v16, %v5898_v57  ;;  %s5952_s3 = sld [smem:[#allocation6 + $0x40]] }
 0x2fc   : > { %2695 = vrot.lane.b32.xlu0 %v2694_v54, %s4605_s24  ;;  %v3056_v40 = vmul.f32 %v3055_v53, %v5590_v59  ;;  %v3057_v42 = vmul.f32 %v3055_v53, %v5898_v57  ;;  %v1993_v54 = vmul.f32 %v1992_v29, %v5311_v4  ;;  %v1998_v58 = vrot.slane %v1994_v15, 2 }
 0x2fd   : > { %v1916_v60 = vadd.f32 %v5819_v10, %v1864_v32  ;;  %v2062_v38 = vpop.permute.xlu2 %2061  ;;  %v1988_v36 = vsel %vm1093_vm1, %v1986_v27, %v1987_v9  ;;  %v3176_v32 = vmul.f32 %v3175_v39, %v5898_v57  ;;  %v2268_v33 = vmul.f32 %v2267_v26, %v5311_v4 }
 0x2fe   : > { %v2023_v34 = vpop.permute.xlu0 %2022  ;;  %2656 = vrot.lane.b32.xlu1 %v2655_v47, %s4604_s23  ;;  %v3060_v61 = vrot.slane %v3056_v40, 7  ;;  %v3061_v55 = vrot.slane %v3057_v42, 7  ;;  %v1997_v47 = vrot.slane %v1993_v54, 2  ;;  %v2932_v27 = vstv %s5934_s25  ;;  %s6019_s25 = sld [smem:[#allocation6 + $0x89]] }
 0x2ff   : > { %v1968_v51 = vadd.f32 %v1966_v13, %v1916_v60  ;;  %v2025_v10 = vadd.f32 %v2023_v34, %v1979_v28  ;;  %v2856_v13 = vsel %vm2718_vm15, %v2854_v63, %v2855_v6  ;;  %v2908_v60 = vmul.f32 %v2906_v12, %v5898_v57 }
 0x300   : > { %v2172_v25 = vpop.permute.xlu1 %2171  ;;  %v2136_v28 = vrot.slane %v2132_v50, 3  ;;  %v3062_v22 = vsel %vm3015_vm0, %v3060_v61, %v3061_v55  ;;  %v2416_v15 = vstv %s5945_s2  ;;  %v2141_v39 = vstv %s5941_s1  ;;  %s6028_s1 = sld [smem:[#allocation6 + $0x68]] }
 0x301   : > { %v2012_v3 = vadd.f32 %v2010_v30, %v1968_v51  ;;  %v2077_v23 = vadd.f32 %v5778_v45, %v2025_v10  ;;  %v1990_v45 = vadd.f32 %v1988_v36, %v5795_v0  ;;  %v2131_v0 = vmul.f32 %v2130_v21, %v5311_v4  ;;  %s6046_s2 = sld [smem:[#allocation6 + $0x7b]] }
 0x302   : > { %v1999_v51 = vsel %vm1093_vm1, %v1997_v47, %v1998_v58  ;;  %v2911_v10 = vrot.slane %v2907_v62, 6  ;;  %v2912_v11 = vrot.slane %v2908_v60, 6  ;;  %v2960_v36 = vmul.f32 %v2958_v19, %v5898_v57 }
 0x303   : > { %v2064_v31 = vadd.f32 %v2062_v38, %v2012_v3  ;;  %v2128_v1 = vadd.f32 %v2126_v37, %v2077_v23  ;;  %2857 = vrot.lane.b32.xlu2 %v2856_v13, %s4605_s24  ;;  %v3107_v38 = vstv %s5905_s27  ;;  %v2135_v34 = vrot.slane %v2131_v0, 3  ;;  %s5992_s27 = sld [smem:[#allocation6 + $0x44]] }
 0x304   : > { %2805 = vrot.lane.b32.xlu0 %v2804_v35, %s4604_s23  ;;  %v3108_v63 = vmul.f32 %v3107_v38, %v5590_v59  ;;  %v3109_v6 = vmul.f32 %v3107_v38, %v5898_v57  ;;  %v2273_v23 = vrot.slane %v2268_v33, 4  ;;  %v2279_v37 = vstv %s5918_s20  ;;  %s5998_s20 = sld [smem:[#allocation6 + $0x41]] }
 0x305   : > { %v2174_v8 = vadd.f32 %v2172_v25, %v2128_v1  ;;  %v2114_v7 = vpop.permute.xlu2 %2113  ;;  %v2001_v25 = vadd.f32 %v1999_v51, %v5847_v18  ;;  %v2137_v21 = vsel %vm2123_vm12, %v2135_v34, %v2136_v28  ;;  %v3208_v1 = vmul.f32 %v3207_v49, %v5898_v57 }
 0x306   : > { %v5920_v43 = vadd.f32 %v2114_v7, %v2064_v31  ;;  %v2036_v44 = vpop.permute.xlu0 %2035  ;;  %2708 = vrot.lane.b32.xlu1 %v2707_v5, %s4605_s24  ;;  %v3112_v29 = vrot.slane %v3108_v63, 7  ;;  %v3113_v31 = vrot.slane %v3109_v6, 7  ;;  %v2913_v18 = vsel %vm2718_vm15, %v2911_v10, %v2912_v11 }
 0x307   : > { %v2038_v46 = vadd.f32 %v2036_v44, %v1990_v45  ;;  %v2959_v35 = vmul.f32 %v2958_v19, %v5590_v59  ;;  %v2275_v5 = vsel %vm2272_vm13, %v2273_v23, %v2274_v24  ;;  %v2281_v16 = vmul.f32 %v2279_v37, %v5418_v41 }
 0x308   : > { %v2224_v52 = vpop.permute.xlu1 %2223  ;;  %v2934_v7 = vmul.f32 %v2932_v27, %v5898_v57  ;;  %v2919_v0 = vstv %s5952_s3  ;;  %v2964_v12 = vrot.slane %v2960_v36, 6  ;;  %v3068_v58 = vstv %s5961_s28  ;;  %s6048_s3 = sld [smem:[#allocation6 + $0x6a]] }
 0x309   : > { %v2226_v30 = vadd.f32 %v2224_v52, %v2174_v8  ;;  %v2933_v8 = vmul.f32 %v2932_v27, %v5590_v59  ;;  %v2963_v50 = vrot.slane %v2959_v35, 6  ;;  %v2285_v54 = vrot.slane %v2281_v16, 4  ;;  %s6062_s28 = sld [smem:[#allocation6 + $0x8b]] }
 0x30a   : > { %v2920_v61 = vmul.f32 %v2919_v0, %v5590_v59  ;;  %v2142_v55 = vmul.f32 %v2141_v39, %v5311_v4  ;;  %v2938_v38 = vrot.slane %v2934_v7, 6  ;;  %v3069_v47 = vmul.f32 %v3068_v58, %v5590_v59 }
 0x30b   : > { %3218 = vrot.lane.b32.xlu2 %v3216_v14, %s4605_s24  ;;  %v2277_v42 = vadd.f32 %v2275_v5, %v2226_v30  ;;  %v3183_v14 = vstv %s5956_s26  ;;  %v2418_v30 = vmul.f32 %v2416_v15, %v5590_v59  ;;  %v2937_v60 = vrot.slane %v2933_v8, 6  ;;  %s6054_s26 = sld [smem:[#allocation6 + $0x88]] }
 0x30c   : > { %3178 = vrot.lane.b32.xlu0 %v3176_v32, %s4604_s23  ;;  %v2280_v32 = vmul.f32 %v2279_v37, %v5311_v4  ;;  %v3184_v62 = vmul.f32 %v3183_v14, %v5898_v57  ;;  %v2965_v28 = vsel %vm2718_vm15, %v2963_v50, %v2964_v12  ;;  %v3070_v33 = vmul.f32 %v3068_v58, %v5898_v57 }
 0x30d   : > { %v5947_v2 = vpop.permute.xlu2 %2346  ;;  %v2984_v34 = vstv %s5970_s21  ;;  %v2921_v63 = vmul.f32 %v2919_v0, %v5898_v57  ;;  %v2143_v51 = vmul.f32 %v2141_v39, %v5418_v41  ;;  %v2939_v11 = vsel %vm2718_vm15, %v2937_v60, %v2938_v38  ;;  %s6067_s21 = sld [smem:[#allocation6 + $0x7e]] }
 0x30e   : > { %v2088_v9 = vpop.permute.xlu0 %2087  ;;  %3063 = vrot.lane.b32.xlu1 %v3062_v22, %s4604_s23  ;;  %v2284_v22 = vrot.slane %v2280_v32, 4  ;;  %v2924_v19 = vrot.slane %v2920_v61, 6  ;;  %v2146_v23 = vrot.slane %v2142_v55, 3  ;;  %v2152_v35 = vstv %s5988_s30  ;;  %s6076_s30 = sld [smem:[#allocation6 + $0x6b]] }
 0x30f   : > { %v2090_v17 = vadd.f32 %v2088_v9, %v2038_v46  ;;  %v2422_v9 = vrot.slane %v2418_v30, 4  ;;  %v3081_v39 = vstv %s6005_s29  ;;  %v2290_v14 = vstv %s6011_s0  ;;  %s6108_s29 = sld [smem:[#allocation6 + $0x8f]] }
 0x310   : > { %v2049_v3 = vpop.permute.xlu1 %2048  ;;  %v2286_v24 = vsel %vm2272_vm13, %v2284_v22, %v2285_v54  ;;  %v2154_v50 = vmul.f32 %v2152_v35, %v5418_v41  ;;  %v3082_v54 = vmul.f32 %v3081_v39, %v5590_v59  ;;  %v3083_v58 = vmul.f32 %v3081_v39, %v5898_v57  ;;  %s6115_s0 = sld [smem:[#allocation6 + $0x8e]] }
 0x311   : > { %v2139_v13 = vadd.f32 %v2137_v21, %v2090_v17  ;;  %v2051_v53 = vadd.f32 %v2049_v3, %v2001_v25  ;;  %v2985_v17 = vmul.f32 %v2984_v34, %v5590_v59  ;;  %v2986_v25 = vmul.f32 %v2984_v34, %v5898_v57 }
 0x312   : > { %v3073_v21 = vrot.slane %v3069_v47, 7  ;;  %v3074_v3 = vrot.slane %v3070_v33, 7  ;;  %v2291_v38 = vmul.f32 %v2290_v14, %v5311_v4  ;;  %v2153_v47 = vmul.f32 %v2152_v35, %v5311_v4 }
 0x313   : > { %v2187_v45 = vadd.f32 %v5811_v48, %v2139_v13  ;;  %2914 = vrot.lane.b32.xlu2 %v2913_v18, %s4604_s23  ;;  %v3114_v48 = vsel %vm3015_vm0, %v3112_v29, %v3113_v31  ;;  %v2925_v13 = vrot.slane %v2921_v63, 6  ;;  %v2971_v18 = vstv %s5998_s20  ;;  %s6085_s20 = sld [smem:[#allocation6 + $0x8c]] }
 0x314   : > { %3210 = vrot.lane.b32.xlu0 %v3208_v1, %s4605_s24  ;;  %v2147_v1 = vrot.slane %v2143_v51, 3  ;;  %v2989_v5 = vrot.slane %v2985_v17, 6  ;;  %v2990_v16 = vrot.slane %v2986_v25, 6  ;;  %v2973_v0 = vmul.f32 %v2971_v18, %v5898_v57 }
 0x315   : > { %v5981_v40 = vpop.permute.xlu2 %2398  ;;  %v2239_v44 = vadd.f32 %v5851_v20, %v2187_v45  ;;  %v2417_v20 = vmul.f32 %v2416_v15, %v5418_v41  ;;  %v3075_v15 = vsel %vm3015_vm0, %v3073_v21, %v3074_v3  ;;  %v3086_v34 = vrot.slane %v3082_v54, 7 }
 0x316   : > { %v2321_v46 = vpop.permute.xlu0 %2320  ;;  %3115 = vrot.lane.b32.xlu1 %v3114_v48, %s4605_s24  ;;  %v2926_v48 = vsel %vm2718_vm15, %v2924_v19, %v2925_v13  ;;  %v2991_v32 = vsel %vm2718_vm15, %v2989_v5, %v2990_v16  ;;  %v3087_v22 = vrot.slane %v3083_v58, 7  ;;  %v2158_v63 = vrot.slane %v2154_v50, 3 }
 0x317   : > { %v2323_v52 = vadd.f32 %v2321_v46, %v2277_v42  ;;  %v2421_v6 = vrot.slane %v2417_v20, 4  ;;  %v2288_v37 = vadd.f32 %v2286_v24, %v2239_v44  ;;  %v2972_v44 = vmul.f32 %v2971_v18, %v5590_v59 }
 0x318   : > { %v2101_v26 = vpop.permute.xlu1 %2100  ;;  %v2148_v46 = vsel %vm2123_vm12, %v2146_v23, %v2147_v1  ;;  %v2157_v17 = vrot.slane %v2153_v47, 3  ;;  %v2295_v3 = vrot.slane %v2291_v38, 4  ;;  %v2301_v35 = vstv %s6046_s2  ;;  %s4283_s2 = sld [smem:[#allocation6 + $0x60]] }
 0x319   : > { %v2103_v56 = vadd.f32 %v2101_v26, %v2051_v53  ;;  %v3120_v53 = vstv %s5992_s27  ;;  %v2423_v29 = vsel %vm2272_vm13, %v2421_v6, %v2422_v9  ;;  %v2976_v55 = vrot.slane %v2972_v44, 6  ;;  %s6080_s27 = sld [smem:[#allocation6 + $0x36]] }
 0x31a   : > { %v3121_v8 = vmul.f32 %v3120_v53, %v5590_v59  ;;  %v3122_v7 = vmul.f32 %v3120_v53, %v5898_v57  ;;  %v3094_v39 = vstv %s6062_s28  ;;  %v2302_v44 = vmul.f32 %v2301_v35, %v5311_v4  ;;  %s6183_s28 = sld [smem:[#allocation6 + $0x1b]] }
 0x31b   : > { %2966 = vrot.lane.b32.xlu2 %v2965_v28, %s4605_s24  ;;  %v2150_v12 = vadd.f32 %v2148_v46, %v2103_v56  ;;  %v2997_v56 = vstv %s6019_s25  ;;  %v2292_v28 = vmul.f32 %v2290_v14, %v5418_v41  ;;  %v2449_v14 = vstv %s6067_s21  ;;  %s6122_s25 = sld [smem:[#allocation6 + $0x5a]] }
 0x31c   : > { %3186 = vrot.lane.b32.xlu0 %v3184_v62, %s4604_s23  ;;  %v3125_v20 = vrot.slane %v3121_v8, 7  ;;  %v3126_v30 = vrot.slane %v3122_v7, 7  ;;  %v2977_v62 = vrot.slane %v2973_v0, 6  ;;  %v2998_v9 = vmul.f32 %v2997_v56, %v5590_v59  ;;  %s6193_s21 = sld [smem:[#allocation6 + $0x84]] }
 0x31d   : > { %v2469_v10 = vpop.permute.xlu2 %2468  ;;  %v2999_v51 = vmul.f32 %v2997_v56, %v5898_v57  ;;  %v2296_v24 = vrot.slane %v2292_v28, 4  ;;  %v2451_v56 = vmul.f32 %v2449_v14, %v5590_v59  ;;  %vm3262_vm1 = vcmask 392192  }
 0x31e   : > { %v2373_v49 = vpop.permute.xlu0 %2372  ;;  %2940 = vrot.lane.b32.xlu1 %v2939_v11, %s4604_s23  ;;  %v3127_v6 = vsel %vm3015_vm0, %v3125_v20, %v3126_v30  ;;  %v2978_v11 = vsel %vm2718_vm15, %v2976_v55, %v2977_v62  ;;  %v2306_v20 = vrot.slane %v2302_v44, 4  ;;  %v2450_v62 = vmul.f32 %v2449_v14, %v5418_v41 }
 0x31f   : > { %v2375_v27 = vadd.f32 %v2373_v49, %v2323_v52  ;;  %v3088_v49 = vsel %vm3015_vm0, %v3086_v34, %v3087_v22  ;;  %v3003_v13 = vrot.slane %v2999_v51, 6  ;;  %v2297_v1 = vsel %vm2272_vm13, %v2295_v3, %v2296_v24 }
 0x320   : > { %v2334_v31 = vpop.permute.xlu1 %2333  ;;  %v2427_v38 = vstv %s6080_s27  ;;  %s4607_s27 = smov 48  }
 0x321   : > { %v2425_v36 = vadd.f32 %v2423_v29, %v2375_v27  ;;  %v2336_v45 = vadd.f32 %v2334_v31, %v2288_v37  ;;  %v2159_v27 = vsel %vm2123_vm12, %v2157_v17, %v2158_v63  ;;  %v3002_v37 = vrot.slane %v2998_v9, 6 }
 0x322   : > { %v2161_v29 = vadd.f32 %v2159_v27, %v5920_v43  ;;  %v3191_v31 = vstv %s6048_s3  ;;  %v2303_v43 = vmul.f32 %v2301_v35, %v5418_v41  ;;  %v2428_v24 = vmul.f32 %v2427_v38, %v5418_v41  ;;  %s4281_s3 = sld [smem:[#allocation6 + $0x18]] }
 0x323   : > { %v6030_v42 = vadd.f32 %v2469_v10, %v2425_v36  ;;  %3076 = vrot.lane.b32.xlu2 %v3075_v15, %s4604_s23  ;;  %v3133_v10 = vstv %s6028_s1  ;;  %v2945_v36 = vstv %s6054_s26  ;;  %v3192_v8 = vmul.f32 %v3191_v31, %v5898_v57  ;;  %s6128_s1 = sld [smem:[#allocation6 + $0x39]] }
 0x324   : > { %2927 = vrot.lane.b32.xlu0 %v2926_v48, %s4604_s23  ;;  %v3134_v19 = vmul.f32 %v3133_v10, %v5590_v59  ;;  %v3135_v21 = vmul.f32 %v3133_v10, %v5898_v57  ;;  %v3004_v7 = vsel %vm2718_vm15, %v3002_v37, %v3003_v13  ;;  %v2946_v0 = vmul.f32 %v2945_v36, %v5590_v59  ;;  %s4272_s26 = sld [smem:[#allocation6 + $0x81]] }
 0x325   : > { %v6040_v52 = vpop.permute.xlu2 %2520  ;;  %v2947_v46 = vmul.f32 %v2945_v36, %v5898_v57  ;;  %v2307_v58 = vrot.slane %v2303_v43, 4  ;;  %v2454_v10 = vrot.slane %v2450_v62, 4  ;;  %v2429_v17 = vmul.f32 %v2427_v38, %v5590_v59 }
 0x326   : > { %v2198_v26 = vpop.permute.xlu0 %2197  ;;  %2992 = vrot.lane.b32.xlu1 %v2991_v32, %s4605_s24  ;;  %v3138_v16 = vrot.slane %v3134_v19, 7  ;;  %v3139_v15 = vrot.slane %v3135_v21, 7  ;;  %v3095_v32 = vmul.f32 %v3094_v39, %v5590_v59  ;;  %v2950_v30 = vrot.slane %v2946_v0, 6 }
 0x327   : > { %v2200_v61 = vadd.f32 %v2198_v26, %v2150_v12  ;;  %v3223_v26 = vstv %s6076_s30  ;;  %v2308_v22 = vsel %vm2272_vm13, %v2306_v20, %v2307_v58  ;;  %v2432_v31 = vrot.slane %v2428_v24, 4  ;;  %s6197_s30 = sld [smem:[#allocation6 + $0x1e]] }
 0x328   : > { %v2386_v60 = vpop.permute.xlu1 %2385  ;;  %v3140_v12 = vsel %vm3015_vm0, %v3138_v16, %v3139_v15  ;;  %v3099_v47 = vrot.slane %v3095_v32, 7  ;;  %v3199_v36 = vstv %s6115_s0  ;;  %v2438_v16 = vstv %s6122_s25  ;;  %s6264_s0 = sld [smem:[#allocation6 + $0x66]] }
 0x329   : > { %v6056_v33 = vadd.f32 %v2386_v60, %v2336_v45  ;;  %v3146_v60 = vstv %s6085_s20  ;;  %v2439_v0 = vmul.f32 %v2438_v16, %v5418_v41  ;;  %s4295_s20 = sld [smem:[#allocation6 + $0x63]] }
 0x32a   : > { %v3147_v9 = vmul.f32 %v3146_v60, %v5590_v59  ;;  %v3148_v51 = vmul.f32 %v3146_v60, %v5898_v57  ;;  %s6282_s25 = sld [smem:[#allocation6 + $0x45]] }
 0x32b   : > { %3128 = vrot.lane.b32.xlu2 %v3127_v6, %s4605_s24 }
 0x32c   : > { %2979 = vrot.lane.b32.xlu0 %v2978_v11, %s4605_s24  ;;  %v2455_v11 = vrot.slane %v2451_v56, 4  ;;  %v3151_v37 = vrot.slane %v3147_v9, 7  ;;  %v3152_v13 = vrot.slane %v3148_v51, 7 }
 0x32d   : > { %v6069_v25 = vpop.permute.xlu2 %2630 }
 0x32e   : > { %v2250_v23 = vpop.permute.xlu0 %2249  ;;  %3089 = vrot.lane.b32.xlu1 %v3088_v49, %s4604_s23 }
 0x32f   : > { %v2252_v53 = vadd.f32 %v2250_v23, %v2200_v61  ;;  %v2951_v61 = vrot.slane %v2947_v46, 6  ;;  %v3231_v23 = vstv %s6108_s29  ;;  %v2440_v46 = vmul.f32 %v2438_v16, %v5590_v59  ;;  %s4306_s29 = sld [smem:[#allocation6 + $0x42]] }
 0x330   : > { %v2211_v18 = vpop.permute.xlu1 %2210  ;;  %v3232_v35 = vmul.f32 %v3231_v23, %v5898_v57 }
 0x331   : > { %v2299_v45 = vadd.f32 %v2297_v1, %v2252_v53  ;;  %v2213_v5 = vadd.f32 %v2211_v18, %v2161_v29  ;;  %v2952_v6 = vsel %vm2718_vm15, %v2950_v30, %v2951_v61  ;;  %v2456_v53 = vsel %vm2272_vm13, %v2454_v10, %v2455_v11 }
 0x332   : > { %v2433_v1 = vrot.slane %v2429_v17, 4  ;;  %v2736_v17 = vstv %s4283_s2  ;;  %s4294_s2 = sld [smem:[#allocation6 + $0x3f]] }
 0x333   : > { %v2349_v48 = vadd.f32 %v5947_v2, %v2299_v45  ;;  %3005 = vrot.lane.b32.xlu2 %v3004_v7, %s4605_s24  ;;  %v3096_v2 = vmul.f32 %v3094_v39, %v5898_v57  ;;  %v2576_v39 = vstv %s6128_s1  ;;  %s4308_s1 = sld [smem:[#allocation6 + $0x8a]] }
 0x334   : > { %3194 = vrot.lane.b32.xlu0 %v3192_v8, %s4604_s23  ;;  %v2434_v15 = vsel %vm2272_vm13, %v2432_v31, %v2433_v1  ;;  %v3200_v8 = vmul.f32 %v3199_v36, %v5898_v57  ;;  %v2577_v32 = vmul.f32 %v2576_v39, %v5418_v41  ;;  %v2523_v31 = vadd.f32 %v6040_v52, %v6030_v42 }
 0x335   : > { %v6098_v50 = vpop.permute.xlu2 %2682  ;;  %v6104_v54 = vadd.f32 %v5981_v40, %v2349_v48  ;;  %v3224_v40 = vmul.f32 %v3223_v26, %v5898_v57  ;;  %v3100_v34 = vrot.slane %v3096_v2, 7  ;;  %v2436_v7 = vadd.f32 %v2434_v15, %v6056_v33 }
 0x336   : > { %v2360_v4 = vpop.permute.xlu0 %2359  ;;  %3141 = vrot.lane.b32.xlu1 %v3140_v12, %s4605_s24  ;;  %v2578_v2 = vmul.f32 %v2576_v39, %v5590_v59  ;;  %v2444_v33 = vrot.slane %v2440_v46, 4  ;;  %v2581_v58 = vrot.slane %v2577_v32, 5  ;;  %v2713_v1 = vstv %s4281_s3 }
 0x337   : > { %v3101_v21 = vsel %vm3015_vm0, %v3099_v47, %v3100_v34  ;;  %v2715_v16 = vmul.f32 %v2713_v1, %v5590_v59 }
 0x338   : > { %v2263_v55 = vpop.permute.xlu1 %2262  ;;  %v2582_v26 = vrot.slane %v2578_v2, 5 }
 0x339   : > { %v2265_v28 = vadd.f32 %v2263_v55, %v2213_v5  ;;  %v3153_v5 = vsel %vm3015_vm0, %v3151_v37, %v3152_v13  ;;  %v2737_v13 = vmul.f32 %v2736_v17, %v5418_v41 }
 0x33a   : > { %v2583_v56 = vsel %vm2569_vm14, %v2581_v58, %v2582_v26 }
 0x33b   : > { %v2310_v63 = vadd.f32 %v2308_v22, %v2265_v28  ;;  %3226 = vrot.lane.b32.xlu2 %v3224_v40, %s4605_s24  ;;  %v2741_v15 = vrot.slane %v2737_v13, 6  ;;  %v692_v13 = vld [vmem:[%s6667_s10 + $0x8] sm:$0xff] }
 0x33c   : > { %2953 = vrot.lane.b32.xlu0 %v2952_v6, %s4604_s23 }
 0x33d   : > { %v2362_v49 = vadd.f32 %v2360_v4, %v2310_v63  ;;  %v2508_v19 = vpop.permute.xlu2 %2507  ;;  %v2443_v4 = vrot.slane %v2439_v0, 4  ;;  %v2720_v0 = vrot.slane %v2715_v16, 6 }
 0x33e   : > { %v2412_v3 = vpop.permute.xlu0 %2411  ;;  %3102 = vrot.lane.b32.xlu1 %v3101_v21, %s4604_s23 }
 0x33f   : > { %v2414_v27 = vadd.f32 %v2412_v3, %v2362_v49  ;;  %v2445_v61 = vsel %vm2272_vm13, %v2443_v4, %v2444_v33  ;;  %v2862_v33 = vstv %s6183_s28  ;;  %s4606_s28 = smov 24  }
 0x340   : > { %v6133_v29 = vpop.permute.xlu1 %2617  ;;  %v2447_v62 = vadd.f32 %v2445_v61, %v6104_v54  ;;  %v696_v61 = vld [vmem:[%s6667_s10 + $0x28] sm:$0xff] }
 0x341   : > { %v2458_v18 = vadd.f32 %v2456_v53, %v2414_v27  ;;  %v2738_v53 = vmul.f32 %v2736_v17, %v5590_v59  ;;  %3314 = vmatpush.msrb.mxu3 %v696_v61 }
 0x343   : > { %v2510_v45 = vadd.f32 %v2508_v19, %v2458_v18  ;;  %3234 = vrot.lane.b32.xlu2 %v3232_v35, %s4605_s24 }
 0x344   : > { %3154 = vrot.lane.b32.xlu0 %v3153_v5, %s4605_s24  ;;  %s4269_s24 = sld [smem:[#allocation6 + $0x15]]  ;;  %v2714_v5 = vmul.f32 %v2713_v1, %v5418_v41 }
 0x345   : > { %v2560_v43 = vpop.permute.xlu2 %2559 }
 0x346   : > { %v2482_v48 = vpop.permute.xlu0 %2481  ;;  %v6145_v44 = vadd.f32 %v2560_v43, %v2510_v45  ;;  %3202 = vrot.lane.b32.xlu1 %v3200_v8, %s4604_s23  ;;  %s4271_s23 = sld [smem:[#allocation6 + $0x5d]]  ;;  %v2742_v8 = vrot.slane %v2738_v53, 6 }
 0x347   : > { %v2484_v14 = vadd.f32 %v2482_v48, %v2436_v7  ;;  %v2719_v48 = vrot.slane %v2714_v5, 6 }
 0x348   : > { %v6150_v12 = vpop.permute.xlu1 %2669  ;;  %v2743_v46 = vsel %vm2718_vm15, %v2741_v15, %v2742_v8 }
 0x34a   : > { %v2564_v9 = vstv %s4269_s24  ;;  %s4282_s24 = sld [smem:[#allocation6 + $0x3c]] }
 0x34b   : > { %v2565_v11 = vmul.f32 %v2564_v9, %v5418_v41  ;;  %v2566_v24 = vmul.f32 %v2564_v9, %v5590_v59  ;;  %v688_v9 = vld [vmem:[%s6666_s9 + $0x18] sm:$0xff] }
 0x34c   : > { %v2587_v54 = vstv %s4271_s23  ;;  %s4317_s23 = sld [smem:[#allocation6 + $0x21]] }
 0x34d   : > { %v6154_v20 = vpop.permute.xlu2 %2792  ;;  %v2570_v3 = vrot.slane %v2565_v11, 5  ;;  %v2571_v23 = vrot.slane %v2566_v24, 5  ;;  %v2747_v11 = vstv %s6193_s21  ;;  %s6279_s21 = sld [smem:[#allocation6 + $0x87]] }
 0x34e   : > { %v2534_v30 = vpop.permute.xlu0 %2533 }
 0x34f   : > { %v2536_v55 = vadd.f32 %v2534_v30, %v2484_v14  ;;  %v2572_v36 = vsel %vm2569_vm14, %v2570_v3, %v2571_v23  ;;  %v2598_v14 = vstv %s4272_s26  ;;  %v690_v30 = vld [vmem:[%s6666_s9 + $0x28] sm:$0xff]  ;;  %v2748_v23 = vmul.f32 %v2747_v11, %v5418_v41  ;;  %s4609_s26 = smov 64  }
 0x350   : > { %v2495_v60 = vpop.permute.xlu1 %2494  ;;  %v2574_v7 = vadd.f32 %v2572_v36, %v2523_v31  ;;  %v2600_v26 = vmul.f32 %v2598_v14, %v5590_v59  ;;  %3285 = vmatpush.msra.mxu2 %v690_v30 }
 0x351   : > { %v2585_v38 = vadd.f32 %v2583_v56, %v2536_v55  ;;  %v2497_v28 = vadd.f32 %v2495_v60, %v2447_v62  ;;  %v2863_v55 = vmul.f32 %v2862_v33, %v5590_v59  ;;  %v2752_v8 = vrot.slane %v2748_v23, 6 }
 0x352   : > { %v2620_v52 = vadd.f32 %v6133_v29, %v2574_v7  ;;  %v2599_v29 = vmul.f32 %v2598_v14, %v5418_v41  ;;  %v3022_v23 = vstv %s4306_s29 }
 0x353   : > { %v2633_v40 = vadd.f32 %v6069_v25, %v2585_v38  ;;  %v2588_v25 = vmul.f32 %v2587_v54, %v5418_v41 }
 0x354   : > { %v2672_v2 = vadd.f32 %v6150_v12, %v2620_v52  ;;  %v2721_v12 = vsel %vm2718_vm15, %v2719_v48, %v2720_v0 }
 0x355   : > { %v6161_v47 = vadd.f32 %v6098_v50, %v2633_v40  ;;  %v6165_v22 = vpop.permute.xlu2 %2844  ;;  %v2589_v50 = vmul.f32 %v2587_v54, %v5590_v59  ;;  %v2592_v49 = vrot.slane %v2588_v25, 5  ;;  %v2604_v40 = vrot.slane %v2600_v26, 5  ;;  %v695_v54 = vld [vmem:[%s6667_s10 + $0x20] sm:$0xff] }
 0x356   : > { %v6163_v34 = vpop.permute.xlu0 %2766  ;;  %v2723_v56 = vadd.f32 %v2721_v12, %v2672_v2  ;;  %v2867_v25 = vrot.slane %v2863_v55, 6  ;;  %3315 = vmatpush.msrb.mxu3 %v695_v54  ;;  %v691_v26 = vld [vmem:[%s6667_s10] sm:$0xff] }
 0x357   : > { %v2593_v19 = vrot.slane %v2589_v50, 5 }
 0x358   : > { %v2547_v63 = vpop.permute.xlu1 %2546  ;;  %v2769_v38 = vadd.f32 %v6163_v34, %v2723_v56  ;;  %v694_v34 = vld [vmem:[%s6667_s10 + $0x18] sm:$0xff] }
 0x359   : > { %v2549_v27 = vadd.f32 %v2547_v63, %v2497_v28  ;;  %v2594_v18 = vsel %vm2569_vm14, %v2592_v49, %v2593_v19  ;;  %v2603_v28 = vrot.slane %v2599_v29, 5  ;;  %v689_v63 = vld [vmem:[%s6666_s9 + $0x20] sm:$0xff]  ;;  %v3010_v49 = vstv %s6197_s30  ;;  %v687_v19 = vld [vmem:[%s6666_s9 + $0x10] sm:$0xff]  ;;  %3316 = vmatpush.msrb.mxu3 %v694_v34  ;;  %s4319_s30 = sld [smem:[#allocation6 + $0x69]] }
 0x35a   : > { %3286 = vmatpush.msra.mxu2 %v689_v63  ;;  %v3011_v31 = vmul.f32 %v3010_v49, %v5590_v59  ;;  %v3012_v1 = vmul.f32 %v3010_v49, %v5898_v57 }
 0x35b   : > { %v2596_v45 = vadd.f32 %v2594_v18, %v2549_v27  ;;  %v2605_v3 = vsel %vm2569_vm14, %v2603_v28, %v2604_v40  ;;  %v2749_v27 = vmul.f32 %v2747_v11, %v5590_v59 }
 0x35c   : > { %3287 = vmatpush.msra.mxu2 %v688_v9  ;;  %v2607_v36 = vadd.f32 %v2605_v3, %v6145_v44  ;;  %v3017_v52 = vrot.slane %v3012_v1, 7 }
 0x35d   : > { %v6169_v51 = vpop.permute.xlu2 %2857  ;;  %v2753_v7 = vrot.slane %v2749_v27, 6 }
 0x35e   : > { %v6167_v6 = vpop.permute.xlu0 %2818  ;;  %3288 = vmatpush.msra.mxu2 %v687_v19 }
 0x35f   : > { %v2821_v17 = vadd.f32 %v6167_v6, %v2769_v38  ;;  %v686_v6 = vld [vmem:[%s6666_s9 + $0x8] sm:$0xff]  ;;  %v2754_v0 = vsel %vm2718_vm15, %v2752_v8, %v2753_v7 }
 0x360   : > { %v6171_v10 = vpop.permute.xlu1 %2779  ;;  %3289 = vmatpush.msra.mxu2 %v686_v6 }
 0x365   : > { %v6186_v35 = vpop.permute.xlu2 %3218 }
 0x366   : > { %v2644_v21 = vpop.permute.xlu0 %2643 }
 0x367   : > { %v2646_v43 = vadd.f32 %v2644_v21, %v2596_v45  ;;  %v693_v21 = vld [vmem:[%s6667_s10 + $0x10] sm:$0xff] }
 0x368   : > { %v6177_v37 = vpop.permute.xlu1 %2831  ;;  %3317 = vmatpush.msrb.mxu3 %v693_v21 }
 0x36a   : > { %3318 = vmatpush.msrb.mxu3 %v692_v13 }
 0x36c   : > { %3319 = vmatpush.msrb.mxu3 %v691_v26  ;;  %v2895_v26 = vstv %s6279_s21 }
 0x36d   : > { %v2915_v62 = vpop.permute.xlu2 %2914 }
 0x36e   : > { %v2696_v42 = vpop.permute.xlu0 %2695 }
 0x36f   : > { %v2698_v39 = vadd.f32 %v2696_v42, %v2646_v43  ;;  %v3016_v43 = vrot.slane %v3011_v31, 7 }
 0x370   : > { %v2657_v32 = vpop.permute.xlu1 %2656 }
 0x371   : > { %v2745_v4 = vadd.f32 %v2743_v46, %v2698_v39  ;;  %v2659_v15 = vadd.f32 %v2657_v32, %v2607_v36  ;;  %v3018_v46 = vsel %vm3015_vm0, %v3016_v43, %v3017_v52  ;;  %v685_v32 = vld [vmem:[%s6666_s9] sm:$0xff]  ;;  %v3024_v36 = vmul.f32 %v3022_v23, %v5898_v57 }
 0x372   : > { %3290 = vmatpush.msra.mxu2 %v685_v32 }
 0x373   : > { %v6200_v58 = vadd.f32 %v6154_v20, %v2745_v4  ;;  %v2864_v20 = vmul.f32 %v2862_v33, %v5898_v57  ;;  %v3159_v4 = vstv %s4317_s23  ;;  %v2725_v33 = vstv %s4282_s24  ;;  %s4320_s23 = sld [smem:[#allocation6 + $0x8d]] }
 0x374   : > { %v3160_v12 = vmul.f32 %v3159_v4, %v5898_v57  ;;  %v3028_v52 = vrot.slane %v3024_v36, 7 }
 0x375   : > { %v2868_v50 = vrot.slane %v2864_v20, 6  ;;  %v2967_v45 = vpop.permute.xlu2 %2966  ;;  %v2727_v20 = vmul.f32 %v2725_v33, %v5590_v59 }
 0x376   : > { %v2806_v60 = vpop.permute.xlu0 %2805 }
 0x377   : > { %v2869_v53 = vsel %vm2718_vm15, %v2867_v25, %v2868_v50  ;;  %v2731_v63 = vrot.slane %v2727_v20, 6  ;;  %v2873_v25 = vstv %s4294_s2  ;;  %v2884_v50 = vstv %s4295_s20  ;;  %s4608_s20 = smov 72  }
 0x378   : > { %v2709_v24 = vpop.permute.xlu1 %2708  ;;  %v2871_v18 = vadd.f32 %v2869_v53, %v2821_v17  ;;  %v2874_v34 = vmul.f32 %v2873_v25, %v5590_v59  ;;  %v2875_v17 = vmul.f32 %v2873_v25, %v5898_v57  ;;  %v2885_v19 = vmul.f32 %v2884_v50, %v5590_v59 }
 0x379   : > { %v2711_v48 = vadd.f32 %v2709_v24, %v2659_v15  ;;  %v2886_v21 = vmul.f32 %v2884_v50, %v5898_v57  ;;  %v2897_v20 = vmul.f32 %v2895_v26, %v5898_v57 }
 0x37a   : > { %v2917_v16 = vadd.f32 %v2915_v62, %v2871_v18  ;;  %v2726_v62 = vmul.f32 %v2725_v33, %v5418_v41  ;;  %v2878_v27 = vrot.slane %v2874_v34, 6  ;;  %v2879_v13 = vrot.slane %v2875_v17, 6 }
 0x37b   : > { %v2756_v44 = vadd.f32 %v2754_v0, %v2711_v48  ;;  %v2889_v31 = vrot.slane %v2885_v19, 6  ;;  %v2890_v1 = vrot.slane %v2886_v21, 6  ;;  %v2901_v34 = vrot.slane %v2897_v20, 6 }
 0x37c   : > { %v2969_v39 = vadd.f32 %v2967_v45, %v2917_v16  ;;  %v2730_v40 = vrot.slane %v2726_v62, 6  ;;  %v3033_v45 = vstv %s6264_s0  ;;  %v2880_v16 = vsel %vm2718_vm15, %v2878_v27, %v2879_v13  ;;  %s650_s0 = scalar_lea.vmem %s6676_s19, %s6690_s22 }
 0x37d   : > { %v2808_v61 = vadd.f32 %v2806_v60, %v2756_v44  ;;  %v3077_v60 = vpop.permute.xlu2 %3076  ;;  %v3034_v7 = vmul.f32 %v3033_v45, %v5590_v59  ;;  %v3035_v43 = vmul.f32 %v3033_v45, %v5898_v57  ;;  %v2896_v62 = vmul.f32 %v2895_v26, %v5590_v59 }
 0x37e   : > { %v3179_v5 = vpop.permute.xlu0 %3178  ;;  %v3020_v14 = vadd.f32 %v3018_v46, %v2969_v39  ;;  %v2732_v24 = vsel %vm2718_vm15, %v2730_v40, %v2731_v63 }
 0x37f   : > { %v6260_v28 = vadd.f32 %v6169_v51, %v2808_v61  ;;  %v2734_v51 = vadd.f32 %v2732_v24, %v6161_v47  ;;  %v3023_v47 = vmul.f32 %v3022_v23, %v5590_v59  ;;  %v3039_v4 = vrot.slane %v3035_v43, 7 }
 0x380   : > { %v3064_v42 = vpop.permute.xlu1 %3063  ;;  %v2900_v24 = vrot.slane %v2896_v62, 6 }
 0x381   : > { %v3066_v29 = vadd.f32 %v3064_v42, %v3020_v14  ;;  %v2782_v3 = vadd.f32 %v6171_v10, %v2734_v51  ;;  %v3027_v42 = vrot.slane %v3023_v47, 7 }
 0x382   : > { %v2902_v23 = vsel %vm2718_vm15, %v2900_v24, %v2901_v34  ;;  %v6335_v24 = vld [vmem:[%s6670_s13 + $0x70] sm:$0xff]  ;;  %v6342_v34 = vld [vmem:[%s6670_s13 + $0x68] sm:$0xff] }
 0x383   : > { %v2834_v53 = vadd.f32 %v6177_v37, %v2782_v3  ;;  %v2891_v37 = vsel %vm2718_vm15, %v2889_v31, %v2890_v1  ;;  %v3029_v14 = vsel %vm3015_vm0, %v3027_v42, %v3028_v52 }
 0x385   : > { %v3129_v10 = vpop.permute.xlu2 %3128  ;;  %v2882_v8 = vadd.f32 %v2880_v16, %v2834_v53 }
 0x386   : > { %v3211_v2 = vpop.permute.xlu0 %3210 }
 0x388   : > { %v3116_v30 = vpop.permute.xlu1 %3115 }
 0x389   : > { %v3118_v55 = vadd.f32 %v3116_v30, %v3066_v29  ;;  %v3163_v30 = vstv %s6282_s25 }
 0x38b   : > { %v3161_v56 = vadd.f32 %v3160_v12, %v3118_v55 }
 0x38d   : > { %v3181_v38 = vadd.f32 %v3179_v5, %v3161_v56  ;;  %v2847_v5 = vadd.f32 %v6165_v22, %v6200_v58  ;;  %v3006_v12 = vpop.permute.xlu2 %3005  ;;  %v3164_v56 = vmul.f32 %v3163_v30, %v5898_v57 }
 0x38e   : > { %v6262_v54 = vpop.permute.xlu0 %3186 }
 0x38f   : > { %v3213_v9 = vadd.f32 %v3211_v2, %v3181_v38  ;;  %v2893_v22 = vadd.f32 %v2891_v37, %v2847_v5  ;;  %v3038_v2 = vrot.slane %v3034_v7, 7 }
 0x390   : > { %v2941_v11 = vpop.permute.xlu1 %2940 }
 0x391   : > { %v3239_v41 = vmin.f32 %v3213_v9, 0.0  ;;  %vm3238_vm3 = vcmp.gt.f32.partialorder %v3213_v9, 0.0  ;;  %v2943_v46 = vadd.f32 %v2941_v11, %v2893_v22  ;;  %v3040_v55 = vsel %vm3015_vm0, %v3038_v2, %v3039_v4 }
 0x392   : > { %v3044_v11 = vstv %s4308_s1 }
 0x393   : > { %v3240_v49 = vmul.f32 1.442695, %v3239_v41  ;;  %v3046_v19 = vmul.f32 %v3044_v11, %v5898_v57 }
 0x395   : > { %4446 = vpow2.f32 %v3240_v49  ;;  %v3045_v49 = vmul.f32 %v3044_v11, %v5590_v59  ;;  %v3227_v53 = vpop.permute.xlu2 %3226  ;;  %v700_v11 = vld [vmem:[%s6669_s12 + $0x8] sm:$0xff] }
 0x396   : > { %v2928_v6 = vpop.permute.xlu0 %2927 }
 0x397   : > { %v2930_v58 = vadd.f32 %v2928_v6, %v2882_v8  ;;  %v2904_v6 = vadd.f32 %v2902_v23, %v6260_v28  ;;  %v3049_v1 = vrot.slane %v3045_v49, 7  ;;  %v6374_v49 = vld [vmem:[%s6670_s13 + $0x48] sm:$0xff] }
 0x398   : > { %v2993_v18 = vpop.permute.xlu1 %2992  ;;  %v6406_v23 = vld [vmem:[%s6670_s13 + $0x28] sm:$0xff] }
 0x399   : > { %v2995_v29 = vadd.f32 %v2993_v18, %v2943_v46  ;;  %v3050_v18 = vrot.slane %v3046_v19, 7  ;;  %v6382_v19 = vld [vmem:[%s6670_s13 + $0x40] sm:$0xff] }
 0x39b   : > { %v4447_v15 = vpop.eup %4446  ;;  %v3042_v40 = vadd.f32 %v3040_v55, %v2995_v29 }
 0x39c   : > { %v4329_v39 = vadd.f32 -1.0, %v4447_v15  ;;  %v3171_v15 = vstv %s4320_s23 }
 0x39d   : > { %v3172_v43 = vmul.f32 %v3171_v15, %v5898_v57 }
 0x39e   : > { %v2980_v48 = vpop.permute.xlu0 %2979  ;;  %v3243_v0 = vsel %vm3238_vm3, %v3213_v9, %v4329_v39  ;;  %v3167_v9 = vstv %s4319_s30  ;;  %s4611_s30 = smov 96  }
 0x39f   : > { %v2982_v44 = vadd.f32 %v2980_v48, %v2930_v58  ;;  %4333 = vmatmul.msk.f32.vlgmr.msra.gmra.mxu2 %vm3262_vm1, %v3243_v0  ;;  %4337 = vmatmul.msk.f32.vlgmr.msrb.gmra.mxu3 %vm3262_vm1, %v3243_v0  ;;  %v3235_v0 = vpop.permute.xlu2 %3234 }
 0x3a0   : > { %v3090_v33 = vpop.permute.xlu1 %3089 }
 0x3a1   : > { %v3031_v32 = vadd.f32 %v3029_v14, %v2982_v44  ;;  %v3092_v50 = vadd.f32 %v3090_v33, %v3042_v40 }
 0x3a3   : > { %v3079_v61 = vadd.f32 %v3077_v60, %v3031_v32  ;;  %v3168_v60 = vmul.f32 %v3167_v9, %v5898_v57  ;;  %v697_v9 = vld [vmem:[%s6668_s11] sm:$0xff] }
 0x3a5   : > { %v3131_v38 = vadd.f32 %v3129_v10, %v3079_v61 }
 0x3a6   : > { %v3195_v63 = vpop.permute.xlu0 %3194 }
 0x3a7   : > { %v3165_v25 = vadd.f32 %v3164_v56, %v3131_v38 }
 0x3a8   : > { %v3142_v41 = vpop.permute.xlu1 %3141 }
 0x3a9   : > { %v3144_v17 = vadd.f32 %v3142_v41, %v3092_v50  ;;  %v3189_v51 = vadd.f32 %v6262_v54, %v3165_v25  ;;  %v699_v25 = vld [vmem:[%s6669_s12] sm:$0xff]  ;;  %v698_v50 = vld [vmem:[%s6668_s11 + $0x8] sm:$0xff]  ;;  %v6330_v41 = vld [vmem:[%s6670_s13 + $0x78] sm:$0xff] }
 0x3aa   : > { %3443 = vmatpush.msra.mxu3 %v6330_v41  ;;  %3703 = vmatpush.msrb.mxu2 %v6330_v41 }
 0x3ab   : > { %v3169_v21 = vadd.f32 %v3168_v60, %v3144_v17  ;;  %v3221_v3 = vadd.f32 %v6186_v35, %v3189_v51  ;;  %v3051_v35 = vsel %vm3015_vm0, %v3049_v1, %v3050_v18  ;;  %v6350_v60 = vld [vmem:[%s6670_s13 + $0x60] sm:$0xff]  ;;  %v6358_v17 = vld [vmem:[%s6670_s13 + $0x58] sm:$0xff]  ;;  %v6366_v51 = vld [vmem:[%s6670_s13 + $0x50] sm:$0xff] }
 0x3ac   : > { %3444 = vmatpush.msra.mxu3 %v6335_v24  ;;  %3704 = vmatpush.msrb.mxu2 %v6335_v24 }
 0x3ad   : > { %v3197_v27 = vadd.f32 %v3195_v63, %v3169_v21  ;;  %v3245_v13 = vmin.f32 %v3221_v3, 0.0  ;;  %vm3244_vm4 = vcmp.gt.f32.partialorder %v3221_v3, 0.0  ;;  %v6390_v21 = vld [vmem:[%s6670_s13 + $0x38] sm:$0xff] }
 0x3ae   : > { %v2954_v31 = vpop.permute.xlu0 %2953  ;;  %3445 = vmatpush.msra.mxu3 %v6342_v34  ;;  %3705 = vmatpush.msrb.mxu2 %v6342_v34 }
 0x3af   : > { %v2956_v47 = vadd.f32 %v2954_v31, %v2904_v6  ;;  %v3246_v54 = vmul.f32 1.442695, %v3245_v13  ;;  %v3229_v36 = vadd.f32 %v3227_v53, %v3197_v27  ;;  %v6414_v53 = vld [vmem:[%s6670_s13 + $0x20] sm:$0xff] }
 0x3b0   : > { %v3103_v59 = vpop.permute.xlu1 %3102  ;;  %3446 = vmatpush.msra.mxu3 %v6350_v60  ;;  %3706 = vmatpush.msrb.mxu2 %v6350_v60 }
 0x3b1   : > { %v3008_v45 = vadd.f32 %v3006_v12, %v2956_v47  ;;  %4448 = vpow2.f32 %v3246_v54  ;;  %v3251_v5 = vmin.f32 %v3229_v36, 0.0  ;;  %vm3250_vm5 = vcmp.gt.f32.partialorder %v3229_v36, 0.0 }
 0x3b2   : > { %3447 = vmatpush.msra.mxu3 %v6358_v17  ;;  %3707 = vmatpush.msrb.mxu2 %v6358_v17 }
 0x3b3   : > { %v3053_v10 = vadd.f32 %v3051_v35, %v3008_v45  ;;  %v3252_v16 = vmul.f32 1.442695, %v3251_v5  ;;  %v6438_v45 = vld [vmem:[%s6670_s13 + $0x8] sm:$0xff]  ;;  %v6450_v5 = vld [vmem:[%s6670_s13] sm:$0xff] }
 0x3b4   : > { %3448 = vmatpush.msra.mxu3 %v6366_v51  ;;  %3708 = vmatpush.msrb.mxu2 %v6366_v51 }
 0x3b5   : > { %v3105_v37 = vadd.f32 %v3103_v59, %v3053_v10  ;;  %4450 = vpow2.f32 %v3252_v16  ;;  %v6431_v59 = vld [vmem:[%s6670_s13 + $0x10] sm:$0xff] }
 0x3b6   : > { %v3155_v28 = vpop.permute.xlu0 %3154  ;;  %3449 = vmatpush.msra.mxu3 %v6374_v49  ;;  %3709 = vmatpush.msrb.mxu2 %v6374_v49 }
 0x3b7   : > { %v4449_v8 = vpop.eup %4448  ;;  %v3157_v7 = vadd.f32 %v3155_v28, %v3105_v37 }
 0x3b8   : > { %v3203_v42 = vpop.permute.xlu1 %3202  ;;  %v4330_v52 = vadd.f32 -1.0, %v4449_v8  ;;  %3450 = vmatpush.msra.mxu3 %v6382_v19  ;;  %3710 = vmatpush.msrb.mxu2 %v6382_v19  ;;  %v6463_v8 = vld [vmem:[%s6671_s14] sm:$0x1] }
 0x3b9   : > { %v3173_v39 = vadd.f32 %v3172_v43, %v3157_v7 }
 0x3ba   : > { %v3249_v22 = vsel %vm3244_vm4, %v3221_v3, %v4330_v52  ;;  %v6398_v3 = vld [vmem:[%s6670_s13 + $0x30] sm:$0xff]  ;;  %3451 = vmatpush.msra.mxu3 %v6390_v21  ;;  %3711 = vmatpush.msrb.mxu2 %v6390_v21 }
 0x3bb   : > { %v4451_v58 = vpop.eup %4450  ;;  %v3205_v48 = vadd.f32 %v3203_v42, %v3173_v39  ;;  %4334 = vmatmul.msk.f32.gmra.mxu2 %vm3262_vm1, %v3249_v22  ;;  %4338 = vmatmul.msk.f32.gmra.mxu3 %vm3262_vm1, %v3249_v22 }
 0x3bc   : > { %v4331_v44 = vadd.f32 -1.0, %v4451_v58  ;;  %3452 = vmatpush.msra.mxu3 %v6398_v3  ;;  %3712 = vmatpush.msrb.mxu2 %v6398_v3 }
 0x3bd   : > { %v3237_v46 = vadd.f32 %v3235_v0, %v3205_v48 }
 0x3be   : > { %v3255_v4 = vsel %vm3250_vm5, %v3229_v36, %v4331_v44  ;;  %3453 = vmatpush.msra.mxu3 %v6406_v23  ;;  %3713 = vmatpush.msrb.mxu2 %v6406_v23  ;;  %v6426_v36 = vld [vmem:[%s6670_s13 + $0x18] sm:$0xff] }
 0x3bf   : > { %v3257_v14 = vmin.f32 %v3237_v46, 0.0  ;;  %vm3256_vm6 = vcmp.gt.f32.partialorder %v3237_v46, 0.0 }
 0x3c0   : > { %3454 = vmatpush.msra.mxu3 %v6414_v53  ;;  %3714 = vmatpush.msrb.mxu2 %v6414_v53 }
 0x3c1   : > { %v3258_v2 = vmul.f32 1.442695, %v3257_v14 }
 0x3c2   : > { %3455 = vmatpush.msra.mxu3 %v6426_v36  ;;  %3715 = vmatpush.msrb.mxu2 %v6426_v36 }
 0x3c3   : > { %4335 = vmatmul.msk.f32.gmra.mxu2 %vm3262_vm1, %v3255_v4  ;;  %4339 = vmatmul.msk.f32.gmra.mxu3 %vm3262_vm1, %v3255_v4  ;;  %4452 = vpow2.f32 %v3258_v2 }
 0x3c4   : > { %3456 = vmatpush.msra.mxu3 %v6431_v59  ;;  %3716 = vmatpush.msrb.mxu2 %v6431_v59 }
 0x3c6   : > { %3457 = vmatpush.msra.mxu3 %v6438_v45  ;;  %3717 = vmatpush.msrb.mxu2 %v6438_v45 }
 0x3c8   : > { %3458 = vmatpush.msra.mxu3 %v6450_v5  ;;  %3718 = vmatpush.msrb.mxu2 %v6450_v5 }
 0x3c9   : > { %v4453_v57 = vpop.eup %4452 }
 0x3ca   : > { %v4332_v33 = vadd.f32 -1.0, %v4453_v57 }
 0x3cc   : > { %v3261_v29 = vsel %vm3256_vm6, %v3237_v46, %v4332_v33 }
 0x3cd   : > { %4336 = vmatmul.msk.f32.gmra.mxu2 %vm3262_vm1, %v3261_v29  ;;  %4340 = vmatmul.msk.f32.gmra.mxu3 %vm3262_vm1, %v3261_v29 }
 0x422   : > { %v3292_v32 = vpop.f32.mrf.mxu2  ;;  %v3321_v26 = vpop.f32.mrf.mxu3 }
 0x423   : > { %v3333_v63 = vmax.f32 %v3292_v32, %v3321_v26 }
 0x43e   : > { %v3295_v30 = vpop.f32.mrf.mxu2  ;;  %v3324_v61 = vpop.f32.mrf.mxu3 }
 0x43f   : > { %v3334_v40 = vmax.f32 %v3295_v30, %v3324_v61 }
 0x446   : > { %v3298_v12 = vpop.f32.mrf.mxu2  ;;  %v3327_v55 = vpop.f32.mrf.mxu3 }
 0x447   : > { %v3335_v38 = vmax.f32 %v3298_v12, %v3327_v55  ;;  %v3440_v55 = vld [vmem:[%s6672_s15 + $0x38] sm:$0xff] }
 0x448   : > { %3516 = vmatpush.msrb.mxu3 %v3440_v55 }
 0x450   : > { %v3301_v62 = vpop.f32.mrf.mxu2  ;;  %v3330_v20 = vpop.f32.mrf.mxu3 }
 0x451   : > { %v3336_v56 = vmax.f32 %v3301_v62, %v3330_v20  ;;  %v3439_v62 = vld [vmem:[%s6672_s15 + $0x30] sm:$0xff]  ;;  %v3438_v20 = vld [vmem:[%s6672_s15 + $0x28] sm:$0xff] }
 0x452   : > { %3517 = vmatpush.msrb.mxu3 %v3439_v62 }
 0x453   : > { %3356 = vmatpush.msrb.mxu0 %v3336_v56  ;;  %3385 = vmatpush.msrb.mxu1 %v3336_v56  ;;  %v3437_v56 = vld [vmem:[%s6672_s15 + $0x20] sm:$0xff] }
 0x454   : > { %3518 = vmatpush.msrb.mxu3 %v3438_v20 }
 0x455   : > { %3357 = vmatpush.msrb.mxu0 %v3335_v38  ;;  %3386 = vmatpush.msrb.mxu1 %v3335_v38  ;;  %v3436_v38 = vld [vmem:[%s6672_s15 + $0x18] sm:$0xff] }
 0x456   : > { %3519 = vmatpush.msrb.mxu3 %v3437_v56 }
 0x457   : > { %3358 = vmatpush.msrb.mxu0 %v3334_v40  ;;  %3387 = vmatpush.msrb.mxu1 %v3334_v40  ;;  %v3435_v40 = vld [vmem:[%s6672_s15 + $0x10] sm:$0xff] }
 0x458   : > { %3520 = vmatpush.msrb.mxu3 %v3436_v38 }
 0x459   : > { %3359 = vmatpush.msrb.mxu0 %v3333_v63  ;;  %3388 = vmatpush.msrb.mxu1 %v3333_v63  ;;  %v3434_v63 = vld [vmem:[%s6672_s15 + $0x8] sm:$0xff] }
 0x45a   : > { %4341 = vmatmul.msk.f32.vlgmr.msrb.gmra.mxu0 %vm3337_vm7, %v697_v9  ;;  %4343 = vmatmul.msk.f32.vlgmr.msrb.gmra.mxu1 %vm3337_vm7, %v699_v25 }
 0x45b   : > { %3571 = vmatpush.msra.mxu0 %v6330_v41  ;;  %3648 = vmatpush.msra.mxu1 %v3440_v55 }
 0x45c   : > { %3521 = vmatpush.msrb.mxu3 %v3435_v40 }
 0x45d   : > { %3572 = vmatpush.msra.mxu0 %v6335_v24  ;;  %3649 = vmatpush.msra.mxu1 %v3439_v62 }
 0x45e   : > { %3522 = vmatpush.msrb.mxu3 %v3434_v63 }
 0x45f   : > { %3573 = vmatpush.msra.mxu0 %v6342_v34  ;;  %3650 = vmatpush.msra.mxu1 %v3438_v20 }
 0x461   : > { %3574 = vmatpush.msra.mxu0 %v6350_v60  ;;  %3651 = vmatpush.msra.mxu1 %v3437_v56 }
 0x462   : > { %4342 = vmatmul.msk.f32.gmra.mxu0 %vm3337_vm7, %v698_v50  ;;  %4344 = vmatmul.msk.f32.gmra.mxu1 %vm3337_vm7, %v700_v11 }
 0x463   : > { %3575 = vmatpush.msra.mxu0 %v6358_v17  ;;  %3652 = vmatpush.msra.mxu1 %v3436_v38 }
 0x465   : > { %3576 = vmatpush.msra.mxu0 %v6366_v51  ;;  %3653 = vmatpush.msra.mxu1 %v3435_v40 }
 0x467   : > { %3577 = vmatpush.msra.mxu0 %v6374_v49  ;;  %3654 = vmatpush.msra.mxu1 %v3434_v63 }
 0x469   : > { %3578 = vmatpush.msra.mxu0 %v6382_v19 }
 0x46b   : > { %3579 = vmatpush.msra.mxu0 %v6390_v21 }
 0x46d   : > { %3580 = vmatpush.msra.mxu0 %v6398_v3 }
 0x46f   : > { %3581 = vmatpush.msra.mxu0 %v6406_v23 }
 0x471   : > { %3582 = vmatpush.msra.mxu0 %v6414_v53 }
 0x473   : > { %3583 = vmatpush.msra.mxu0 %v6426_v36 }
 0x475   : > { %3584 = vmatpush.msra.mxu0 %v6431_v59 }
 0x477   : > { %3585 = vmatpush.msra.mxu0 %v6438_v45 }
 0x479   : > { %3586 = vmatpush.msra.mxu0 %v6450_v5 }
 0x4d7   : > { %v3361_v27 = vpop.f32.mrf.mxu0  ;;  %v3390_v6 = vpop.f32.mrf.mxu1 }
 0x4d8   : > { %v3396_v13 = vmax.f32 %v3361_v27, %v3390_v6  ;;  %v3433_v6 = vld [vmem:[%s6672_s15] sm:$0xff] }
 0x4d9   : > { %3523 = vmatpush.msrb.mxu3 %v3433_v6  ;;  %3655 = vmatpush.msra.mxu1 %v3433_v6 }
 0x4da   : > { %v3399_v31 = vrot.slane %v3396_v13, 4 }
 0x4db   : > { %3835 = vmatpush.msrb.mxu1 %v6330_v41 }
 0x4dc   : > { %3400 = vrot.lane.b32.xlu0 %v3399_v31, %s4606_s28  ;;  %s4610_s28 = smov 32  }
 0x4dd   : > { %3836 = vmatpush.msrb.mxu1 %v6335_v24 }
 0x4df   : > { %v3364_v1 = vpop.f32.mrf.mxu0  ;;  %v3393_v18 = vpop.f32.mrf.mxu1  ;;  %3837 = vmatpush.msrb.mxu1 %v6342_v34 }
 0x4e0   : > { %v3397_v47 = vmax.f32 %v3364_v1, %v3393_v18 }
 0x4e1   : > { %3838 = vmatpush.msrb.mxu1 %v6350_v60 }
 0x4e2   : > { %v3407_v54 = vrot.slane %v3397_v47, 4  ;;  %3404 = vrot.lane.b32.xlu1 %v3397_v47, %s4607_s27 }
 0x4e3   : > { %3839 = vmatpush.msrb.mxu1 %v6358_v17 }
 0x4e4   : > { %3408 = vrot.lane.b32.xlu2 %v3407_v54, %s4608_s20 }
 0x4e5   : > { %3840 = vmatpush.msrb.mxu1 %v6366_v51 }
 0x4e7   : > { %3841 = vmatpush.msrb.mxu1 %v6374_v49 }
 0x4e9   : > { %3842 = vmatpush.msrb.mxu1 %v6382_v19 }
 0x4eb   : > { %3843 = vmatpush.msrb.mxu1 %v6390_v21 }
 0x4ed   : > { %3844 = vmatpush.msrb.mxu1 %v6398_v3 }
 0x4ef   : > { %3845 = vmatpush.msrb.mxu1 %v6406_v23  ;;  %v6522_v23 = vld [vmem:[%s6673_s16] sm:$0x1] }
 0x4f1   : > { %3846 = vmatpush.msrb.mxu1 %v6414_v53 }
 0x4f3   : > { %3847 = vmatpush.msrb.mxu1 %v6426_v36 }
 0x4f5   : > { %3848 = vmatpush.msrb.mxu1 %v6431_v59 }
 0x4f7   : > { %3849 = vmatpush.msrb.mxu1 %v6438_v45 }
 0x4f9   : > { %3850 = vmatpush.msrb.mxu1 %v6450_v5 }
 0x53e   : > { %v3409_v37 = vpop.permute.xlu2 %3408 }
 0x54e   : > { %v3401_v35 = vpop.permute.xlu0 %3400 }
 0x54f   : > { %v3412_v10 = vsel %vm3411_vm8, %v3396_v13, %v3401_v35 }
 0x554   : > { %v3405_v16 = vpop.permute.xlu1 %3404 }
 0x555   : > { %v3413_v15 = vsel %vm3262_vm1, %v3412_v10, %v3405_v16 }
 0x556   : > { %v6456_v28 = vsel %vm3414_vm9, %v3413_v15, %v3409_v37 }
 0x557   : > { %4345 = vmatmul.msk.f32.vlgmr.msra.gmra.mxu3 %vm1370_vm2, %v6456_v28 }
 0x558   : > { %3780 = vmatpush.msra.mxu3 %v3440_v55 }
 0x55a   : > { %3781 = vmatpush.msra.mxu3 %v3439_v62 }
 0x55c   : > { %3782 = vmatpush.msra.mxu3 %v3438_v20 }
 0x55e   : > { %3783 = vmatpush.msra.mxu3 %v3437_v56 }
 0x560   : > { %3784 = vmatpush.msra.mxu3 %v3436_v38 }
 0x562   : > { %3785 = vmatpush.msra.mxu3 %v3435_v40 }
 0x564   : > { %3786 = vmatpush.msra.mxu3 %v3434_v63 }
 0x566   : > { %3787 = vmatpush.msra.mxu3 %v3433_v6 }
 0x5da   : > { %v3460_v7 = vpop.f32.mrf.mxu3 }
 0x5db   : > { %v3461_v43 = vadd.f32 %v3460_v7, %v6463_v8 }
 0x5dd   : > { %4454 = vtanh.f32 %v3461_v43  ;;  %v4346_v52 = vmul.f32 -1.442695, %v3461_v43 }
 0x5df   : > { %4456 = vpow2.f32 %v4346_v52 }
 0x5e3   : > { %v4455_v42 = vpop.eup %4454 }
 0x5e4   : > { %3485 = vrot.lane.b32.xlu0 %v4455_v42, %s4609_s26 }
 0x5e5   : > { %v4457_v39 = vpop.eup %4456 }
 0x5e6   : > { %v3466_v22 = vadd.f32 1.0, %v4457_v39 }
 0x5e8   : > { %4458 = vrcp.f32 %v3466_v22  ;;  %v3478_v14 = vand.u32 2147483648, %v3466_v22  ;;  %vm3472_vm12 = vweird.f32 %v3466_v22  ;;  %v3476_v2 = vand.u32 2147483647, %v3466_v22 }
 0x5ea   : > { %v3479_v57 = vor.u32 1.1754944e-38, %v3478_v14  ;;  %vm3477_vm14 = vcmp.eq.f32.partialorder %v3476_v2, 8.507059e+37 }
 0x5ee   : > { %v4459_v58 = vpop.eup %4458 }
 0x5ef   : > { %v3468_v48 = vmul.f32 %v4459_v58, %v3466_v22  ;;  %vm3473_vm10 = vweird.f32 %v4459_v58 }
 0x5f0   : > { %vm3474_vm13 = vmor %vm3472_vm12, %vm3473_vm10 }
 0x5f1   : > { %v3469_v0 = vsub.f32 1.0, %v3468_v48 }
 0x5f3   : > { %v3470_v46 = vmul.f32 %v4459_v58, %v3469_v0 }
 0x5f5   : > { %v3471_v44 = vadd.f32 %v4459_v58, %v3470_v46 }
 0x5f7   : > { %v3475_v4 = vsel %vm3474_vm13, %v4459_v58, %v3471_v44 }
 0x5f8   : > { %v3480_v29 = vsel %vm3477_vm14, %v3479_v57, %v3475_v4 }
 0x5f9   : > { %v3483_v26 = vmul.f32 0.0, %v3480_v29 }
 0x656   : > { %v3486_v33 = vpop.permute.xlu0 %3485 }
 0x657   : > { %v3488_v32 = vmul.f32 %v3486_v33, %v3480_v29 }
 0x659   : > { %3490 = vrot.lane.b32.xlu1 %v3488_v32, %s4610_s28 }
 0x6cb   : > { %v3491_v30 = vpop.permute.xlu1 %3490 }
 0x6cc   : > { %v6468_v61 = vadd.f32 %v3491_v30, %v3483_v26 }
 0x6ce   : > { %4460 = vtanh.f32 %v6468_v61 }
 0x6d4   : > { %v4461_v12 = vpop.eup %4460 }
 0x6d5   : > { %3496 = vrot.lane.b32.xlu2 %v4461_v12, %s4609_s26 }
 0x72f   : > { %v3497_v9 = vpop.permute.xlu2 %3496 }
 0x730   : > { %v3499_v25 = vmul.f32 %v3497_v9, %v3480_v29 }
 0x732   : > { %v3565_v50 = vrot.slane %v3499_v25, 7  ;;  %3501 = vrot.lane.b32.xlu0 %v3499_v25, %s4610_s28 }
 0x734   : > { %v3567_v11 = vsel %vm1370_vm2, %v6456_v28, %v3565_v50 }
 0x735   : > { %v3569_v27 = vrot.slane %v3567_v11, 1 }
 0x737   : > { %3587 = vmatmul.f32.vlgmr.msra.gmra.mxu0 %v3569_v27 }
 0x7a4   : > { %v3502_v41 = vpop.permute.xlu0 %3501 }
 0x7a5   : > { %v3504_v24 = vsel %vm3337_vm7, %v3502_v41, 0.0 }
 0x7a6   : > { %4347 = vmatmul.msk.f32.vlgmr.msrb.gmra.mxu3 %vm1485_vm11, %v3504_v24 }
 0x7a7   : > { %3912 = vmatpush.msrb.mxu3 %v3440_v55 }
 0x7a9   : > { %3913 = vmatpush.msrb.mxu3 %v3439_v62 }
 0x7ab   : > { %3914 = vmatpush.msrb.mxu3 %v3438_v20 }
 0x7ad   : > { %3915 = vmatpush.msrb.mxu3 %v3437_v56 }
 0x7af   : > { %3916 = vmatpush.msrb.mxu3 %v3436_v38 }
 0x7b1   : > { %3917 = vmatpush.msrb.mxu3 %v3435_v40 }
 0x7b3   : > { %3918 = vmatpush.msrb.mxu3 %v3434_v63 }
 0x7b4   : > { %v3588_v34 = vpop.f32.mrf.mxu0 }
 0x7b5   : > { %v3589_v60 = vadd.f32 %v3588_v34, %v6463_v8  ;;  %3919 = vmatpush.msrb.mxu3 %v3433_v6 }
 0x7b7   : > { %4462 = vtanh.f32 %v3589_v60  ;;  %v4349_v51 = vmul.f32 -1.442695, %v3589_v60 }
 0x7b9   : > { %4464 = vpow2.f32 %v4349_v51 }
 0x7bd   : > { %v4463_v17 = vpop.eup %4462 }
 0x7be   : > { %3613 = vrot.lane.b32.xlu2 %v4463_v17, %s4609_s26 }
 0x7bf   : > { %v4465_v49 = vpop.eup %4464 }
 0x7c0   : > { %v3594_v19 = vadd.f32 1.0, %v4465_v49 }
 0x7c2   : > { %4466 = vrcp.f32 %v3594_v19  ;;  %v3606_v54 = vand.u32 2147483648, %v3594_v19  ;;  %vm3600_vm0 = vweird.f32 %v3594_v19  ;;  %v3604_v36 = vand.u32 2147483647, %v3594_v19 }
 0x7c4   : > { %v3607_v5 = vor.u32 1.1754944e-38, %v3606_v54  ;;  %vm3605_vm3 = vcmp.eq.f32.partialorder %v3604_v36, 8.507059e+37 }
 0x7c8   : > { %v4467_v21 = vpop.eup %4466 }
 0x7c9   : > { %v3596_v3 = vmul.f32 %v4467_v21, %v3594_v19  ;;  %vm3601_vm15 = vweird.f32 %v4467_v21 }
 0x7ca   : > { %vm3602_vm1 = vmor %vm3600_vm0, %vm3601_vm15 }
 0x7cb   : > { %v3597_v13 = vsub.f32 1.0, %v3596_v3 }
 0x7cd   : > { %v3598_v1 = vmul.f32 %v4467_v21, %v3597_v13 }
 0x7cf   : > { %v3599_v18 = vadd.f32 %v4467_v21, %v3598_v1 }
 0x7d1   : > { %v3603_v59 = vsel %vm3602_vm1, %v4467_v21, %v3599_v18 }
 0x7d2   : > { %v3608_v35 = vsel %vm3605_vm3, %v3607_v5, %v3603_v59 }
 0x7d3   : > { %v3611_v2 = vmul.f32 %v3608_v35, %v6468_v61 }
 0x818   : > { %v3614_v45 = vpop.permute.xlu2 %3613 }
 0x819   : > { %v3616_v10 = vmul.f32 %v3614_v45, %v3608_v35 }
 0x829   : > { %v3525_v53 = vpop.f32.mrf.mxu3 }
 0x82a   : > { %v3526_v31 = vadd.f32 %v3525_v53, %v6522_v23 }
 0x82c   : > { %4468 = vtanh.f32 %v3526_v31  ;;  %v4348_v16 = vmul.f32 -1.442695, %v3526_v31 }
 0x82e   : > { %4470 = vpow2.f32 %v4348_v16 }
 0x832   : > { %v4469_v47 = vpop.eup %4468 }
 0x833   : > { %3550 = vrot.lane.b32.xlu1 %v4469_v47, %s4609_s26 }
 0x834   : > { %v4471_v15 = vpop.eup %4470 }
 0x835   : > { %v3531_v37 = vadd.f32 1.0, %v4471_v15 }
 0x837   : > { %4472 = vrcp.f32 %v3531_v37  ;;  %v3543_v22 = vand.u32 2147483648, %v3531_v37  ;;  %vm3537_vm5 = vweird.f32 %v3531_v37  ;;  %v3541_v58 = vand.u32 2147483647, %v3531_v37 }
 0x839   : > { %v3544_v0 = vor.u32 1.1754944e-38, %v3543_v22  ;;  %vm3542_vm8 = vcmp.eq.f32.partialorder %v3541_v58, 8.507059e+37 }
 0x83b   : > { %3618 = vrot.lane.b32.xlu1 %v3616_v10, %s4610_s28 }
 0x83d   : > { %v4473_v7 = vpop.eup %4472 }
 0x83e   : > { %v3533_v43 = vmul.f32 %v4473_v7, %v3531_v37  ;;  %vm3538_vm4 = vweird.f32 %v4473_v7 }
 0x83f   : > { %vm3539_vm6 = vmor %vm3537_vm5, %vm3538_vm4 }
 0x840   : > { %v3534_v42 = vsub.f32 1.0, %v3533_v43 }
 0x842   : > { %v3535_v52 = vmul.f32 %v4473_v7, %v3534_v42 }
 0x844   : > { %v3536_v39 = vadd.f32 %v4473_v7, %v3535_v52 }
 0x846   : > { %v3540_v48 = vsel %vm3539_vm6, %v4473_v7, %v3536_v39 }
 0x847   : > { %v3545_v44 = vsel %vm3542_vm8, %v3544_v0, %v3540_v48 }
 0x848   : > { %v3548_v29 = vmul.f32 0.0, %v3545_v44 }
 0x8a5   : > { %v3551_v46 = vpop.permute.xlu1 %3550 }
 0x8a6   : > { %v3553_v14 = vmul.f32 %v3551_v46, %v3545_v44 }
 0x8a8   : > { %3555 = vrot.lane.b32.xlu0 %v3553_v14, %s4610_s28 }
 0x8ad   : > { %v3619_v4 = vpop.permute.xlu1 %3618 }
 0x8ae   : > { %v6529_v57 = vadd.f32 %v3619_v4, %v3611_v2 }
 0x8b0   : > { %4474 = vtanh.f32 %v6529_v57 }
 0x8b6   : > { %v4475_v33 = vpop.eup %4474 }
 0x8b7   : > { %3624 = vrot.lane.b32.xlu0 %v4475_v33, %s4609_s26 }
 0x91a   : > { %v3556_v32 = vpop.permute.xlu0 %3555 }
 0x91b   : > { %v6533_v26 = vadd.f32 %v3556_v32, %v3548_v29 }
 0x91d   : > { %4476 = vtanh.f32 %v6533_v26 }
 0x923   : > { %v4477_v30 = vpop.eup %4476 }
 0x924   : > { %3561 = vrot.lane.b32.xlu2 %v4477_v30, %s4609_s26 }
 0x929   : > { %v3625_v12 = vpop.permute.xlu0 %3624 }
 0x92a   : > { %v3627_v55 = vmul.f32 %v3625_v12, %v3608_v35 }
 0x92c   : > { %v3697_v61 = vrot.slane %v3627_v55, 6  ;;  %3629 = vrot.lane.b32.xlu1 %v3627_v55, %s4610_s28 }
 0x92e   : > { %v3699_v62 = vsel %vm1370_vm2, %v6456_v28, %v3697_v61 }
 0x92f   : > { %v3701_v20 = vrot.slane %v3699_v62, 2 }
 0x931   : > { %3719 = vmatmul.f32.vlgmr.msrb.gmra.mxu2 %v3701_v20 }
 0x97e   : > { %v3562_v56 = vpop.permute.xlu2 %3561 }
 0x97f   : > { %v6540_v38 = vmul.f32 %v3562_v56, %v3545_v44 }
 0x981   : > { %3633 = vrot.lane.b32.xlu2 %v6540_v38, %s4609_s26 }
 0x99e   : > { %v3630_v25 = vpop.permute.xlu1 %3629 }
 0x9b4   : > { %v3720_v40 = vpop.f32.mrf.mxu2 }
 0x9b5   : > { %v3721_v63 = vadd.f32 %v3720_v40, %v6463_v8 }
 0x9b7   : > { %4478 = vtanh.f32 %v3721_v63  ;;  %v4352_v27 = vmul.f32 -1.442695, %v3721_v63 }
 0x9b9   : > { %4480 = vpow2.f32 %v4352_v27 }
 0x9bd   : > { %v4479_v9 = vpop.eup %4478 }
 0x9be   : > { %3745 = vrot.lane.b32.xlu1 %v4479_v9, %s4609_s26 }
 0x9bf   : > { %v4481_v6 = vpop.eup %4480 }
 0x9c0   : > { %v3726_v41 = vadd.f32 1.0, %v4481_v6 }
 0x9c2   : > { %4482 = vrcp.f32 %v3726_v41  ;;  %v3738_v3 = vand.u32 2147483648, %v3726_v41  ;;  %vm3732_vm10 = vweird.f32 %v3726_v41  ;;  %v3736_v13 = vand.u32 2147483647, %v3726_v41 }
 0x9c4   : > { %v3739_v1 = vor.u32 1.1754944e-38, %v3738_v3  ;;  %vm3737_vm13 = vcmp.eq.f32.partialorder %v3736_v13, 8.507059e+37 }
 0x9c8   : > { %v4483_v24 = vpop.eup %4482 }
 0x9c9   : > { %v3728_v34 = vmul.f32 %v4483_v24, %v3726_v41  ;;  %vm3733_vm9 = vweird.f32 %v4483_v24 }
 0x9ca   : > { %vm3734_vm12 = vmor %vm3732_vm10, %vm3733_vm9 }
 0x9cb   : > { %v3729_v60 = vsub.f32 1.0, %v3728_v34 }
 0x9cd   : > { %v3730_v49 = vmul.f32 %v4483_v24, %v3729_v60 }
 0x9cf   : > { %v3731_v19 = vadd.f32 %v4483_v24, %v3730_v49 }
 0x9d1   : > { %v3735_v53 = vsel %vm3734_vm12, %v4483_v24, %v3731_v19 }
 0x9d2   : > { %v3740_v18 = vsel %vm3737_vm13, %v3739_v1, %v3735_v53 }
 0x9d3   : > { %v3743_v22 = vmul.f32 %v3740_v18, %v6529_v57 }
 0x9db   : > { %v3634_v50 = vpop.permute.xlu2 %3633 }
 0x9dc   : > { %v3636_v11 = vsel %vm3337_vm7, %v3630_v25, %v3634_v50 }
 0x9dd   : > { %4350 = vmatmul.msk.f32.vlgmr.msra.gmra.mxu1 %vm1485_vm11, %v3636_v11 }
 0xa30   : > { %v3746_v31 = vpop.permute.xlu1 %3745 }
 0xa31   : > { %v3748_v47 = vmul.f32 %v3746_v31, %v3740_v18 }
 0xa5a   : > { %v3657_v17 = vpop.f32.mrf.mxu1 }
 0xa5b   : > { %v3658_v51 = vadd.f32 %v3657_v17, %v6522_v23 }
 0xa5d   : > { %4484 = vtanh.f32 %v3658_v51  ;;  %v4351_v54 = vmul.f32 -1.442695, %v3658_v51 }
 0xa5f   : > { %4486 = vpow2.f32 %v4351_v54 }
 0xa63   : > { %v4485_v21 = vpop.eup %4484 }
 0xa64   : > { %3682 = vrot.lane.b32.xlu0 %v4485_v21, %s4609_s26 }
 0xa65   : > { %v4487_v36 = vpop.eup %4486 }
 0xa66   : > { %v3663_v59 = vadd.f32 1.0, %v4487_v36 }
 0xa68   : > { %4488 = vrcp.f32 %v3663_v59  ;;  %v3675_v15 = vand.u32 2147483648, %v3663_v59  ;;  %vm3669_vm15 = vweird.f32 %v3663_v59  ;;  %v3673_v37 = vand.u32 2147483647, %v3663_v59 }
 0xa6a   : > { %v3676_v43 = vor.u32 1.1754944e-38, %v3675_v15  ;;  %vm3674_vm1 = vcmp.eq.f32.partialorder %v3673_v37, 8.507059e+37 }
 0xa6c   : > { %3750 = vrot.lane.b32.xlu0 %v3748_v47, %s4610_s28 }
 0xa6e   : > { %v4489_v45 = vpop.eup %4488 }
 0xa6f   : > { %v3665_v5 = vmul.f32 %v4489_v45, %v3663_v59  ;;  %vm3670_vm14 = vweird.f32 %v4489_v45 }
 0xa70   : > { %vm3671_vm0 = vmor %vm3669_vm15, %vm3670_vm14 }
 0xa71   : > { %v3666_v35 = vsub.f32 1.0, %v3665_v5 }
 0xa73   : > { %v3667_v10 = vmul.f32 %v4489_v45, %v3666_v35 }
 0xa75   : > { %v3668_v16 = vadd.f32 %v4489_v45, %v3667_v10 }
 0xa77   : > { %v3672_v7 = vsel %vm3671_vm0, %v4489_v45, %v3668_v16 }
 0xa78   : > { %v3677_v52 = vsel %vm3674_vm1, %v3676_v43, %v3672_v7  ;;  %vm4007_vm1 = vcmask 253952  }
 0xa79   : > { %v3680_v46 = vmul.f32 %v3677_v52, %v6533_v26 }
 0xad6   : > { %v3683_v42 = vpop.permute.xlu0 %3682 }
 0xad7   : > { %v3685_v39 = vmul.f32 %v3683_v42, %v3677_v52 }
 0xad9   : > { %3687 = vrot.lane.b32.xlu2 %v3685_v39, %s4610_s28 }
 0xade   : > { %v3751_v58 = vpop.permute.xlu0 %3750 }
 0xadf   : > { %v6553_v48 = vadd.f32 %v3751_v58, %v3743_v22 }
 0xae1   : > { %4490 = vtanh.f32 %v6553_v48 }
 0xae7   : > { %v4491_v0 = vpop.eup %4490 }
 0xae8   : > { %3756 = vrot.lane.b32.xlu2 %v4491_v0, %s4609_s26 }
 0xb33   : > { %v3688_v44 = vpop.permute.xlu2 %3687 }
 0xb34   : > { %v6558_v14 = vadd.f32 %v3688_v44, %v3680_v46 }
 0xb36   : > { %4492 = vtanh.f32 %v6558_v14 }
 0xb3c   : > { %v4493_v2 = vpop.eup %4492 }
 0xb3d   : > { %3693 = vrot.lane.b32.xlu1 %v4493_v2, %s4609_s26 }
 0xb42   : > { %v3757_v4 = vpop.permute.xlu2 %3756 }
 0xb43   : > { %v3759_v57 = vmul.f32 %v3757_v4, %v3740_v18 }
 0xb45   : > { %v3829_v33 = vrot.slane %v3759_v57, 5  ;;  %3761 = vrot.lane.b32.xlu0 %v3759_v57, %s4610_s28 }
 0xb47   : > { %v3831_v29 = vsel %vm1370_vm2, %v6456_v28, %v3829_v33 }
 0xb48   : > { %v3833_v32 = vrot.slane %v3831_v29, 3 }
 0xb4a   : > { %3851 = vmatmul.f32.vlgmr.msrb.gmra.mxu1 %v3833_v32 }
 0xbaf   : > { %v3694_v30 = vpop.permute.xlu1 %3693 }
 0xbb0   : > { %v3696_v26 = vmul.f32 %v3694_v30, %v3677_v52 }
 0xbb2   : > { %3765 = vrot.lane.b32.xlu1 %v3696_v26, %s4609_s26 }
 0xbb7   : > { %v3762_v62 = vpop.permute.xlu0 %3761 }
 0xbc7   : > { %v3852_v12 = vpop.f32.mrf.mxu1 }
 0xbc8   : > { %v3853_v55 = vadd.f32 %v3852_v12, %v6463_v8 }
 0xbca   : > { %4494 = vtanh.f32 %v3853_v55  ;;  %v4355_v28 = vmul.f32 -1.442695, %v3853_v55 }
 0xbcc   : > { %4496 = vpow2.f32 %v4355_v28 }
 0xbd0   : > { %v4495_v61 = vpop.eup %4494 }
 0xbd1   : > { %3877 = vrot.lane.b32.xlu0 %v4495_v61, %s4609_s26 }
 0xbd2   : > { %v4497_v40 = vpop.eup %4496 }
 0xbd3   : > { %v3858_v63 = vadd.f32 1.0, %v4497_v40 }
 0xbd5   : > { %4498 = vrcp.f32 %v3858_v63  ;;  %v3870_v24 = vand.u32 2147483648, %v3858_v63  ;;  %vm3864_vm4 = vweird.f32 %v3858_v63  ;;  %v3868_v34 = vand.u32 2147483647, %v3858_v63 }
 0xbd7   : > { %v3871_v51 = vor.u32 1.1754944e-38, %v3870_v24  ;;  %vm3869_vm6 = vcmp.eq.f32.partialorder %v3868_v34, 8.507059e+37  ;;  %v3977_v24 = vld [vmem:[%s6674_s17 + $0x38] sm:$0xff]  ;;  %v3976_v34 = vld [vmem:[%s6674_s17 + $0x30] sm:$0xff] }
 0xbdb   : > { %v4499_v9 = vpop.eup %4498 }
 0xbdc   : > { %v3860_v25 = vmul.f32 %v4499_v9, %v3858_v63  ;;  %vm3865_vm3 = vweird.f32 %v4499_v9 }
 0xbdd   : > { %vm3866_vm5 = vmor %vm3864_vm4, %vm3865_vm3 }
 0xbde   : > { %v3861_v8 = vsub.f32 1.0, %v3860_v25  ;;  %v3984_v25 = vld [vmem:[%s6674_s17 + $0x70] sm:$0xff] }
 0xbe0   : > { %v3862_v27 = vmul.f32 %v4499_v9, %v3861_v8  ;;  %v3983_v8 = vld [vmem:[%s6674_s17 + $0x68] sm:$0xff] }
 0xbe2   : > { %v3863_v6 = vadd.f32 %v4499_v9, %v3862_v27  ;;  %v3980_v27 = vld [vmem:[%s6674_s17 + $0x50] sm:$0xff] }
 0xbe4   : > { %v3867_v60 = vsel %vm3866_vm5, %v4499_v9, %v3863_v6  ;;  %v3985_v9 = vld [vmem:[%s6674_s17 + $0x78] sm:$0xff]  ;;  %v3979_v6 = vld [vmem:[%s6674_s17 + $0x48] sm:$0xff] }
 0xbe5   : > { %v3872_v49 = vsel %vm3869_vm6, %v3871_v51, %v3867_v60  ;;  %3987 = vmatpush.msrb.mxu0 %v3985_v9  ;;  %v3975_v60 = vld [vmem:[%s6674_s17 + $0x28] sm:$0xff] }
 0xbe6   : > { %v3875_v16 = vmul.f32 %v3872_v49, %v6553_v48 }
 0xbe7   : > { %3988 = vmatpush.msrb.mxu0 %v3984_v25 }
 0xbe9   : > { %3989 = vmatpush.msrb.mxu0 %v3983_v8 }
 0xc24   : > { %v6568_v20 = vpop.permute.xlu1 %3765 }
 0xc25   : > { %v3768_v56 = vsel %vm3337_vm7, %v3762_v62, %v6568_v20 }
 0xc26   : > { %4353 = vmatmul.msk.f32.vlgmr.msra.gmra.mxu3 %vm1485_vm11, %v3768_v56 }
 0xc43   : > { %v3878_v17 = vpop.permute.xlu0 %3877 }
 0xc44   : > { %v3880_v19 = vmul.f32 %v3878_v17, %v3872_v49  ;;  %v3974_v17 = vld [vmem:[%s6674_s17 + $0x20] sm:$0xff] }
 0xca9   : > { %v3789_v50 = vpop.f32.mrf.mxu3 }
 0xcaa   : > { %v3790_v11 = vadd.f32 %v3789_v50, %v6522_v23  ;;  %v3982_v50 = vld [vmem:[%s6674_s17 + $0x60] sm:$0xff] }
 0xcab   : > { %3990 = vmatpush.msrb.mxu0 %v3982_v50 }
 0xcac   : > { %4500 = vtanh.f32 %v3790_v11  ;;  %v4354_v21 = vmul.f32 -1.442695, %v3790_v11  ;;  %v3981_v11 = vld [vmem:[%s6674_s17 + $0x58] sm:$0xff] }
 0xcad   : > { %3991 = vmatpush.msrb.mxu0 %v3981_v11 }
 0xcae   : > { %4502 = vpow2.f32 %v4354_v21 }
 0xcaf   : > { %3992 = vmatpush.msrb.mxu0 %v3980_v27 }
 0xcb1   : > { %3993 = vmatpush.msrb.mxu0 %v3979_v6 }
 0xcb2   : > { %v4501_v41 = vpop.eup %4500 }
 0xcb3   : > { %3814 = vrot.lane.b32.xlu2 %v4501_v41, %s4609_s26  ;;  %v3978_v41 = vld [vmem:[%s6674_s17 + $0x40] sm:$0xff] }
 0xcb4   : > { %v4503_v3 = vpop.eup %4502  ;;  %3994 = vmatpush.msrb.mxu0 %v3978_v41 }
 0xcb5   : > { %v3795_v13 = vadd.f32 1.0, %v4503_v3  ;;  %v3972_v3 = vld [vmem:[%s6674_s17 + $0x10] sm:$0xff] }
 0xcb6   : > { %3995 = vmatpush.msrb.mxu0 %v3977_v24 }
 0xcb7   : > { %4504 = vrcp.f32 %v3795_v13  ;;  %v3807_v54 = vand.u32 2147483648, %v3795_v13  ;;  %vm3801_vm9 = vweird.f32 %v3795_v13  ;;  %v3805_v36 = vand.u32 2147483647, %v3795_v13 }
 0xcb8   : > { %3996 = vmatpush.msrb.mxu0 %v3976_v34 }
 0xcb9   : > { %v3808_v45 = vor.u32 1.1754944e-38, %v3807_v54  ;;  %vm3806_vm12 = vcmp.eq.f32.partialorder %v3805_v36, 8.507059e+37 }
 0xcba   : > { %3997 = vmatpush.msrb.mxu0 %v3975_v60 }
 0xcbb   : > { %3882 = vrot.lane.b32.xlu2 %v3880_v19, %s4610_s28  ;;  %v3973_v19 = vld [vmem:[%s6674_s17 + $0x18] sm:$0xff] }
 0xcbc   : > { %3998 = vmatpush.msrb.mxu0 %v3974_v17 }
 0xcbd   : > { %v4505_v53 = vpop.eup %4504 }
 0xcbe   : > { %v3797_v31 = vmul.f32 %v4505_v53, %v3795_v13  ;;  %vm3802_vm8 = vweird.f32 %v4505_v53  ;;  %3999 = vmatpush.msrb.mxu0 %v3973_v19 }
 0xcbf   : > { %vm3803_vm10 = vmor %vm3801_vm9, %vm3802_vm8 }
 0xcc0   : > { %v3798_v1 = vsub.f32 1.0, %v3797_v31  ;;  %4000 = vmatpush.msrb.mxu0 %v3972_v3  ;;  %v3970_v31 = vld [vmem:[%s6674_s17] sm:$0xff] }
 0xcc2   : > { %v3799_v18 = vmul.f32 %v4505_v53, %v3798_v1 }
 0xcc4   : > { %v3800_v47 = vadd.f32 %v4505_v53, %v3799_v18 }
 0xcc6   : > { %v3804_v59 = vsel %vm3803_vm10, %v4505_v53, %v3800_v47  ;;  %v3971_v53 = vld [vmem:[%s6674_s17 + $0x8] sm:$0xff] }
 0xcc7   : > { %v3809_v35 = vsel %vm3806_vm12, %v3808_v45, %v3804_v59  ;;  %4001 = vmatpush.msrb.mxu0 %v3971_v53 }
 0xcc8   : > { %v3812_v43 = vmul.f32 %v3809_v35, %v6558_v14 }
 0xcc9   : > { %4002 = vmatpush.msrb.mxu0 %v3970_v31 }
 0xd0d   : > { %v3815_v5 = vpop.permute.xlu2 %3814 }
 0xd0e   : > { %v3817_v10 = vmul.f32 %v3815_v5, %v3809_v35  ;;  %v3986_v5 = vld [vmem:[%s6675_s18] sm:$0x1] }
 0xd10   : > { %3819 = vrot.lane.b32.xlu1 %v3817_v10, %s4610_s28 }
 0xd15   : > { %v3883_v15 = vpop.permute.xlu2 %3882 }
 0xd16   : > { %v3885_v37 = vadd.f32 %v3883_v15, %v3875_v16 }
 0xd18   : > { %4506 = vtanh.f32 %v3885_v37 }
 0xd1e   : > { %v4507_v7 = vpop.eup %4506 }
 0xd1f   : > { %3888 = vrot.lane.b32.xlu1 %v4507_v7, %s4609_s26 }
 0xd82   : > { %v3820_v42 = vpop.permute.xlu1 %3819 }
 0xd83   : > { %v6580_v52 = vadd.f32 %v3820_v42, %v3812_v43 }
 0xd85   : > { %4508 = vtanh.f32 %v6580_v52 }
 0xd8b   : > { %v4509_v39 = vpop.eup %4508 }
 0xd8c   : > { %3825 = vrot.lane.b32.xlu0 %v4509_v39, %s4609_s26 }
 0xd91   : > { %v3889_v22 = vpop.permute.xlu1 %3888 }
 0xd92   : > { %v3891_v58 = vmul.f32 %v3889_v22, %v3872_v49 }
 0xd94   : > { %3893 = vrot.lane.b32.xlu2 %v3891_v58, %s4610_s28 }
 0xdee   : > { %v3894_v46 = vpop.permute.xlu2 %3893 }
 0xdfe   : > { %v3826_v48 = vpop.permute.xlu0 %3825 }
 0xdff   : > { %v3828_v0 = vmul.f32 %v3826_v48, %v3809_v35 }
 0xe01   : > { %3897 = vrot.lane.b32.xlu0 %v3828_v0, %s4609_s26 }
 0xe73   : > { %v3898_v44 = vpop.permute.xlu0 %3897 }
 0xe74   : > { %v3900_v14 = vsel %vm3337_vm7, %v3894_v46, %v3898_v44 }
 0xe75   : > { %4356 = vmatmul.msk.f32.vlgmr.msrb.gmra.mxu3 %vm1485_vm11, %v3900_v14 }
 0xef8   : > { %v3921_v2 = vpop.f32.mrf.mxu3 }
 0xef9   : > { %v3922_v4 = vadd.f32 %v3921_v2, %v6522_v23 }
 0xefb   : > { %4510 = vtanh.f32 %v3922_v4  ;;  %v4357_v33 = vmul.f32 -1.442695, %v3922_v4 }
 0xefd   : > { %4512 = vpow2.f32 %v4357_v33 }
 0xf01   : > { %v4511_v57 = vpop.eup %4510 }
 0xf02   : > { %3946 = vrot.lane.b32.xlu1 %v4511_v57, %s4609_s26 }
 0xf03   : > { %v4513_v29 = vpop.eup %4512 }
 0xf04   : > { %v3927_v32 = vadd.f32 1.0, %v4513_v29 }
 0xf06   : > { %4514 = vrcp.f32 %v3927_v32  ;;  %v3939_v62 = vand.u32 2147483648, %v3927_v32  ;;  %vm3933_vm14 = vweird.f32 %v3927_v32  ;;  %v3937_v23 = vand.u32 2147483647, %v3927_v32 }
 0xf08   : > { %v3940_v28 = vor.u32 1.1754944e-38, %v3939_v62  ;;  %vm3938_vm0 = vcmp.eq.f32.partialorder %v3937_v23, 8.507059e+37 }
 0xf0a   : > { %3961 = vrot.lane.b32.xlu1 %v6540_v38, %s4610_s28 }
 0xf0c   : > { %v4515_v30 = vpop.eup %4514 }
 0xf0d   : > { %v3929_v26 = vmul.f32 %v4515_v30, %v3927_v32  ;;  %vm3934_vm13 = vweird.f32 %v4515_v30 }
 0xf0e   : > { %vm3935_vm15 = vmor %vm3933_vm14, %vm3934_vm13 }
 0xf0f   : > { %v3930_v12 = vsub.f32 1.0, %v3929_v26 }
 0xf11   : > { %v3931_v55 = vmul.f32 %v4515_v30, %v3930_v12 }
 0xf13   : > { %v3932_v61 = vadd.f32 %v4515_v30, %v3931_v55 }
 0xf15   : > { %v3936_v56 = vsel %vm3935_vm15, %v4515_v30, %v3932_v61 }
 0xf16   : > { %v3941_v38 = vsel %vm3938_vm0, %v3940_v28, %v3936_v56 }
 0xf17   : > { %v3944_v51 = vmul.f32 %v3941_v38, %v6580_v52 }
 0xf74   : > { %v3947_v40 = vpop.permute.xlu1 %3946 }
 0xf75   : > { %v3949_v63 = vmul.f32 %v3947_v40, %v3941_v38 }
 0xf77   : > { %3951 = vrot.lane.b32.xlu2 %v3949_v63, %s4610_s28 }
 0xf7c   : > { %v3962_v1 = vpop.permute.xlu1 %3961 }
 0xf7d   : > { %v3967_v54 = vsel %vm3337_vm7, %v3962_v1, %v6568_v20 }
 0xf7f   : > { %3964 = vrot.lane.b32.xlu2 %v3828_v0, %s4611_s30 }
 0xfd1   : > { %v3952_v49 = vpop.permute.xlu2 %3951 }
 0xfd2   : > { %v3954_v21 = vadd.f32 %v3952_v49, %v3944_v51 }
 0xfd4   : > { %4516 = vtanh.f32 %v3954_v21 }
 0xfd9   : > { %v3965_v18 = vpop.permute.xlu2 %3964 }
 0xfda   : > { %v4517_v13 = vpop.eup %4516  ;;  %v3968_v59 = vsel %vm1485_vm11, %v3967_v54, %v3965_v18 }
 0xfdb   : > { %3957 = vrot.lane.b32.xlu0 %v4517_v13, %s4609_s26 }
0x104d   : > { %v3958_v47 = vpop.permute.xlu0 %3957 }
0x104e   : > { %v3960_v36 = vmul.f32 %v3958_v47, %v3941_v38 }
0x1050   : > { %v3969_v45 = vsel %vm1370_vm2, %v3968_v59, %v3960_v36 }
0x1051   : > { %4003 = vmatmul.f32.vlgmr.msrb.gmra.mxu0 %v3969_v45 }
0x10ce   : > { %v4004_v35 = vpop.f32.mrf.mxu0 }
0x10cf   : > { %v4005_v10 = vadd.f32 %v4004_v35, %v3986_v5 }
0x10d1   : > { %4008 = vst.msk [vmem:[%s650_s0] sm:$0x1] %vm4007_vm1, %v4005_v10 }
0x10d2 PF: > { %s6688_s21 = sld [smem:[#allocation12_spill]] }
0x10d8   : > { %s32_s0 = sadd.s32 1, %s6688_s21  }
0x10d9   : > { %p29_p7 = scmp.ge.s32.totalorder %s32_s0, 4  }
0x10db   :  { %31 = sbr.rel (!%p29_p7) target bundleno = 8 (0x8), region = 143 }
0x10e0   :  { %4026 = vsyncpa [#allocation3], 1 }
0x10e1   :  { %4028 = vsyncpa [#allocation3 + $0x1], 1 }
0x10e2   :  { %4029 = vsyncpa [#allocation5], 1 }
0x10e3   :  { %4030 = vsyncpa [#allocation8], 1 }

</bundles_post_ra>
